<compile_context>
chip_gen: v7x
topology: tpu7x:2x2x1
jax: 0.10.0
libtpu: 0.0.40
codegen_flags: <defaults>
</compile_context>

<pallas_src>
import functools
import math

import jax
import jax.numpy as jnp
from jax.experimental import pallas as pl
from jax.experimental.pallas import tpu as pltpu


# ----------------------------------------------------------------------------- #
# In-kernel helpers
# ----------------------------------------------------------------------------- #
def _ln(x, g, b, eps):
    mean = jnp.mean(x, axis=-1, keepdims=True)
    c = x - mean
    var = jnp.mean(c * c, axis=-1, keepdims=True)
    return c * jax.lax.rsqrt(var + eps) * g + b


def _mha_core(q, k, v, mask, n_heads):
    """q:[Tq,D] k,v:[Tk,D] mask:[Tq,Tk] bool -> [Tq,D].  Per-head loop, f32 math."""
    _, D = q.shape
    dk = D // n_heads
    scale = 1.0 / math.sqrt(dk)
    neg = jnp.float32(jnp.finfo(jnp.float32).min)
    nt = (((1,), (1,)), ((), ()))              # contract last dims: A @ B^T
    parts = []
    for h in range(n_heads):
        lo, hi = h * dk, (h + 1) * dk
        s = jax.lax.dot_general(q[:, lo:hi], k[:, lo:hi], nt,
                                preferred_element_type=jnp.float32) * scale
        s = jnp.where(mask, s, neg)
        s = s - jnp.max(s, axis=-1, keepdims=True)
        e = jnp.exp(s)
        p = e * pl.reciprocal(jnp.sum(e, axis=-1, keepdims=True), approx=True)
        p = jnp.where(mask, p, 0.0)            # masked_fill(mask==0, 0.0) after softmax
        parts.append(jnp.dot(p, v[:, lo:hi], preferred_element_type=jnp.float32))
    return jnp.concatenate(parts, axis=-1)     # lane-dense [Tq, D]


# ----------------------------------------------------------------------------- #
# Fused sub-layer kernels
# ----------------------------------------------------------------------------- #
def _embed_pe_kernel(x_ref, w_ref, b_ref, pe_ref, o_ref, *, scale):
    x = x_ref[0].astype(jnp.bfloat16)                           # [T, F]
    y = jnp.dot(x, w_ref[...], preferred_element_type=jnp.float32) + b_ref[...]
    o_ref[0] = (y * scale + pe_ref[...]).astype(o_ref.dtype)


def _self_attn_block_kernel(x_ref, km_ref, g_ref, b_ref, wqkv_ref, bqkv_ref,
                            wo_ref, bo_ref, o_ref, *, n_heads, causal, eps):
    x = x_ref[0].astype(jnp.float32)                            # [T, D]
    T, D = x.shape
    xn = _ln(x, g_ref[...], b_ref[...], eps)
    qkv = jnp.dot(xn.astype(jnp.bfloat16), wqkv_ref[...],
                  preferred_element_type=jnp.float32) + bqkv_ref[...]   # [T, 3D]
    mask = jnp.broadcast_to(km_ref[0] > 0.0, (T, T))            # key-validity
    if causal:
        qi = jax.lax.broadcasted_iota(jnp.int32, (T, T), 0)
        ki = jax.lax.broadcasted_iota(jnp.int32, (T, T), 1)
        mask = jnp.logical_and(mask, ki <= qi)
    ctx = _mha_core(qkv[:, :D], qkv[:, D:2 * D], qkv[:, 2 * D:], mask, n_heads)
    out = jnp.dot(ctx.astype(jnp.bfloat16), wo_ref[...],
                  preferred_element_type=jnp.float32) + bo_ref[...]
    o_ref[0] = (x + out).astype(o_ref.dtype)                    # residual fused


def _cross_attn_block_kernel(x_ref, mem_ref, km_ref, g_ref, b_ref, wq_ref, bq_ref,
                             wkv_ref, bkv_ref, wo_ref, bo_ref, o_ref,
                             *, n_heads, eps):
    x = x_ref[0].astype(jnp.float32)                            # [Lq, D]
    mem = mem_ref[0].astype(jnp.float32)                        # [Tk, D]
    Lq, D = x.shape
    Tk = mem.shape[0]
    xn = _ln(x, g_ref[...], b_ref[...], eps)
    q = jnp.dot(xn.astype(jnp.bfloat16), wq_ref[...],
                preferred_element_type=jnp.float32) + bq_ref[...]
    kv = jnp.dot(mem.astype(jnp.bfloat16), wkv_ref[...],
                 preferred_element_type=jnp.float32) + bkv_ref[...]     # [Tk, 2D]
    mask = jnp.broadcast_to(km_ref[0] > 0.0, (Lq, Tk))
    ctx = _mha_core(q, kv[:, :D], kv[:, D:], mask, n_heads)
    out = jnp.dot(ctx.astype(jnp.bfloat16), wo_ref[...],
                  preferred_element_type=jnp.float32) + bo_ref[...]
    o_ref[0] = (x + out).astype(o_ref.dtype)


def _ffn_block_kernel(x_ref, g_ref, b_ref, w1_ref, b1_ref, w2_ref, b2_ref, o_ref, *, eps):
    x = x_ref[0].astype(jnp.float32)                            # [T, D]
    xn = _ln(x, g_ref[...], b_ref[...], eps)
    h = jnp.dot(xn.astype(jnp.bfloat16), w1_ref[...],
                preferred_element_type=jnp.float32) + b1_ref[...]
    h = jnp.maximum(h, 0.0)
    y = jnp.dot(h.astype(jnp.bfloat16), w2_ref[...],
                preferred_element_type=jnp.float32) + b2_ref[...]
    o_ref[0] = (x + y).astype(o_ref.dtype)


def _layernorm_kernel(x_ref, g_ref, b_ref, o_ref, *, eps):
    x = x_ref[0].astype(jnp.float32)
    o_ref[0] = _ln(x, g_ref[...], b_ref[...], eps).astype(o_ref.dtype)


def _ln_linear_kernel(x_ref, g_ref, b_ref, w_ref, bias_ref, o_ref, *, eps):
    x = x_ref[...].astype(jnp.float32)                          # [tm, D]
    xn = _ln(x, g_ref[...], b_ref[...], eps)
    y = jnp.dot(xn.astype(jnp.bfloat16), w_ref[...],
                preferred_element_type=jnp.float32) + bias_ref[...]
    o_ref[...] = y.astype(o_ref.dtype)


def _label_smoothing_kernel(x_ref, t_ref, o_ref, *, smoothing, padding_idx,
                            vocab, inv_norm):
    i = pl.program_id(0)

    @pl.when(i == 0)
    def _():
        o_ref[...] = jnp.zeros_like(o_ref)

    x = x_ref[...].astype(jnp.float32)                          # [tm, V]
    t = t_ref[...]                                              # [tm, 1] int32
    m = jnp.max(x, axis=-1, keepdims=True)
    lse = jnp.log(jnp.sum(jnp.exp(x - m), axis=-1, keepdims=True)) + m
    # logp = x - lse (never materialised over [tm, V] temporaries beyond x itself)
    sum_logp = jnp.sum(x, axis=-1, keepdims=True) - vocab * lse
    col = jax.lax.broadcasted_iota(jnp.int32, x.shape, 1)
    logp_t = jnp.sum(jnp.where(col == t, x, 0.0), axis=-1, keepdims=True) - lse

    confidence = 1.0 - smoothing
    low = smoothing / (vocab - 1)
    const = confidence * math.log(confidence) + (vocab - 1) * low * math.log(low)
    per_row = const - (confidence - low) * logp_t - low * sum_logp
    per_row = jnp.where(t == padding_idx, 0.0, per_row)
    o_ref[...] += jnp.sum(per_row, axis=0, keepdims=True)

    @pl.when(i == pl.num_programs(0) - 1)
    def _():
        o_ref[...] = o_ref[...] * inv_norm


# ----------------------------------------------------------------------------- #
# Kernel wrappers
# ----------------------------------------------------------------------------- #
_PAR1 = pltpu.CompilerParams(dimension_semantics=("parallel",))


def _row_tile(m, max_tile=256):
    if m % 8 != 0:
        return m
    t = min(max_tile, m)
    t -= t % 8
    while t >= 8 and m % t != 0:
        t -= 8
    return t if t >= 8 else m


def _col_tile(n, max_tile=512):
    if n % 128 != 0:
        return n
    t = min(max_tile, n)
    t -= t % 128
    while t >= 128 and n % t != 0:
        t -= 128
    return t if t >= 128 else n


def encoder_embed(x, w, b, pe, scale):
    B, T, F = x.shape
    D = w.shape[1]
    return pl.pallas_call(
        functools.partial(_embed_pe_kernel, scale=scale),
        out_shape=jax.ShapeDtypeStruct((B, T, D), jnp.float32),
        grid=(B,),
        in_specs=[
            pl.BlockSpec((1, T, F), lambda i: (i, 0, 0)),
            pl.BlockSpec((F, D), lambda i: (0, 0)),
            pl.BlockSpec((1, D), lambda i: (0, 0)),
            pl.BlockSpec((T, D), lambda i: (0, 0)),
        ],
        out_specs=pl.BlockSpec((1, T, D), lambda i: (i, 0, 0)),
        compiler_params=_PAR1,
    )(x, w, b, pe)


def self_attn_block(x, kmask, p, *, n_heads, causal):
    B, T, D = x.shape
    kern = functools.partial(_self_attn_block_kernel,
                             n_heads=n_heads, causal=causal, eps=1e-5)
    return pl.pallas_call(
        kern,
        out_shape=jax.ShapeDtypeStruct((B, T, D), jnp.float32),
        grid=(B,),
        in_specs=[
            pl.BlockSpec((1, T, D), lambda i: (i, 0, 0)),
            pl.BlockSpec((1, 1, T), lambda i: (i, 0, 0)),
            pl.BlockSpec((1, D), lambda i: (0, 0)),
            pl.BlockSpec((1, D), lambda i: (0, 0)),
            pl.BlockSpec((D, 3 * D), lambda i: (0, 0)),
            pl.BlockSpec((1, 3 * D), lambda i: (0, 0)),
            pl.BlockSpec((D, D), lambda i: (0, 0)),
            pl.BlockSpec((1, D), lambda i: (0, 0)),
        ],
        out_specs=pl.BlockSpec((1, T, D), lambda i: (i, 0, 0)),
        compiler_params=_PAR1,
    )(x, kmask, p["ln_g"], p["ln_b"], p["wqkv"], p["bqkv"], p["wo"], p["bo"])


def cross_attn_block(x, memory, kmask, p, *, n_heads):
    B, L, D = x.shape
    T = memory.shape[1]
    kern = functools.partial(_cross_attn_block_kernel, n_heads=n_heads, eps=1e-5)
    return pl.pallas_call(
        kern,
        out_shape=jax.ShapeDtypeStruct((B, L, D), jnp.float32),
        grid=(B,),
        in_specs=[
            pl.BlockSpec((1, L, D), lambda i: (i, 0, 0)),
            pl.BlockSpec((1, T, D), lambda i: (i, 0, 0)),
            pl.BlockSpec((1, 1, T), lambda i: (i, 0, 0)),
            pl.BlockSpec((1, D), lambda i: (0, 0)),
            pl.BlockSpec((1, D), lambda i: (0, 0)),
            pl.BlockSpec((D, D), lambda i: (0, 0)),
            pl.BlockSpec((1, D), lambda i: (0, 0)),
            pl.BlockSpec((D, 2 * D), lambda i: (0, 0)),
            pl.BlockSpec((1, 2 * D), lambda i: (0, 0)),
            pl.BlockSpec((D, D), lambda i: (0, 0)),
            pl.BlockSpec((1, D), lambda i: (0, 0)),
        ],
        out_specs=pl.BlockSpec((1, L, D), lambda i: (i, 0, 0)),
        compiler_params=_PAR1,
    )(x, memory, kmask, p["ln_g"], p["ln_b"], p["wq"], p["bq"],
      p["wkv"], p["bkv"], p["wo"], p["bo"])


def ffn_block(x, p):
    B, T, D = x.shape
    F = p["w1"].shape[1]
    return pl.pallas_call(
        functools.partial(_ffn_block_kernel, eps=1e-5),
        out_shape=jax.ShapeDtypeStruct((B, T, D), jnp.float32),
        grid=(B,),
        in_specs=[
            pl.BlockSpec((1, T, D), lambda i: (i, 0, 0)),
            pl.BlockSpec((1, D), lambda i: (0, 0)),
            pl.BlockSpec((1, D), lambda i: (0, 0)),
            pl.BlockSpec((D, F), lambda i: (0, 0)),
            pl.BlockSpec((1, F), lambda i: (0, 0)),
            pl.BlockSpec((F, D), lambda i: (0, 0)),
            pl.BlockSpec((1, D), lambda i: (0, 0)),
        ],
        out_specs=pl.BlockSpec((1, T, D), lambda i: (i, 0, 0)),
        compiler_params=_PAR1,
    )(x, p["ln_g"], p["ln_b"], p["w1"], p["b1"], p["w2"], p["b2"])


def layernorm3(x, g, b, eps=1e-5):
    B, T, D = x.shape
    return pl.pallas_call(
        functools.partial(_layernorm_kernel, eps=eps),
        out_shape=jax.ShapeDtypeStruct((B, T, D), jnp.float32),
        grid=(B,),
        in_specs=[
            pl.BlockSpec((1, T, D), lambda i: (i, 0, 0)),
            pl.BlockSpec((1, D), lambda i: (0, 0)),
            pl.BlockSpec((1, D), lambda i: (0, 0)),
        ],
        out_specs=pl.BlockSpec((1, T, D), lambda i: (i, 0, 0)),
        compiler_params=_PAR1,
    )(x, g, b)


def ln_linear(x2d, g, b, w, bias, eps=1e-5):
    """LayerNorm(x) @ w + bias, tiled over rows and output columns."""
    M, D = x2d.shape
    N = w.shape[1]
    tm = _row_tile(M, 256)
    tn = _col_tile(N, 512)
    return pl.pallas_call(
        functools.partial(_ln_linear_kernel, eps=eps),
        out_shape=jax.ShapeDtypeStruct((M, N), jnp.float32),
        grid=(M // tm, N // tn),
        in_specs=[
            pl.BlockSpec((tm, D), lambda i, j: (i, 0)),
            pl.BlockSpec((1, D), lambda i, j: (0, 0)),
            pl.BlockSpec((1, D), lambda i, j: (0, 0)),
            pl.BlockSpec((D, tn), lambda i, j: (0, j)),
            pl.BlockSpec((1, tn), lambda i, j: (0, j)),
        ],
        out_specs=pl.BlockSpec((tm, tn), lambda i, j: (i, j)),
        compiler_params=pltpu.CompilerParams(
            dimension_semantics=("parallel", "parallel")),
    )(x2d, g, b, w, bias)


def label_smoothing_loss(logits, target, smoothing, padding_idx=0):
    B, L, V = logits.shape
    N = B * L
    x = logits.reshape(N, V)
    t = target.reshape(N, 1).astype(jnp.int32)
    tm = _row_tile(N, 256)
    kern = functools.partial(_label_smoothing_kernel, smoothing=float(smoothing),
                             padding_idx=padding_idx, vocab=V,
                             inv_norm=1.0 / float(B))   # normalize_length=False
    out = pl.pallas_call(
        kern,
        out_shape=jax.ShapeDtypeStruct((1, 1), jnp.float32),
        grid=(N // tm,),
        in_specs=[
            pl.BlockSpec((tm, V), lambda i: (i, 0)),
            pl.BlockSpec((tm, 1), lambda i: (i, 0)),
        ],
        out_specs=pl.BlockSpec((1, 1), lambda i: (0, 0)),
        compiler_params=pltpu.CompilerParams(dimension_semantics=("arbitrary",)),
    )(x, t)
    return out[0, 0]


# ----------------------------------------------------------------------------- #
# Model glue (plain JAX around the fused Pallas kernels)
# ----------------------------------------------------------------------------- #
def positional_encoding(max_len, d_model):
    pos = jnp.arange(max_len, dtype=jnp.float32)[:, None]
    idx = jnp.arange(0, d_model, 2, dtype=jnp.float32)[None, :]
    div = jnp.exp(-jnp.log(10000.0) * idx / d_model)
    pe = jnp.zeros((max_len, d_model), jnp.float32)
    pe = pe.at[:, 0::2].set(jnp.sin(pos * div))
    pe = pe.at[:, 1::2].set(jnp.cos(pos * div))
    return pe


def encoder_forward(ep, inputs, inputs_length, cfg):
    B, T, _ = inputs.shape
    D = cfg["d_model"]
    # key-validity mask, [B, 1, T] (no [B,T,T] materialisation)
    kmask = (jnp.arange(T)[None, :] < inputs_length[:, None]).astype(jnp.float32)[:, None, :]
    x = encoder_embed(inputs, ep["embed_w"], ep["embed_b"], ep["pe"][:T], math.sqrt(D))
    for blk in ep["blocks"]:
        x = self_attn_block(x, kmask, blk["slf"], n_heads=cfg["n_heads"], causal=False)
        x = ffn_block(x, blk["ffn"])
    x = layernorm3(x, ep["after_g"], ep["after_b"])     # after_norm (normalize_before)
    return x, kmask


def decoder_forward(dp, target_in, target_length, memory, memory_mask, cfg):
    del target_length  # pad mask derived from pad token (= 0), as in otrans
    B, L = target_in.shape
    D, V = cfg["d_model"], cfg["vocab_size"]
    # token-embedding gather + PE add kept in plain JAX (single fused XLA op)
    x = jnp.take(dp["embed"], target_in, axis=0) * math.sqrt(D) + dp["pe"][:L][None, :, :]
    pad_mask = (target_in != 0).astype(jnp.float32)[:, None, :]   # [B, 1, L]
    for blk in dp["blocks"]:
        x = self_attn_block(x, pad_mask, blk["slf"], n_heads=cfg["n_heads"], causal=True)
        x = cross_attn_block(x, memory, memory_mask, blk["src"], n_heads=cfg["n_heads"])
        x = ffn_block(x, blk["ffn"])
    # after_norm fused into the tiled output projection
    logits = ln_linear(x.reshape(-1, D), dp["after_g"], dp["after_b"],
                       dp["out_w"], dp["out_b"]).reshape(B, L, V)
    return logits


def transformer_forward(params, inputs, inputs_length, targets, targets_length, cfg):
    enc_states, enc_mask = encoder_forward(params["encoder"], inputs, inputs_length, cfg)
    target_in = targets[:, :-1]
    logits = decoder_forward(params["decoder"], target_in, targets_length,
                             enc_states, enc_mask, cfg)
    target_out = targets[:, 1:]
    return label_smoothing_loss(logits, target_out, cfg["smoothing"], padding_idx=0)


# ----------------------------------------------------------------------------- #
# Deterministic parameter init (matmul weights stored in bf16)
# ----------------------------------------------------------------------------- #
class KeyGen:
    def __init__(self, key):
        self.key = key

    def __call__(self):
        self.key, sub = jax.random.split(self.key)
        return sub


def _dense(kg, d_in, d_out, scale=0.02):
    w = (scale * jax.random.normal(kg(), (d_in, d_out), jnp.float32)).astype(jnp.bfloat16)
    b = jnp.zeros((1, d_out), jnp.float32)
    return w, b


def _ln_params(D):
    return jnp.ones((1, D), jnp.float32), jnp.zeros((1, D), jnp.float32)


def init_self_attn(kg, D):
    g, b = _ln_params(D)
    wqkv, bqkv = _dense(kg, D, 3 * D)
    wo, bo = _dense(kg, D, D)
    return {"ln_g": g, "ln_b": b, "wqkv": wqkv, "bqkv": bqkv, "wo": wo, "bo": bo}


def init_cross_attn(kg, D):
    g, b = _ln_params(D)
    wq, bq = _dense(kg, D, D)
    wkv, bkv = _dense(kg, D, 2 * D)
    wo, bo = _dense(kg, D, D)
    return {"ln_g": g, "ln_b": b, "wq": wq, "bq": bq,
            "wkv": wkv, "bkv": bkv, "wo": wo, "bo": bo}


def init_ffn(kg, D, F):
    g, b = _ln_params(D)
    w1, b1 = _dense(kg, D, F)
    w2, b2 = _dense(kg, F, D)
    return {"ln_g": g, "ln_b": b, "w1": w1, "b1": b1, "w2": w2, "b2": b2}


def init_params(key, cfg, max_len):
    kg = KeyGen(key)
    D = cfg["d_model"]
    ag, ab = _ln_params(D)

    embed_w, embed_b = _dense(kg, cfg["feat_dim"], D)
    enc_blocks = [{"slf": init_self_attn(kg, D),
                   "ffn": init_ffn(kg, D, cfg["enc_ffn_units"])}
                  for _ in range(cfg["num_enc_blocks"])]
    encoder = {"embed_w": embed_w, "embed_b": embed_b,
               "pe": positional_encoding(max_len, D),
               "blocks": enc_blocks, "after_g": ag, "after_b": ab}

    dec_blocks = [{"slf": init_self_attn(kg, D),
                   "src": init_cross_attn(kg, D),
                   "ffn": init_ffn(kg, D, cfg["dec_ffn_units"])}
                  for _ in range(cfg["num_dec_blocks"])]
    out_w, out_b = _dense(kg, D, cfg["vocab_size"])
    decoder = {"embed": 0.02 * jax.random.normal(kg(), (cfg["vocab_size"], D), jnp.float32),
               "pe": positional_encoding(max_len, D),
               "blocks": dec_blocks, "after_g": ag, "after_b": ab,
               "out_w": out_w, "out_b": out_b}   # share_embedding=False
    return {"encoder": encoder, "decoder": decoder}


# ----------------------------------------------------------------------------- #
if __name__ == "__main__":
    cfg = dict(
        feat_dim=32, d_model=64, n_heads=4,
        enc_ffn_units=128, num_enc_blocks=2,
        dec_ffn_units=128, num_dec_blocks=2,
        vocab_size=128, smoothing=0.1,
        enc_input_layer="linear", normalize_before=True, concat_after=False,
        activation="relu", share_embedding=False,
        pos_dropout_rate=0.0, slf_attn_dropout_rate=0.0, src_attn_dropout_rate=0.0,
        ffn_dropout_rate=0.0, residual_dropout_rate=0.0,
    )

    B, T_enc, L_tgt = 2, 16, 9
    key = jax.random.PRNGKey(0)
    k_param, k_in, k_tgt = jax.random.split(key, 3)

    params = init_params(k_param, cfg, max_len=64)

    inputs = jax.random.normal(k_in, (B, T_enc, cfg["feat_dim"]), jnp.float32)
    inputs_length = jnp.array([16, 12], jnp.int32)

    tokens = jax.random.randint(k_tgt, (B, L_tgt), 3, cfg["vocab_size"], dtype=jnp.int32)
    targets = tokens.at[1, 6:].set(0)          # pad tail of second sequence (pad id 0)
    targets_length = jnp.array([9, 6], jnp.int32)

    fwd = jax.jit(functools.partial(transformer_forward, cfg=cfg))
    loss = fwd(params, inputs, inputs_length, targets, targets_length)
    loss = jax.block_until_ready(loss)
    assert bool(jnp.isfinite(loss))
    print("KERNEL_OK")
</pallas_src>

<mosaic_0001>
module attributes {stable_mosaic.version = 11 : i64} {
  func.func @_self_attn_block_kernel(%arg0: i32, %arg1: memref<1x8x64xf32, #tpu.memory_space<vmem>>, %arg2: memref<1x1x8xf32, #tpu.memory_space<vmem>>, %arg3: memref<1x64xf32, #tpu.memory_space<vmem>>, %arg4: memref<1x64xf32, #tpu.memory_space<vmem>>, %arg5: memref<64x192xbf16, #tpu.memory_space<vmem>>, %arg6: memref<1x192xf32, #tpu.memory_space<vmem>>, %arg7: memref<64x64xbf16, #tpu.memory_space<vmem>>, %arg8: memref<1x64xf32, #tpu.memory_space<vmem>>, %arg9: memref<1x8x64xf32, #tpu.memory_space<vmem>>) attributes {dimension_semantics = [#tpu.dimension_semantics<parallel>], iteration_bounds = array<i64: 2>, scalar_prefetch = 0 : i64, scratch_operands = 0 : i64, tpu.core_type = #tpu.core_type<tc>, window_params = [{transform_indices = @transform_0, window_bounds = array<i64: 1, 8, 64>}, {transform_indices = @transform_1, window_bounds = array<i64: 1, 1, 8>}, {pipeline_mode = #tpu.pipeline_mode<synchronous>, transform_indices = @transform_2, window_bounds = array<i64: 1, 64>}, {pipeline_mode = #tpu.pipeline_mode<synchronous>, transform_indices = @transform_3, window_bounds = array<i64: 1, 64>}, {pipeline_mode = #tpu.pipeline_mode<synchronous>, transform_indices = @transform_4, window_bounds = array<i64: 64, 192>}, {pipeline_mode = #tpu.pipeline_mode<synchronous>, transform_indices = @transform_5, window_bounds = array<i64: 1, 192>}, {pipeline_mode = #tpu.pipeline_mode<synchronous>, transform_indices = @transform_6, window_bounds = array<i64: 64, 64>}, {pipeline_mode = #tpu.pipeline_mode<synchronous>, transform_indices = @transform_7, window_bounds = array<i64: 1, 64>}, {transform_indices = @transform_8, window_bounds = array<i64: 1, 8, 64>}]} {
    %c0 = arith.constant 0 : index
    %c0_0 = arith.constant 0 : index
    %c0_1 = arith.constant 0 : index
    %0 = vector.load %arg1[%c0, %c0_0, %c0_1] : memref<1x8x64xf32, #tpu.memory_space<vmem>>, vector<1x8x64xf32>
    %1 = vector.shape_cast %0 : vector<1x8x64xf32> to vector<8x64xf32>
    %c0_2 = arith.constant 0 : index
    %c0_3 = arith.constant 0 : index
    %2 = vector.load %arg3[%c0_2, %c0_3] : memref<1x64xf32, #tpu.memory_space<vmem>>, vector<1x64xf32>
    %c0_4 = arith.constant 0 : index
    %c0_5 = arith.constant 0 : index
    %3 = vector.load %arg4[%c0_4, %c0_5] : memref<1x64xf32, #tpu.memory_space<vmem>>, vector<1x64xf32>
    %cst = arith.constant dense<0.000000e+00> : vector<8xf32>
    %4 = vector.multi_reduction <add>, %1, %cst [1] : vector<8x64xf32> to vector<8xf32>
    %5 = vector.shape_cast %4 : vector<8xf32> to vector<8x1xf32>
    %cst_6 = arith.constant 6.400000e+01 : f32
    %6 = vector.broadcast %cst_6 : f32 to vector<8x1xf32>
    %7 = arith.divf %5, %6 : vector<8x1xf32>
    %8 = vector.broadcast %7 : vector<8x1xf32> to vector<8x64xf32>
    %9 = arith.subf %1, %8 : vector<8x64xf32>
    %10 = arith.mulf %9, %9 : vector<8x64xf32>
    %cst_7 = arith.constant dense<0.000000e+00> : vector<8xf32>
    %11 = vector.multi_reduction <add>, %10, %cst_7 [1] : vector<8x64xf32> to vector<8xf32>
    %12 = vector.shape_cast %11 : vector<8xf32> to vector<8x1xf32>
    %cst_8 = arith.constant 6.400000e+01 : f32
    %13 = vector.broadcast %cst_8 : f32 to vector<8x1xf32>
    %14 = arith.divf %12, %13 : vector<8x1xf32>
    %cst_9 = arith.constant 9.99999974E-6 : f32
    %15 = vector.broadcast %cst_9 : f32 to vector<8x1xf32>
    %16 = arith.addf %14, %15 : vector<8x1xf32>
    %17 = math.rsqrt %16 : vector<8x1xf32>
    %18 = vector.broadcast %17 : vector<8x1xf32> to vector<8x64xf32>
    %19 = arith.mulf %9, %18 : vector<8x64xf32>
    %20 = vector.broadcast %2 : vector<1x64xf32> to vector<8x64xf32>
    %21 = arith.mulf %19, %20 : vector<8x64xf32>
    %22 = vector.broadcast %3 : vector<1x64xf32> to vector<8x64xf32>
    %23 = arith.addf %21, %22 : vector<8x64xf32>
    %24 = arith.truncf %23 : vector<8x64xf32> to vector<8x64xbf16>
    %c0_10 = arith.constant 0 : index
    %c0_11 = arith.constant 0 : index
    %25 = vector.load %arg5[%c0_10, %c0_11] : memref<64x192xbf16, #tpu.memory_space<vmem>>, vector<64x192xbf16>
    %cst_12 = arith.constant dense<0.000000e+00> : vector<8x192xf32>
    %26 = tpu.matmul %24, %25, %cst_12 {dimension_numbers = #tpu.dot_dimension_numbers<[1], [0], [0], [1], [0, 0, 1, 1], [], []>} : vector<8x64xbf16>, vector<64x192xbf16>, vector<8x192xf32> -> vector<8x192xf32>
    %c0_13 = arith.constant 0 : index
    %c0_14 = arith.constant 0 : index
    %27 = vector.load %arg6[%c0_13, %c0_14] : memref<1x192xf32, #tpu.memory_space<vmem>>, vector<1x192xf32>
    %28 = vector.broadcast %27 : vector<1x192xf32> to vector<8x192xf32>
    %29 = arith.addf %26, %28 : vector<8x192xf32>
    %c0_15 = arith.constant 0 : index
    %c0_16 = arith.constant 0 : index
    %c0_17 = arith.constant 0 : index
    %30 = vector.load %arg2[%c0_15, %c0_16, %c0_17] : memref<1x1x8xf32, #tpu.memory_space<vmem>>, vector<1x1x8xf32>
    %31 = vector.shape_cast %30 : vector<1x1x8xf32> to vector<1x8xf32>
    %cst_18 = arith.constant 0.000000e+00 : f32
    %32 = vector.broadcast %cst_18 : f32 to vector<1x8xf32>
    %33 = arith.cmpf ogt, %31, %32 : vector<1x8xf32>
    %34 = vector.shape_cast %33 : vector<1x8xi1> to vector<1x8xi1>
    %35 = vector.broadcast %34 : vector<1x8xi1> to vector<8x8xi1>
    %36 = tpu.iota {dimensions = array<i32: 0>} : vector<8x8xi32>
    %37 = tpu.iota {dimensions = array<i32: 1>} : vector<8x8xi32>
    %38 = arith.cmpi sle, %37, %36 : vector<8x8xi32>
    %39 = arith.andi %35, %38 : vector<8x8xi1>
    %40 = vector.extract_strided_slice %29 {offsets = [0, 0], sizes = [8, 64], strides = [1, 1]} : vector<8x192xf32> to vector<8x64xf32>
    %41 = vector.extract_strided_slice %29 {offsets = [0, 64], sizes = [8, 64], strides = [1, 1]} : vector<8x192xf32> to vector<8x64xf32>
    %42 = vector.extract_strided_slice %29 {offsets = [0, 128], sizes = [8, 64], strides = [1, 1]} : vector<8x192xf32> to vector<8x64xf32>
    %43 = vector.extract_strided_slice %40 {offsets = [0, 0], sizes = [8, 16], strides = [1, 1]} : vector<8x64xf32> to vector<8x16xf32>
    %44 = vector.extract_strided_slice %41 {offsets = [0, 0], sizes = [8, 16], strides = [1, 1]} : vector<8x64xf32> to vector<8x16xf32>
    %cst_19 = arith.constant dense<0.000000e+00> : vector<8x8xf32>
    %45 = tpu.matmul %43, %44, %cst_19 {dimension_numbers = #tpu.dot_dimension_numbers<[1], [1], [0], [0], [0, 0, 1, 0], [], []>} : vector<8x16xf32>, vector<8x16xf32>, vector<8x8xf32> -> vector<8x8xf32>
    %cst_20 = arith.constant 2.500000e-01 : f32
    %46 = vector.broadcast %cst_20 : f32 to vector<8x8xf32>
    %47 = arith.mulf %45, %46 : vector<8x8xf32>
    %cst_21 = arith.constant -3.40282347E+38 : f32
    %48 = vector.broadcast %cst_21 : f32 to vector<8x8xf32>
    %49 = arith.select %39, %47, %48 : vector<8x8xi1>, vector<8x8xf32>
    %cst_22 = arith.constant dense<0xFF800000> : vector<8xf32>
    %50 = vector.multi_reduction <maximumf>, %49, %cst_22 [1] : vector<8x8xf32> to vector<8xf32>
    %51 = vector.shape_cast %50 : vector<8xf32> to vector<8x1xf32>
    %52 = vector.broadcast %51 : vector<8x1xf32> to vector<8x8xf32>
    %53 = arith.subf %49, %52 : vector<8x8xf32>
    %54 = math.exp %53 : vector<8x8xf32>
    %cst_23 = arith.constant dense<0.000000e+00> : vector<8xf32>
    %55 = vector.multi_reduction <add>, %54, %cst_23 [1] : vector<8x8xf32> to vector<8xf32>
    %56 = vector.shape_cast %55 : vector<8xf32> to vector<8x1xf32>
    %57 = tpu.reciprocal %56 {approx = true} : vector<8x1xf32> -> vector<8x1xf32>
    %58 = vector.broadcast %57 : vector<8x1xf32> to vector<8x8xf32>
    %59 = arith.mulf %54, %58 : vector<8x8xf32>
    %cst_24 = arith.constant 0.000000e+00 : f32
    %60 = vector.broadcast %cst_24 : f32 to vector<8x8xf32>
    %61 = arith.select %39, %59, %60 : vector<8x8xi1>, vector<8x8xf32>
    %62 = vector.extract_strided_slice %42 {offsets = [0, 0], sizes = [8, 16], strides = [1, 1]} : vector<8x64xf32> to vector<8x16xf32>
    %cst_25 = arith.constant dense<0.000000e+00> : vector<8x16xf32>
    %63 = tpu.matmul %61, %62, %cst_25 {dimension_numbers = #tpu.dot_dimension_numbers<[1], [0], [0], [1], [0, 0, 1, 1], [], []>} : vector<8x8xf32>, vector<8x16xf32>, vector<8x16xf32> -> vector<8x16xf32>
    %64 = vector.extract_strided_slice %40 {offsets = [0, 16], sizes = [8, 16], strides = [1, 1]} : vector<8x64xf32> to vector<8x16xf32>
    %65 = vector.extract_strided_slice %41 {offsets = [0, 16], sizes = [8, 16], strides = [1, 1]} : vector<8x64xf32> to vector<8x16xf32>
    %cst_26 = arith.constant dense<0.000000e+00> : vector<8x8xf32>
    %66 = tpu.matmul %64, %65, %cst_26 {dimension_numbers = #tpu.dot_dimension_numbers<[1], [1], [0], [0], [0, 0, 1, 0], [], []>} : vector<8x16xf32>, vector<8x16xf32>, vector<8x8xf32> -> vector<8x8xf32>
    %cst_27 = arith.constant 2.500000e-01 : f32
    %67 = vector.broadcast %cst_27 : f32 to vector<8x8xf32>
    %68 = arith.mulf %66, %67 : vector<8x8xf32>
    %cst_28 = arith.constant -3.40282347E+38 : f32
    %69 = vector.broadcast %cst_28 : f32 to vector<8x8xf32>
    %70 = arith.select %39, %68, %69 : vector<8x8xi1>, vector<8x8xf32>
    %cst_29 = arith.constant dense<0xFF800000> : vector<8xf32>
    %71 = vector.multi_reduction <maximumf>, %70, %cst_29 [1] : vector<8x8xf32> to vector<8xf32>
    %72 = vector.shape_cast %71 : vector<8xf32> to vector<8x1xf32>
    %73 = vector.broadcast %72 : vector<8x1xf32> to vector<8x8xf32>
    %74 = arith.subf %70, %73 : vector<8x8xf32>
    %75 = math.exp %74 : vector<8x8xf32>
    %cst_30 = arith.constant dense<0.000000e+00> : vector<8xf32>
    %76 = vector.multi_reduction <add>, %75, %cst_30 [1] : vector<8x8xf32> to vector<8xf32>
    %77 = vector.shape_cast %76 : vector<8xf32> to vector<8x1xf32>
    %78 = tpu.reciprocal %77 {approx = true} : vector<8x1xf32> -> vector<8x1xf32>
    %79 = vector.broadcast %78 : vector<8x1xf32> to vector<8x8xf32>
    %80 = arith.mulf %75, %79 : vector<8x8xf32>
    %cst_31 = arith.constant 0.000000e+00 : f32
    %81 = vector.broadcast %cst_31 : f32 to vector<8x8xf32>
    %82 = arith.select %39, %80, %81 : vector<8x8xi1>, vector<8x8xf32>
    %83 = vector.extract_strided_slice %42 {offsets = [0, 16], sizes = [8, 16], strides = [1, 1]} : vector<8x64xf32> to vector<8x16xf32>
    %cst_32 = arith.constant dense<0.000000e+00> : vector<8x16xf32>
    %84 = tpu.matmul %82, %83, %cst_32 {dimension_numbers = #tpu.dot_dimension_numbers<[1], [0], [0], [1], [0, 0, 1, 1], [], []>} : vector<8x8xf32>, vector<8x16xf32>, vector<8x16xf32> -> vector<8x16xf32>
    %85 = vector.extract_strided_slice %40 {offsets = [0, 32], sizes = [8, 16], strides = [1, 1]} : vector<8x64xf32> to vector<8x16xf32>
    %86 = vector.extract_strided_slice %41 {offsets = [0, 32], sizes = [8, 16], strides = [1, 1]} : vector<8x64xf32> to vector<8x16xf32>
    %cst_33 = arith.constant dense<0.000000e+00> : vector<8x8xf32>
    %87 = tpu.matmul %85, %86, %cst_33 {dimension_numbers = #tpu.dot_dimension_numbers<[1], [1], [0], [0], [0, 0, 1, 0], [], []>} : vector<8x16xf32>, vector<8x16xf32>, vector<8x8xf32> -> vector<8x8xf32>
    %cst_34 = arith.constant 2.500000e-01 : f32
    %88 = vector.broadcast %cst_34 : f32 to vector<8x8xf32>
    %89 = arith.mulf %87, %88 : vector<8x8xf32>
    %cst_35 = arith.constant -3.40282347E+38 : f32
    %90 = vector.broadcast %cst_35 : f32 to vector<8x8xf32>
    %91 = arith.select %39, %89, %90 : vector<8x8xi1>, vector<8x8xf32>
    %cst_36 = arith.constant dense<0xFF800000> : vector<8xf32>
    %92 = vector.multi_reduction <maximumf>, %91, %cst_36 [1] : vector<8x8xf32> to vector<8xf32>
    %93 = vector.shape_cast %92 : vector<8xf32> to vector<8x1xf32>
    %94 = vector.broadcast %93 : vector<8x1xf32> to vector<8x8xf32>
    %95 = arith.subf %91, %94 : vector<8x8xf32>
    %96 = math.exp %95 : vector<8x8xf32>
    %cst_37 = arith.constant dense<0.000000e+00> : vector<8xf32>
    %97 = vector.multi_reduction <add>, %96, %cst_37 [1] : vector<8x8xf32> to vector<8xf32>
    %98 = vector.shape_cast %97 : vector<8xf32> to vector<8x1xf32>
    %99 = tpu.reciprocal %98 {approx = true} : vector<8x1xf32> -> vector<8x1xf32>
    %100 = vector.broadcast %99 : vector<8x1xf32> to vector<8x8xf32>
    %101 = arith.mulf %96, %100 : vector<8x8xf32>
    %cst_38 = arith.constant 0.000000e+00 : f32
    %102 = vector.broadcast %cst_38 : f32 to vector<8x8xf32>
    %103 = arith.select %39, %101, %102 : vector<8x8xi1>, vector<8x8xf32>
    %104 = vector.extract_strided_slice %42 {offsets = [0, 32], sizes = [8, 16], strides = [1, 1]} : vector<8x64xf32> to vector<8x16xf32>
    %cst_39 = arith.constant dense<0.000000e+00> : vector<8x16xf32>
    %105 = tpu.matmul %103, %104, %cst_39 {dimension_numbers = #tpu.dot_dimension_numbers<[1], [0], [0], [1], [0, 0, 1, 1], [], []>} : vector<8x8xf32>, vector<8x16xf32>, vector<8x16xf32> -> vector<8x16xf32>
    %106 = vector.extract_strided_slice %40 {offsets = [0, 48], sizes = [8, 16], strides = [1, 1]} : vector<8x64xf32> to vector<8x16xf32>
    %107 = vector.extract_strided_slice %41 {offsets = [0, 48], sizes = [8, 16], strides = [1, 1]} : vector<8x64xf32> to vector<8x16xf32>
    %cst_40 = arith.constant dense<0.000000e+00> : vector<8x8xf32>
    %108 = tpu.matmul %106, %107, %cst_40 {dimension_numbers = #tpu.dot_dimension_numbers<[1], [1], [0], [0], [0, 0, 1, 0], [], []>} : vector<8x16xf32>, vector<8x16xf32>, vector<8x8xf32> -> vector<8x8xf32>
    %cst_41 = arith.constant 2.500000e-01 : f32
    %109 = vector.broadcast %cst_41 : f32 to vector<8x8xf32>
    %110 = arith.mulf %108, %109 : vector<8x8xf32>
    %cst_42 = arith.constant -3.40282347E+38 : f32
    %111 = vector.broadcast %cst_42 : f32 to vector<8x8xf32>
    %112 = arith.select %39, %110, %111 : vector<8x8xi1>, vector<8x8xf32>
    %cst_43 = arith.constant dense<0xFF800000> : vector<8xf32>
    %113 = vector.multi_reduction <maximumf>, %112, %cst_43 [1] : vector<8x8xf32> to vector<8xf32>
    %114 = vector.shape_cast %113 : vector<8xf32> to vector<8x1xf32>
    %115 = vector.broadcast %114 : vector<8x1xf32> to vector<8x8xf32>
    %116 = arith.subf %112, %115 : vector<8x8xf32>
    %117 = math.exp %116 : vector<8x8xf32>
    %cst_44 = arith.constant dense<0.000000e+00> : vector<8xf32>
    %118 = vector.multi_reduction <add>, %117, %cst_44 [1] : vector<8x8xf32> to vector<8xf32>
    %119 = vector.shape_cast %118 : vector<8xf32> to vector<8x1xf32>
    %120 = tpu.reciprocal %119 {approx = true} : vector<8x1xf32> -> vector<8x1xf32>
    %121 = vector.broadcast %120 : vector<8x1xf32> to vector<8x8xf32>
    %122 = arith.mulf %117, %121 : vector<8x8xf32>
    %cst_45 = arith.constant 0.000000e+00 : f32
    %123 = vector.broadcast %cst_45 : f32 to vector<8x8xf32>
    %124 = arith.select %39, %122, %123 : vector<8x8xi1>, vector<8x8xf32>
    %125 = vector.extract_strided_slice %42 {offsets = [0, 48], sizes = [8, 16], strides = [1, 1]} : vector<8x64xf32> to vector<8x16xf32>
    %cst_46 = arith.constant dense<0.000000e+00> : vector<8x16xf32>
    %126 = tpu.matmul %124, %125, %cst_46 {dimension_numbers = #tpu.dot_dimension_numbers<[1], [0], [0], [1], [0, 0, 1, 1], [], []>} : vector<8x8xf32>, vector<8x16xf32>, vector<8x16xf32> -> vector<8x16xf32>
    %127 = tpu.concatenate %63, %84, %105, %126 in 1 : vector<8x16xf32>, vector<8x16xf32>, vector<8x16xf32>, vector<8x16xf32> -> vector<8x64xf32>
    %128 = arith.truncf %127 : vector<8x64xf32> to vector<8x64xbf16>
    %c0_47 = arith.constant 0 : index
    %c0_48 = arith.constant 0 : index
    %129 = vector.load %arg7[%c0_47, %c0_48] : memref<64x64xbf16, #tpu.memory_space<vmem>>, vector<64x64xbf16>
    %cst_49 = arith.constant dense<0.000000e+00> : vector<8x64xf32>
    %130 = tpu.matmul %128, %129, %cst_49 {dimension_numbers = #tpu.dot_dimension_numbers<[1], [0], [0], [1], [0, 0, 1, 1], [], []>} : vector<8x64xbf16>, vector<64x64xbf16>, vector<8x64xf32> -> vector<8x64xf32>
    %c0_50 = arith.constant 0 : index
    %c0_51 = arith.constant 0 : index
    %131 = vector.load %arg8[%c0_50, %c0_51] : memref<1x64xf32, #tpu.memory_space<vmem>>, vector<1x64xf32>
    %132 = vector.broadcast %131 : vector<1x64xf32> to vector<8x64xf32>
    %133 = arith.addf %130, %132 : vector<8x64xf32>
    %134 = arith.addf %1, %133 : vector<8x64xf32>
    %c0_52 = arith.constant 0 : index
    %c0_53 = arith.constant 0 : index
    %c0_54 = arith.constant 0 : index
    %135 = vector.load %arg9[%c0_52, %c0_53, %c0_54] : memref<1x8x64xf32, #tpu.memory_space<vmem>>, vector<1x8x64xf32>
    %136 = vector.shape_cast %135 : vector<1x8x64xf32> to vector<8x64xf32>
    %137 = vector.shape_cast %134 : vector<8x64xf32> to vector<1x8x64xf32>
    tpu.vector_store %arg9[%c0_52, %c0_53, %c0_54], %137 {strides = array<i32>} : memref<1x8x64xf32, #tpu.memory_space<vmem>>, vector<1x8x64xf32>,
    return
  }
  func.func @transform_0(%arg0: i32) -> (i32, i32, i32) {
    %c0_i32 = arith.constant 0 : i32
    %c0_i32_0 = arith.constant 0 : i32
    %c0_i32_1 = arith.constant 0 : i32
    return %arg0, %c0_i32, %c0_i32_0 : i32, i32, i32
  }
  func.func @transform_1(%arg0: i32) -> (i32, i32, i32) {
    %c0_i32 = arith.constant 0 : i32
    %c0_i32_0 = arith.constant 0 : i32
    %c0_i32_1 = arith.constant 0 : i32
    return %arg0, %c0_i32, %c0_i32_0 : i32, i32, i32
  }
  func.func @transform_2(%arg0: i32) -> (i32, i32) {
    %c0_i32 = arith.constant 0 : i32
    %c0_i32_0 = arith.constant 0 : i32
    %c0_i32_1 = arith.constant 0 : i32
    return %c0_i32, %c0_i32_0 : i32, i32
  }
  func.func @transform_3(%arg0: i32) -> (i32, i32) {
    %c0_i32 = arith.constant 0 : i32
    %c0_i32_0 = arith.constant 0 : i32
    %c0_i32_1 = arith.constant 0 : i32
    return %c0_i32, %c0_i32_0 : i32, i32
  }
  func.func @transform_4(%arg0: i32) -> (i32, i32) {
    %c0_i32 = arith.constant 0 : i32
    %c0_i32_0 = arith.constant 0 : i32
    %c0_i32_1 = arith.constant 0 : i32
    return %c0_i32, %c0_i32_0 : i32, i32
  }
  func.func @transform_5(%arg0: i32) -> (i32, i32) {
    %c0_i32 = arith.constant 0 : i32
    %c0_i32_0 = arith.constant 0 : i32
    %c0_i32_1 = arith.constant 0 : i32
    return %c0_i32, %c0_i32_0 : i32, i32
  }
  func.func @transform_6(%arg0: i32) -> (i32, i32) {
    %c0_i32 = arith.constant 0 : i32
    %c0_i32_0 = arith.constant 0 : i32
    %c0_i32_1 = arith.constant 0 : i32
    return %c0_i32, %c0_i32_0 : i32, i32
  }
  func.func @transform_7(%arg0: i32) -> (i32, i32) {
    %c0_i32 = arith.constant 0 : i32
    %c0_i32_0 = arith.constant 0 : i32
    %c0_i32_1 = arith.constant 0 : i32
    return %c0_i32, %c0_i32_0 : i32, i32
  }
  func.func @transform_8(%arg0: i32) -> (i32, i32, i32) {
    %c0_i32 = arith.constant 0 : i32
    %c0_i32_0 = arith.constant 0 : i32
    %c0_i32_1 = arith.constant 0 : i32
    return %arg0, %c0_i32, %c0_i32_0 : i32, i32, i32
  }
}

module attributes {stable_mosaic.version = 11 : i64} {
  func.func @_embed_pe_kernel(%arg0: i32, %arg1: memref<1x16x32xf32, #tpu.memory_space<vmem>>, %arg2: memref<32x64xbf16, #tpu.memory_space<vmem>>, %arg3: memref<1x64xf32, #tpu.memory_space<vmem>>, %arg4: memref<16x64xf32, #tpu.memory_space<vmem>>, %arg5: memref<1x16x64xf32, #tpu.memory_space<vmem>>) attributes {dimension_semantics = [#tpu.dimension_semantics<parallel>], iteration_bounds = array<i64: 2>, scalar_prefetch = 0 : i64, scratch_operands = 0 : i64, tpu.core_type = #tpu.core_type<tc>, window_params = [{transform_indices = @transform_0, window_bounds = array<i64: 1, 16, 32>}, {pipeline_mode = #tpu.pipeline_mode<synchronous>, transform_indices = @transform_1, window_bounds = array<i64: 32, 64>}, {pipeline_mode = #tpu.pipeline_mode<synchronous>, transform_indices = @transform_2, window_bounds = array<i64: 1, 64>}, {pipeline_mode = #tpu.pipeline_mode<synchronous>, transform_indices = @transform_3, window_bounds = array<i64: 16, 64>}, {transform_indices = @transform_4, window_bounds = array<i64: 1, 16, 64>}]} {
    %c0 = arith.constant 0 : index
    %c0_0 = arith.constant 0 : index
    %c0_1 = arith.constant 0 : index
    %0 = vector.load %arg1[%c0, %c0_0, %c0_1] : memref<1x16x32xf32, #tpu.memory_space<vmem>>, vector<1x16x32xf32>
    %1 = vector.shape_cast %0 : vector<1x16x32xf32> to vector<16x32xf32>
    %2 = arith.truncf %1 : vector<16x32xf32> to vector<16x32xbf16>
    %c0_2 = arith.constant 0 : index
    %c0_3 = arith.constant 0 : index
    %3 = vector.load %arg2[%c0_2, %c0_3] : memref<32x64xbf16, #tpu.memory_space<vmem>>, vector<32x64xbf16>
    %cst = arith.constant dense<0.000000e+00> : vector<16x64xf32>
    %4 = tpu.matmul %2, %3, %cst {dimension_numbers = #tpu.dot_dimension_numbers<[1], [0], [0], [1], [0, 0, 1, 1], [], []>} : vector<16x32xbf16>, vector<32x64xbf16>, vector<16x64xf32> -> vector<16x64xf32>
    %c0_4 = arith.constant 0 : index
    %c0_5 = arith.constant 0 : index
    %5 = vector.load %arg3[%c0_4, %c0_5] : memref<1x64xf32, #tpu.memory_space<vmem>>, vector<1x64xf32>
    %6 = vector.broadcast %5 : vector<1x64xf32> to vector<16x64xf32>
    %7 = arith.addf %4, %6 : vector<16x64xf32>
    %cst_6 = arith.constant 8.000000e+00 : f32
    %8 = vector.broadcast %cst_6 : f32 to vector<16x64xf32>
    %9 = arith.mulf %7, %8 : vector<16x64xf32>
    %c0_7 = arith.constant 0 : index
    %c0_8 = arith.constant 0 : index
    %10 = vector.load %arg4[%c0_7, %c0_8] : memref<16x64xf32, #tpu.memory_space<vmem>>, vector<16x64xf32>
    %11 = arith.addf %9, %10 : vector<16x64xf32>
    %c0_9 = arith.constant 0 : index
    %c0_10 = arith.constant 0 : index
    %c0_11 = arith.constant 0 : index
    %12 = vector.load %arg5[%c0_9, %c0_10, %c0_11] : memref<1x16x64xf32, #tpu.memory_space<vmem>>, vector<1x16x64xf32>
    %13 = vector.shape_cast %12 : vector<1x16x64xf32> to vector<16x64xf32>
    %14 = vector.shape_cast %11 : vector<16x64xf32> to vector<1x16x64xf32>
    tpu.vector_store %arg5[%c0_9, %c0_10, %c0_11], %14 {strides = array<i32>} : memref<1x16x64xf32, #tpu.memory_space<vmem>>, vector<1x16x64xf32>,
    return
  }
  func.func @transform_0(%arg0: i32) -> (i32, i32, i32) {
    %c0_i32 = arith.constant 0 : i32
    %c0_i32_0 = arith.constant 0 : i32
    %c0_i32_1 = arith.constant 0 : i32
    return %arg0, %c0_i32, %c0_i32_0 : i32, i32, i32
  }
  func.func @transform_1(%arg0: i32) -> (i32, i32) {
    %c0_i32 = arith.constant 0 : i32
    %c0_i32_0 = arith.constant 0 : i32
    %c0_i32_1 = arith.constant 0 : i32
    return %c0_i32, %c0_i32_0 : i32, i32
  }
  func.func @transform_2(%arg0: i32) -> (i32, i32) {
    %c0_i32 = arith.constant 0 : i32
    %c0_i32_0 = arith.constant 0 : i32
    %c0_i32_1 = arith.constant 0 : i32
    return %c0_i32, %c0_i32_0 : i32, i32
  }
  func.func @transform_3(%arg0: i32) -> (i32, i32) {
    %c0_i32 = arith.constant 0 : i32
    %c0_i32_0 = arith.constant 0 : i32
    %c0_i32_1 = arith.constant 0 : i32
    return %c0_i32, %c0_i32_0 : i32, i32
  }
  func.func @transform_4(%arg0: i32) -> (i32, i32, i32) {
    %c0_i32 = arith.constant 0 : i32
    %c0_i32_0 = arith.constant 0 : i32
    %c0_i32_1 = arith.constant 0 : i32
    return %arg0, %c0_i32, %c0_i32_0 : i32, i32, i32
  }
}

module attributes {stable_mosaic.version = 11 : i64} {
  func.func @_self_attn_block_kernel(%arg0: i32, %arg1: memref<1x16x64xf32, #tpu.memory_space<vmem>>, %arg2: memref<1x1x16xf32, #tpu.memory_space<vmem>>, %arg3: memref<1x64xf32, #tpu.memory_space<vmem>>, %arg4: memref<1x64xf32, #tpu.memory_space<vmem>>, %arg5: memref<64x192xbf16, #tpu.memory_space<vmem>>, %arg6: memref<1x192xf32, #tpu.memory_space<vmem>>, %arg7: memref<64x64xbf16, #tpu.memory_space<vmem>>, %arg8: memref<1x64xf32, #tpu.memory_space<vmem>>, %arg9: memref<1x16x64xf32, #tpu.memory_space<vmem>>) attributes {dimension_semantics = [#tpu.dimension_semantics<parallel>], iteration_bounds = array<i64: 2>, scalar_prefetch = 0 : i64, scratch_operands = 0 : i64, tpu.core_type = #tpu.core_type<tc>, window_params = [{transform_indices = @transform_0, window_bounds = array<i64: 1, 16, 64>}, {transform_indices = @transform_1, window_bounds = array<i64: 1, 1, 16>}, {pipeline_mode = #tpu.pipeline_mode<synchronous>, transform_indices = @transform_2, window_bounds = array<i64: 1, 64>}, {pipeline_mode = #tpu.pipeline_mode<synchronous>, transform_indices = @transform_3, window_bounds = array<i64: 1, 64>}, {pipeline_mode = #tpu.pipeline_mode<synchronous>, transform_indices = @transform_4, window_bounds = array<i64: 64, 192>}, {pipeline_mode = #tpu.pipeline_mode<synchronous>, transform_indices = @transform_5, window_bounds = array<i64: 1, 192>}, {pipeline_mode = #tpu.pipeline_mode<synchronous>, transform_indices = @transform_6, window_bounds = array<i64: 64, 64>}, {pipeline_mode = #tpu.pipeline_mode<synchronous>, transform_indices = @transform_7, window_bounds = array<i64: 1, 64>}, {transform_indices = @transform_8, window_bounds = array<i64: 1, 16, 64>}]} {
    %c0 = arith.constant 0 : index
    %c0_0 = arith.constant 0 : index
    %c0_1 = arith.constant 0 : index
    %0 = vector.load %arg1[%c0, %c0_0, %c0_1] : memref<1x16x64xf32, #tpu.memory_space<vmem>>, vector<1x16x64xf32>
    %1 = vector.shape_cast %0 : vector<1x16x64xf32> to vector<16x64xf32>
    %c0_2 = arith.constant 0 : index
    %c0_3 = arith.constant 0 : index
    %2 = vector.load %arg3[%c0_2, %c0_3] : memref<1x64xf32, #tpu.memory_space<vmem>>, vector<1x64xf32>
    %c0_4 = arith.constant 0 : index
    %c0_5 = arith.constant 0 : index
    %3 = vector.load %arg4[%c0_4, %c0_5] : memref<1x64xf32, #tpu.memory_space<vmem>>, vector<1x64xf32>
    %cst = arith.constant dense<0.000000e+00> : vector<16xf32>
    %4 = vector.multi_reduction <add>, %1, %cst [1] : vector<16x64xf32> to vector<16xf32>
    %5 = vector.shape_cast %4 : vector<16xf32> to vector<16x1xf32>
    %cst_6 = arith.constant 6.400000e+01 : f32
    %6 = vector.broadcast %cst_6 : f32 to vector<16x1xf32>
    %7 = arith.divf %5, %6 : vector<16x1xf32>
    %8 = vector.broadcast %7 : vector<16x1xf32> to vector<16x64xf32>
    %9 = arith.subf %1, %8 : vector<16x64xf32>
    %10 = arith.mulf %9, %9 : vector<16x64xf32>
    %cst_7 = arith.constant dense<0.000000e+00> : vector<16xf32>
    %11 = vector.multi_reduction <add>, %10, %cst_7 [1] : vector<16x64xf32> to vector<16xf32>
    %12 = vector.shape_cast %11 : vector<16xf32> to vector<16x1xf32>
    %cst_8 = arith.constant 6.400000e+01 : f32
    %13 = vector.broadcast %cst_8 : f32 to vector<16x1xf32>
    %14 = arith.divf %12, %13 : vector<16x1xf32>
    %cst_9 = arith.constant 9.99999974E-6 : f32
    %15 = vector.broadcast %cst_9 : f32 to vector<16x1xf32>
    %16 = arith.addf %14, %15 : vector<16x1xf32>
    %17 = math.rsqrt %16 : vector<16x1xf32>
    %18 = vector.broadcast %17 : vector<16x1xf32> to vector<16x64xf32>
    %19 = arith.mulf %9, %18 : vector<16x64xf32>
    %20 = vector.broadcast %2 : vector<1x64xf32> to vector<16x64xf32>
    %21 = arith.mulf %19, %20 : vector<16x64xf32>
    %22 = vector.broadcast %3 : vector<1x64xf32> to vector<16x64xf32>
    %23 = arith.addf %21, %22 : vector<16x64xf32>
    %24 = arith.truncf %23 : vector<16x64xf32> to vector<16x64xbf16>
    %c0_10 = arith.constant 0 : index
    %c0_11 = arith.constant 0 : index
    %25 = vector.load %arg5[%c0_10, %c0_11] : memref<64x192xbf16, #tpu.memory_space<vmem>>, vector<64x192xbf16>
    %cst_12 = arith.constant dense<0.000000e+00> : vector<16x192xf32>
    %26 = tpu.matmul %24, %25, %cst_12 {dimension_numbers = #tpu.dot_dimension_numbers<[1], [0], [0], [1], [0, 0, 1, 1], [], []>} : vector<16x64xbf16>, vector<64x192xbf16>, vector<16x192xf32> -> vector<16x192xf32>
    %c0_13 = arith.constant 0 : index
    %c0_14 = arith.constant 0 : index
    %27 = vector.load %arg6[%c0_13, %c0_14] : memref<1x192xf32, #tpu.memory_space<vmem>>, vector<1x192xf32>
    %28 = vector.broadcast %27 : vector<1x192xf32> to vector<16x192xf32>
    %29 = arith.addf %26, %28 : vector<16x192xf32>
    %c0_15 = arith.constant 0 : index
    %c0_16 = arith.constant 0 : index
    %c0_17 = arith.constant 0 : index
    %30 = vector.load %arg2[%c0_15, %c0_16, %c0_17] : memref<1x1x16xf32, #tpu.memory_space<vmem>>, vector<1x1x16xf32>
    %31 = vector.shape_cast %30 : vector<1x1x16xf32> to vector<1x16xf32>
    %cst_18 = arith.constant 0.000000e+00 : f32
    %32 = vector.broadcast %cst_18 : f32 to vector<1x16xf32>
    %33 = arith.cmpf ogt, %31, %32 : vector<1x16xf32>
    %34 = vector.shape_cast %33 : vector<1x16xi1> to vector<1x16xi1>
    %35 = vector.broadcast %34 : vector<1x16xi1> to vector<16x16xi1>
    %36 = vector.extract_strided_slice %29 {offsets = [0, 0], sizes = [16, 64], strides = [1, 1]} : vector<16x192xf32> to vector<16x64xf32>
    %37 = vector.extract_strided_slice %29 {offsets = [0, 64], sizes = [16, 64], strides = [1, 1]} : vector<16x192xf32> to vector<16x64xf32>
    %38 = vector.extract_strided_slice %29 {offsets = [0, 128], sizes = [16, 64], strides = [1, 1]} : vector<16x192xf32> to vector<16x64xf32>
    %39 = vector.extract_strided_slice %36 {offsets = [0, 0], sizes = [16, 16], strides = [1, 1]} : vector<16x64xf32> to vector<16x16xf32>
    %40 = vector.extract_strided_slice %37 {offsets = [0, 0], sizes = [16, 16], strides = [1, 1]} : vector<16x64xf32> to vector<16x16xf32>
    %cst_19 = arith.constant dense<0.000000e+00> : vector<16x16xf32>
    %41 = tpu.matmul %39, %40, %cst_19 {dimension_numbers = #tpu.dot_dimension_numbers<[1], [1], [0], [0], [0, 0, 1, 0], [], []>} : vector<16x16xf32>, vector<16x16xf32>, vector<16x16xf32> -> vector<16x16xf32>
    %cst_20 = arith.constant 2.500000e-01 : f32
    %42 = vector.broadcast %cst_20 : f32 to vector<16x16xf32>
    %43 = arith.mulf %41, %42 : vector<16x16xf32>
    %cst_21 = arith.constant -3.40282347E+38 : f32
    %44 = vector.broadcast %cst_21 : f32 to vector<16x16xf32>
    %45 = arith.select %35, %43, %44 : vector<16x16xi1>, vector<16x16xf32>
    %cst_22 = arith.constant dense<0xFF800000> : vector<16xf32>
    %46 = vector.multi_reduction <maximumf>, %45, %cst_22 [1] : vector<16x16xf32> to vector<16xf32>
    %47 = vector.shape_cast %46 : vector<16xf32> to vector<16x1xf32>
    %48 = vector.broadcast %47 : vector<16x1xf32> to vector<16x16xf32>
    %49 = arith.subf %45, %48 : vector<16x16xf32>
    %50 = math.exp %49 : vector<16x16xf32>
    %cst_23 = arith.constant dense<0.000000e+00> : vector<16xf32>
    %51 = vector.multi_reduction <add>, %50, %cst_23 [1] : vector<16x16xf32> to vector<16xf32>
    %52 = vector.shape_cast %51 : vector<16xf32> to vector<16x1xf32>
    %53 = tpu.reciprocal %52 {approx = true} : vector<16x1xf32> -> vector<16x1xf32>
    %54 = vector.broadcast %53 : vector<16x1xf32> to vector<16x16xf32>
    %55 = arith.mulf %50, %54 : vector<16x16xf32>
    %cst_24 = arith.constant 0.000000e+00 : f32
    %56 = vector.broadcast %cst_24 : f32 to vector<16x16xf32>
    %57 = arith.select %35, %55, %56 : vector<16x16xi1>, vector<16x16xf32>
    %58 = vector.extract_strided_slice %38 {offsets = [0, 0], sizes = [16, 16], strides = [1, 1]} : vector<16x64xf32> to vector<16x16xf32>
    %cst_25 = arith.constant dense<0.000000e+00> : vector<16x16xf32>
    %59 = tpu.matmul %57, %58, %cst_25 {dimension_numbers = #tpu.dot_dimension_numbers<[1], [0], [0], [1], [0, 0, 1, 1], [], []>} : vector<16x16xf32>, vector<16x16xf32>, vector<16x16xf32> -> vector<16x16xf32>
    %60 = vector.extract_strided_slice %36 {offsets = [0, 16], sizes = [16, 16], strides = [1, 1]} : vector<16x64xf32> to vector<16x16xf32>
    %61 = vector.extract_strided_slice %37 {offsets = [0, 16], sizes = [16, 16], strides = [1, 1]} : vector<16x64xf32> to vector<16x16xf32>
    %cst_26 = arith.constant dense<0.000000e+00> : vector<16x16xf32>
    %62 = tpu.matmul %60, %61, %cst_26 {dimension_numbers = #tpu.dot_dimension_numbers<[1], [1], [0], [0], [0, 0, 1, 0], [], []>} : vector<16x16xf32>, vector<16x16xf32>, vector<16x16xf32> -> vector<16x16xf32>
    %cst_27 = arith.constant 2.500000e-01 : f32
    %63 = vector.broadcast %cst_27 : f32 to vector<16x16xf32>
    %64 = arith.mulf %62, %63 : vector<16x16xf32>
    %cst_28 = arith.constant -3.40282347E+38 : f32
    %65 = vector.broadcast %cst_28 : f32 to vector<16x16xf32>
    %66 = arith.select %35, %64, %65 : vector<16x16xi1>, vector<16x16xf32>
    %cst_29 = arith.constant dense<0xFF800000> : vector<16xf32>
    %67 = vector.multi_reduction <maximumf>, %66, %cst_29 [1] : vector<16x16xf32> to vector<16xf32>
    %68 = vector.shape_cast %67 : vector<16xf32> to vector<16x1xf32>
    %69 = vector.broadcast %68 : vector<16x1xf32> to vector<16x16xf32>
    %70 = arith.subf %66, %69 : vector<16x16xf32>
    %71 = math.exp %70 : vector<16x16xf32>
    %cst_30 = arith.constant dense<0.000000e+00> : vector<16xf32>
    %72 = vector.multi_reduction <add>, %71, %cst_30 [1] : vector<16x16xf32> to vector<16xf32>
    %73 = vector.shape_cast %72 : vector<16xf32> to vector<16x1xf32>
    %74 = tpu.reciprocal %73 {approx = true} : vector<16x1xf32> -> vector<16x1xf32>
    %75 = vector.broadcast %74 : vector<16x1xf32> to vector<16x16xf32>
    %76 = arith.mulf %71, %75 : vector<16x16xf32>
    %cst_31 = arith.constant 0.000000e+00 : f32
    %77 = vector.broadcast %cst_31 : f32 to vector<16x16xf32>
    %78 = arith.select %35, %76, %77 : vector<16x16xi1>, vector<16x16xf32>
    %79 = vector.extract_strided_slice %38 {offsets = [0, 16], sizes = [16, 16], strides = [1, 1]} : vector<16x64xf32> to vector<16x16xf32>
    %cst_32 = arith.constant dense<0.000000e+00> : vector<16x16xf32>
    %80 = tpu.matmul %78, %79, %cst_32 {dimension_numbers = #tpu.dot_dimension_numbers<[1], [0], [0], [1], [0, 0, 1, 1], [], []>} : vector<16x16xf32>, vector<16x16xf32>, vector<16x16xf32> -> vector<16x16xf32>
    %81 = vector.extract_strided_slice %36 {offsets = [0, 32], sizes = [16, 16], strides = [1, 1]} : vector<16x64xf32> to vector<16x16xf32>
    %82 = vector.extract_strided_slice %37 {offsets = [0, 32], sizes = [16, 16], strides = [1, 1]} : vector<16x64xf32> to vector<16x16xf32>
    %cst_33 = arith.constant dense<0.000000e+00> : vector<16x16xf32>
    %83 = tpu.matmul %81, %82, %cst_33 {dimension_numbers = #tpu.dot_dimension_numbers<[1], [1], [0], [0], [0, 0, 1, 0], [], []>} : vector<16x16xf32>, vector<16x16xf32>, vector<16x16xf32> -> vector<16x16xf32>
    %cst_34 = arith.constant 2.500000e-01 : f32
    %84 = vector.broadcast %cst_34 : f32 to vector<16x16xf32>
    %85 = arith.mulf %83, %84 : vector<16x16xf32>
    %cst_35 = arith.constant -3.40282347E+38 : f32
    %86 = vector.broadcast %cst_35 : f32 to vector<16x16xf32>
    %87 = arith.select %35, %85, %86 : vector<16x16xi1>, vector<16x16xf32>
    %cst_36 = arith.constant dense<0xFF800000> : vector<16xf32>
    %88 = vector.multi_reduction <maximumf>, %87, %cst_36 [1] : vector<16x16xf32> to vector<16xf32>
    %89 = vector.shape_cast %88 : vector<16xf32> to vector<16x1xf32>
    %90 = vector.broadcast %89 : vector<16x1xf32> to vector<16x16xf32>
    %91 = arith.subf %87, %90 : vector<16x16xf32>
    %92 = math.exp %91 : vector<16x16xf32>
    %cst_37 = arith.constant dense<0.000000e+00> : vector<16xf32>
    %93 = vector.multi_reduction <add>, %92, %cst_37 [1] : vector<16x16xf32> to vector<16xf32>
    %94 = vector.shape_cast %93 : vector<16xf32> to vector<16x1xf32>
    %95 = tpu.reciprocal %94 {approx = true} : vector<16x1xf32> -> vector<16x1xf32>
    %96 = vector.broadcast %95 : vector<16x1xf32> to vector<16x16xf32>
    %97 = arith.mulf %92, %96 : vector<16x16xf32>
    %cst_38 = arith.constant 0.000000e+00 : f32
    %98 = vector.broadcast %cst_38 : f32 to vector<16x16xf32>
    %99 = arith.select %35, %97, %98 : vector<16x16xi1>, vector<16x16xf32>
    %100 = vector.extract_strided_slice %38 {offsets = [0, 32], sizes = [16, 16], strides = [1, 1]} : vector<16x64xf32> to vector<16x16xf32>
    %cst_39 = arith.constant dense<0.000000e+00> : vector<16x16xf32>
    %101 = tpu.matmul %99, %100, %cst_39 {dimension_numbers = #tpu.dot_dimension_numbers<[1], [0], [0], [1], [0, 0, 1, 1], [], []>} : vector<16x16xf32>, vector<16x16xf32>, vector<16x16xf32> -> vector<16x16xf32>
    %102 = vector.extract_strided_slice %36 {offsets = [0, 48], sizes = [16, 16], strides = [1, 1]} : vector<16x64xf32> to vector<16x16xf32>
    %103 = vector.extract_strided_slice %37 {offsets = [0, 48], sizes = [16, 16], strides = [1, 1]} : vector<16x64xf32> to vector<16x16xf32>
    %cst_40 = arith.constant dense<0.000000e+00> : vector<16x16xf32>
    %104 = tpu.matmul %102, %103, %cst_40 {dimension_numbers = #tpu.dot_dimension_numbers<[1], [1], [0], [0], [0, 0, 1, 0], [], []>} : vector<16x16xf32>, vector<16x16xf32>, vector<16x16xf32> -> vector<16x16xf32>
    %cst_41 = arith.constant 2.500000e-01 : f32
    %105 = vector.broadcast %cst_41 : f32 to vector<16x16xf32>
    %106 = arith.mulf %104, %105 : vector<16x16xf32>
    %cst_42 = arith.constant -3.40282347E+38 : f32
    %107 = vector.broadcast %cst_42 : f32 to vector<16x16xf32>
    %108 = arith.select %35, %106, %107 : vector<16x16xi1>, vector<16x16xf32>
    %cst_43 = arith.constant dense<0xFF800000> : vector<16xf32>
    %109 = vector.multi_reduction <maximumf>, %108, %cst_43 [1] : vector<16x16xf32> to vector<16xf32>
    %110 = vector.shape_cast %109 : vector<16xf32> to vector<16x1xf32>
    %111 = vector.broadcast %110 : vector<16x1xf32> to vector<16x16xf32>
    %112 = arith.subf %108, %111 : vector<16x16xf32>
    %113 = math.exp %112 : vector<16x16xf32>
    %cst_44 = arith.constant dense<0.000000e+00> : vector<16xf32>
    %114 = vector.multi_reduction <add>, %113, %cst_44 [1] : vector<16x16xf32> to vector<16xf32>
    %115 = vector.shape_cast %114 : vector<16xf32> to vector<16x1xf32>
    %116 = tpu.reciprocal %115 {approx = true} : vector<16x1xf32> -> vector<16x1xf32>
    %117 = vector.broadcast %116 : vector<16x1xf32> to vector<16x16xf32>
    %118 = arith.mulf %113, %117 : vector<16x16xf32>
    %cst_45 = arith.constant 0.000000e+00 : f32
    %119 = vector.broadcast %cst_45 : f32 to vector<16x16xf32>
    %120 = arith.select %35, %118, %119 : vector<16x16xi1>, vector<16x16xf32>
    %121 = vector.extract_strided_slice %38 {offsets = [0, 48], sizes = [16, 16], strides = [1, 1]} : vector<16x64xf32> to vector<16x16xf32>
    %cst_46 = arith.constant dense<0.000000e+00> : vector<16x16xf32>
    %122 = tpu.matmul %120, %121, %cst_46 {dimension_numbers = #tpu.dot_dimension_numbers<[1], [0], [0], [1], [0, 0, 1, 1], [], []>} : vector<16x16xf32>, vector<16x16xf32>, vector<16x16xf32> -> vector<16x16xf32>
    %123 = tpu.concatenate %59, %80, %101, %122 in 1 : vector<16x16xf32>, vector<16x16xf32>, vector<16x16xf32>, vector<16x16xf32> -> vector<16x64xf32>
    %124 = arith.truncf %123 : vector<16x64xf32> to vector<16x64xbf16>
    %c0_47 = arith.constant 0 : index
    %c0_48 = arith.constant 0 : index
    %125 = vector.load %arg7[%c0_47, %c0_48] : memref<64x64xbf16, #tpu.memory_space<vmem>>, vector<64x64xbf16>
    %cst_49 = arith.constant dense<0.000000e+00> : vector<16x64xf32>
    %126 = tpu.matmul %124, %125, %cst_49 {dimension_numbers = #tpu.dot_dimension_numbers<[1], [0], [0], [1], [0, 0, 1, 1], [], []>} : vector<16x64xbf16>, vector<64x64xbf16>, vector<16x64xf32> -> vector<16x64xf32>
    %c0_50 = arith.constant 0 : index
    %c0_51 = arith.constant 0 : index
    %127 = vector.load %arg8[%c0_50, %c0_51] : memref<1x64xf32, #tpu.memory_space<vmem>>, vector<1x64xf32>
    %128 = vector.broadcast %127 : vector<1x64xf32> to vector<16x64xf32>
    %129 = arith.addf %126, %128 : vector<16x64xf32>
    %130 = arith.addf %1, %129 : vector<16x64xf32>
    %c0_52 = arith.constant 0 : index
    %c0_53 = arith.constant 0 : index
    %c0_54 = arith.constant 0 : index
    %131 = vector.load %arg9[%c0_52, %c0_53, %c0_54] : memref<1x16x64xf32, #tpu.memory_space<vmem>>, vector<1x16x64xf32>
    %132 = vector.shape_cast %131 : vector<1x16x64xf32> to vector<16x64xf32>
    %133 = vector.shape_cast %130 : vector<16x64xf32> to vector<1x16x64xf32>
    tpu.vector_store %arg9[%c0_52, %c0_53, %c0_54], %133 {strides = array<i32>} : memref<1x16x64xf32, #tpu.memory_space<vmem>>, vector<1x16x64xf32>,
    return
  }
  func.func @transform_0(%arg0: i32) -> (i32, i32, i32) {
    %c0_i32 = arith.constant 0 : i32
    %c0_i32_0 = arith.constant 0 : i32
    %c0_i32_1 = arith.constant 0 : i32
    return %arg0, %c0_i32, %c0_i32_0 : i32, i32, i32
  }
  func.func @transform_1(%arg0: i32) -> (i32, i32, i32) {
    %c0_i32 = arith.constant 0 : i32
    %c0_i32_0 = arith.constant 0 : i32
    %c0_i32_1 = arith.constant 0 : i32
    return %arg0, %c0_i32, %c0_i32_0 : i32, i32, i32
  }
  func.func @transform_2(%arg0: i32) -> (i32, i32) {
    %c0_i32 = arith.constant 0 : i32
    %c0_i32_0 = arith.constant 0 : i32
    %c0_i32_1 = arith.constant 0 : i32
    return %c0_i32, %c0_i32_0 : i32, i32
  }
  func.func @transform_3(%arg0: i32) -> (i32, i32) {
    %c0_i32 = arith.constant 0 : i32
    %c0_i32_0 = arith.constant 0 : i32
    %c0_i32_1 = arith.constant 0 : i32
    return %c0_i32, %c0_i32_0 : i32, i32
  }
  func.func @transform_4(%arg0: i32) -> (i32, i32) {
    %c0_i32 = arith.constant 0 : i32
    %c0_i32_0 = arith.constant 0 : i32
    %c0_i32_1 = arith.constant 0 : i32
    return %c0_i32, %c0_i32_0 : i32, i32
  }
  func.func @transform_5(%arg0: i32) -> (i32, i32) {
    %c0_i32 = arith.constant 0 : i32
    %c0_i32_0 = arith.constant 0 : i32
    %c0_i32_1 = arith.constant 0 : i32
    return %c0_i32, %c0_i32_0 : i32, i32
  }
  func.func @transform_6(%arg0: i32) -> (i32, i32) {
    %c0_i32 = arith.constant 0 : i32
    %c0_i32_0 = arith.constant 0 : i32
    %c0_i32_1 = arith.constant 0 : i32
    return %c0_i32, %c0_i32_0 : i32, i32
  }
  func.func @transform_7(%arg0: i32) -> (i32, i32) {
    %c0_i32 = arith.constant 0 : i32
    %c0_i32_0 = arith.constant 0 : i32
    %c0_i32_1 = arith.constant 0 : i32
    return %c0_i32, %c0_i32_0 : i32, i32
  }
  func.func @transform_8(%arg0: i32) -> (i32, i32, i32) {
    %c0_i32 = arith.constant 0 : i32
    %c0_i32_0 = arith.constant 0 : i32
    %c0_i32_1 = arith.constant 0 : i32
    return %arg0, %c0_i32, %c0_i32_0 : i32, i32, i32
  }
}

module attributes {stable_mosaic.version = 11 : i64} {
  func.func @_ffn_block_kernel(%arg0: i32, %arg1: memref<1x16x64xf32, #tpu.memory_space<vmem>>, %arg2: memref<1x64xf32, #tpu.memory_space<vmem>>, %arg3: memref<1x64xf32, #tpu.memory_space<vmem>>, %arg4: memref<64x128xbf16, #tpu.memory_space<vmem>>, %arg5: memref<1x128xf32, #tpu.memory_space<vmem>>, %arg6: memref<128x64xbf16, #tpu.memory_space<vmem>>, %arg7: memref<1x64xf32, #tpu.memory_space<vmem>>, %arg8: memref<1x16x64xf32, #tpu.memory_space<vmem>>) attributes {dimension_semantics = [#tpu.dimension_semantics<parallel>], iteration_bounds = array<i64: 2>, scalar_prefetch = 0 : i64, scratch_operands = 0 : i64, tpu.core_type = #tpu.core_type<tc>, window_params = [{transform_indices = @transform_0, window_bounds = array<i64: 1, 16, 64>}, {pipeline_mode = #tpu.pipeline_mode<synchronous>, transform_indices = @transform_1, window_bounds = array<i64: 1, 64>}, {pipeline_mode = #tpu.pipeline_mode<synchronous>, transform_indices = @transform_2, window_bounds = array<i64: 1, 64>}, {pipeline_mode = #tpu.pipeline_mode<synchronous>, transform_indices = @transform_3, window_bounds = array<i64: 64, 128>}, {pipeline_mode = #tpu.pipeline_mode<synchronous>, transform_indices = @transform_4, window_bounds = array<i64: 1, 128>}, {pipeline_mode = #tpu.pipeline_mode<synchronous>, transform_indices = @transform_5, window_bounds = array<i64: 128, 64>}, {pipeline_mode = #tpu.pipeline_mode<synchronous>, transform_indices = @transform_6, window_bounds = array<i64: 1, 64>}, {transform_indices = @transform_7, window_bounds = array<i64: 1, 16, 64>}]} {
    %c0 = arith.constant 0 : index
    %c0_0 = arith.constant 0 : index
    %c0_1 = arith.constant 0 : index
    %0 = vector.load %arg1[%c0, %c0_0, %c0_1] : memref<1x16x64xf32, #tpu.memory_space<vmem>>, vector<1x16x64xf32>
    %1 = vector.shape_cast %0 : vector<1x16x64xf32> to vector<16x64xf32>
    %c0_2 = arith.constant 0 : index
    %c0_3 = arith.constant 0 : index
    %2 = vector.load %arg2[%c0_2, %c0_3] : memref<1x64xf32, #tpu.memory_space<vmem>>, vector<1x64xf32>
    %c0_4 = arith.constant 0 : index
    %c0_5 = arith.constant 0 : index
    %3 = vector.load %arg3[%c0_4, %c0_5] : memref<1x64xf32, #tpu.memory_space<vmem>>, vector<1x64xf32>
    %cst = arith.constant dense<0.000000e+00> : vector<16xf32>
    %4 = vector.multi_reduction <add>, %1, %cst [1] : vector<16x64xf32> to vector<16xf32>
    %5 = vector.shape_cast %4 : vector<16xf32> to vector<16x1xf32>
    %cst_6 = arith.constant 6.400000e+01 : f32
    %6 = vector.broadcast %cst_6 : f32 to vector<16x1xf32>
    %7 = arith.divf %5, %6 : vector<16x1xf32>
    %8 = vector.broadcast %7 : vector<16x1xf32> to vector<16x64xf32>
    %9 = arith.subf %1, %8 : vector<16x64xf32>
    %10 = arith.mulf %9, %9 : vector<16x64xf32>
    %cst_7 = arith.constant dense<0.000000e+00> : vector<16xf32>
    %11 = vector.multi_reduction <add>, %10, %cst_7 [1] : vector<16x64xf32> to vector<16xf32>
    %12 = vector.shape_cast %11 : vector<16xf32> to vector<16x1xf32>
    %cst_8 = arith.constant 6.400000e+01 : f32
    %13 = vector.broadcast %cst_8 : f32 to vector<16x1xf32>
    %14 = arith.divf %12, %13 : vector<16x1xf32>
    %cst_9 = arith.constant 9.99999974E-6 : f32
    %15 = vector.broadcast %cst_9 : f32 to vector<16x1xf32>
    %16 = arith.addf %14, %15 : vector<16x1xf32>
    %17 = math.rsqrt %16 : vector<16x1xf32>
    %18 = vector.broadcast %17 : vector<16x1xf32> to vector<16x64xf32>
    %19 = arith.mulf %9, %18 : vector<16x64xf32>
    %20 = vector.broadcast %2 : vector<1x64xf32> to vector<16x64xf32>
    %21 = arith.mulf %19, %20 : vector<16x64xf32>
    %22 = vector.broadcast %3 : vector<1x64xf32> to vector<16x64xf32>
    %23 = arith.addf %21, %22 : vector<16x64xf32>
    %24 = arith.truncf %23 : vector<16x64xf32> to vector<16x64xbf16>
    %c0_10 = arith.constant 0 : index
    %c0_11 = arith.constant 0 : index
    %25 = vector.load %arg4[%c0_10, %c0_11] : memref<64x128xbf16, #tpu.memory_space<vmem>>, vector<64x128xbf16>
    %cst_12 = arith.constant dense<0.000000e+00> : vector<16x128xf32>
    %26 = tpu.matmul %24, %25, %cst_12 {dimension_numbers = #tpu.dot_dimension_numbers<[1], [0], [0], [1], [0, 0, 1, 1], [], []>} : vector<16x64xbf16>, vector<64x128xbf16>, vector<16x128xf32> -> vector<16x128xf32>
    %c0_13 = arith.constant 0 : index
    %c0_14 = arith.constant 0 : index
    %27 = vector.load %arg5[%c0_13, %c0_14] : memref<1x128xf32, #tpu.memory_space<vmem>>, vector<1x128xf32>
    %28 = vector.broadcast %27 : vector<1x128xf32> to vector<16x128xf32>
    %29 = arith.addf %26, %28 : vector<16x128xf32>
    %cst_15 = arith.constant 0.000000e+00 : f32
    %30 = vector.broadcast %cst_15 : f32 to vector<16x128xf32>
    %31 = arith.maximumf %29, %30 : vector<16x128xf32>
    %32 = arith.truncf %31 : vector<16x128xf32> to vector<16x128xbf16>
    %c0_16 = arith.constant 0 : index
    %c0_17 = arith.constant 0 : index
    %33 = vector.load %arg6[%c0_16, %c0_17] : memref<128x64xbf16, #tpu.memory_space<vmem>>, vector<128x64xbf16>
    %cst_18 = arith.constant dense<0.000000e+00> : vector<16x64xf32>
    %34 = tpu.matmul %32, %33, %cst_18 {dimension_numbers = #tpu.dot_dimension_numbers<[1], [0], [0], [1], [0, 0, 1, 1], [], []>} : vector<16x128xbf16>, vector<128x64xbf16>, vector<16x64xf32> -> vector<16x64xf32>
    %c0_19 = arith.constant 0 : index
    %c0_20 = arith.constant 0 : index
    %35 = vector.load %arg7[%c0_19, %c0_20] : memref<1x64xf32, #tpu.memory_space<vmem>>, vector<1x64xf32>
    %36 = vector.broadcast %35 : vector<1x64xf32> to vector<16x64xf32>
    %37 = arith.addf %34, %36 : vector<16x64xf32>
    %38 = arith.addf %1, %37 : vector<16x64xf32>
    %c0_21 = arith.constant 0 : index
    %c0_22 = arith.constant 0 : index
    %c0_23 = arith.constant 0 : index
    %39 = vector.load %arg8[%c0_21, %c0_22, %c0_23] : memref<1x16x64xf32, #tpu.memory_space<vmem>>, vector<1x16x64xf32>
    %40 = vector.shape_cast %39 : vector<1x16x64xf32> to vector<16x64xf32>
    %41 = vector.shape_cast %38 : vector<16x64xf32> to vector<1x16x64xf32>
    tpu.vector_store %arg8[%c0_21, %c0_22, %c0_23], %41 {strides = array<i32>} : memref<1x16x64xf32, #tpu.memory_space<vmem>>, vector<1x16x64xf32>,
    return
  }
  func.func @transform_0(%arg0: i32) -> (i32, i32, i32) {
    %c0_i32 = arith.constant 0 : i32
    %c0_i32_0 = arith.constant 0 : i32
    %c0_i32_1 = arith.constant 0 : i32
    return %arg0, %c0_i32, %c0_i32_0 : i32, i32, i32
  }
  func.func @transform_1(%arg0: i32) -> (i32, i32) {
    %c0_i32 = arith.constant 0 : i32
    %c0_i32_0 = arith.constant 0 : i32
    %c0_i32_1 = arith.constant 0 : i32
    return %c0_i32, %c0_i32_0 : i32, i32
  }
  func.func @transform_2(%arg0: i32) -> (i32, i32) {
    %c0_i32 = arith.constant 0 : i32
    %c0_i32_0 = arith.constant 0 : i32
    %c0_i32_1 = arith.constant 0 : i32
    return %c0_i32, %c0_i32_0 : i32, i32
  }
  func.func @transform_3(%arg0: i32) -> (i32, i32) {
    %c0_i32 = arith.constant 0 : i32
    %c0_i32_0 = arith.constant 0 : i32
    %c0_i32_1 = arith.constant 0 : i32
    return %c0_i32, %c0_i32_0 : i32, i32
  }
  func.func @transform_4(%arg0: i32) -> (i32, i32) {
    %c0_i32 = arith.constant 0 : i32
    %c0_i32_0 = arith.constant 0 : i32
    %c0_i32_1 = arith.constant 0 : i32
    return %c0_i32, %c0_i32_0 : i32, i32
  }
  func.func @transform_5(%arg0: i32) -> (i32, i32) {
    %c0_i32 = arith.constant 0 : i32
    %c0_i32_0 = arith.constant 0 : i32
    %c0_i32_1 = arith.constant 0 : i32
    return %c0_i32, %c0_i32_0 : i32, i32
  }
  func.func @transform_6(%arg0: i32) -> (i32, i32) {
    %c0_i32 = arith.constant 0 : i32
    %c0_i32_0 = arith.constant 0 : i32
    %c0_i32_1 = arith.constant 0 : i32
    return %c0_i32, %c0_i32_0 : i32, i32
  }
  func.func @transform_7(%arg0: i32) -> (i32, i32, i32) {
    %c0_i32 = arith.constant 0 : i32
    %c0_i32_0 = arith.constant 0 : i32
    %c0_i32_1 = arith.constant 0 : i32
    return %arg0, %c0_i32, %c0_i32_0 : i32, i32, i32
  }
}

module attributes {stable_mosaic.version = 11 : i64} {
  func.func @_layernorm_kernel(%arg0: i32, %arg1: memref<1x16x64xf32, #tpu.memory_space<vmem>>, %arg2: memref<1x64xf32, #tpu.memory_space<vmem>>, %arg3: memref<1x64xf32, #tpu.memory_space<vmem>>, %arg4: memref<1x16x64xf32, #tpu.memory_space<vmem>>) attributes {dimension_semantics = [#tpu.dimension_semantics<parallel>], iteration_bounds = array<i64: 2>, scalar_prefetch = 0 : i64, scratch_operands = 0 : i64, tpu.core_type = #tpu.core_type<tc>, window_params = [{transform_indices = @transform_0, window_bounds = array<i64: 1, 16, 64>}, {pipeline_mode = #tpu.pipeline_mode<synchronous>, transform_indices = @transform_1, window_bounds = array<i64: 1, 64>}, {pipeline_mode = #tpu.pipeline_mode<synchronous>, transform_indices = @transform_2, window_bounds = array<i64: 1, 64>}, {transform_indices = @transform_3, window_bounds = array<i64: 1, 16, 64>}]} {
    %c0 = arith.constant 0 : index
    %c0_0 = arith.constant 0 : index
    %c0_1 = arith.constant 0 : index
    %0 = vector.load %arg1[%c0, %c0_0, %c0_1] : memref<1x16x64xf32, #tpu.memory_space<vmem>>, vector<1x16x64xf32>
    %1 = vector.shape_cast %0 : vector<1x16x64xf32> to vector<16x64xf32>
    %c0_2 = arith.constant 0 : index
    %c0_3 = arith.constant 0 : index
    %2 = vector.load %arg2[%c0_2, %c0_3] : memref<1x64xf32, #tpu.memory_space<vmem>>, vector<1x64xf32>
    %c0_4 = arith.constant 0 : index
    %c0_5 = arith.constant 0 : index
    %3 = vector.load %arg3[%c0_4, %c0_5] : memref<1x64xf32, #tpu.memory_space<vmem>>, vector<1x64xf32>
    %cst = arith.constant dense<0.000000e+00> : vector<16xf32>
    %4 = vector.multi_reduction <add>, %1, %cst [1] : vector<16x64xf32> to vector<16xf32>
    %5 = vector.shape_cast %4 : vector<16xf32> to vector<16x1xf32>
    %cst_6 = arith.constant 6.400000e+01 : f32
    %6 = vector.broadcast %cst_6 : f32 to vector<16x1xf32>
    %7 = arith.divf %5, %6 : vector<16x1xf32>
    %8 = vector.broadcast %7 : vector<16x1xf32> to vector<16x64xf32>
    %9 = arith.subf %1, %8 : vector<16x64xf32>
    %10 = arith.mulf %9, %9 : vector<16x64xf32>
    %cst_7 = arith.constant dense<0.000000e+00> : vector<16xf32>
    %11 = vector.multi_reduction <add>, %10, %cst_7 [1] : vector<16x64xf32> to vector<16xf32>
    %12 = vector.shape_cast %11 : vector<16xf32> to vector<16x1xf32>
    %cst_8 = arith.constant 6.400000e+01 : f32
    %13 = vector.broadcast %cst_8 : f32 to vector<16x1xf32>
    %14 = arith.divf %12, %13 : vector<16x1xf32>
    %cst_9 = arith.constant 9.99999974E-6 : f32
    %15 = vector.broadcast %cst_9 : f32 to vector<16x1xf32>
    %16 = arith.addf %14, %15 : vector<16x1xf32>
    %17 = math.rsqrt %16 : vector<16x1xf32>
    %18 = vector.broadcast %17 : vector<16x1xf32> to vector<16x64xf32>
    %19 = arith.mulf %9, %18 : vector<16x64xf32>
    %20 = vector.broadcast %2 : vector<1x64xf32> to vector<16x64xf32>
    %21 = arith.mulf %19, %20 : vector<16x64xf32>
    %22 = vector.broadcast %3 : vector<1x64xf32> to vector<16x64xf32>
    %23 = arith.addf %21, %22 : vector<16x64xf32>
    %c0_10 = arith.constant 0 : index
    %c0_11 = arith.constant 0 : index
    %c0_12 = arith.constant 0 : index
    %24 = vector.load %arg4[%c0_10, %c0_11, %c0_12] : memref<1x16x64xf32, #tpu.memory_space<vmem>>, vector<1x16x64xf32>
    %25 = vector.shape_cast %24 : vector<1x16x64xf32> to vector<16x64xf32>
    %26 = vector.shape_cast %23 : vector<16x64xf32> to vector<1x16x64xf32>
    tpu.vector_store %arg4[%c0_10, %c0_11, %c0_12], %26 {strides = array<i32>} : memref<1x16x64xf32, #tpu.memory_space<vmem>>, vector<1x16x64xf32>,
    return
  }
  func.func @transform_0(%arg0: i32) -> (i32, i32, i32) {
    %c0_i32 = arith.constant 0 : i32
    %c0_i32_0 = arith.constant 0 : i32
    %c0_i32_1 = arith.constant 0 : i32
    return %arg0, %c0_i32, %c0_i32_0 : i32, i32, i32
  }
  func.func @transform_1(%arg0: i32) -> (i32, i32) {
    %c0_i32 = arith.constant 0 : i32
    %c0_i32_0 = arith.constant 0 : i32
    %c0_i32_1 = arith.constant 0 : i32
    return %c0_i32, %c0_i32_0 : i32, i32
  }
  func.func @transform_2(%arg0: i32) -> (i32, i32) {
    %c0_i32 = arith.constant 0 : i32
    %c0_i32_0 = arith.constant 0 : i32
    %c0_i32_1 = arith.constant 0 : i32
    return %c0_i32, %c0_i32_0 : i32, i32
  }
  func.func @transform_3(%arg0: i32) -> (i32, i32, i32) {
    %c0_i32 = arith.constant 0 : i32
    %c0_i32_0 = arith.constant 0 : i32
    %c0_i32_1 = arith.constant 0 : i32
    return %arg0, %c0_i32, %c0_i32_0 : i32, i32, i32
  }
}

module attributes {stable_mosaic.version = 11 : i64} {
  func.func @_cross_attn_block_kernel(%arg0: i32, %arg1: memref<1x8x64xf32, #tpu.memory_space<vmem>>, %arg2: memref<1x16x64xf32, #tpu.memory_space<vmem>>, %arg3: memref<1x1x16xf32, #tpu.memory_space<vmem>>, %arg4: memref<1x64xf32, #tpu.memory_space<vmem>>, %arg5: memref<1x64xf32, #tpu.memory_space<vmem>>, %arg6: memref<64x64xbf16, #tpu.memory_space<vmem>>, %arg7: memref<1x64xf32, #tpu.memory_space<vmem>>, %arg8: memref<64x128xbf16, #tpu.memory_space<vmem>>, %arg9: memref<1x128xf32, #tpu.memory_space<vmem>>, %arg10: memref<64x64xbf16, #tpu.memory_space<vmem>>, %arg11: memref<1x64xf32, #tpu.memory_space<vmem>>, %arg12: memref<1x8x64xf32, #tpu.memory_space<vmem>>) attributes {dimension_semantics = [#tpu.dimension_semantics<parallel>], iteration_bounds = array<i64: 2>, scalar_prefetch = 0 : i64, scratch_operands = 0 : i64, tpu.core_type = #tpu.core_type<tc>, window_params = [{transform_indices = @transform_0, window_bounds = array<i64: 1, 8, 64>}, {transform_indices = @transform_1, window_bounds = array<i64: 1, 16, 64>}, {transform_indices = @transform_2, window_bounds = array<i64: 1, 1, 16>}, {pipeline_mode = #tpu.pipeline_mode<synchronous>, transform_indices = @transform_3, window_bounds = array<i64: 1, 64>}, {pipeline_mode = #tpu.pipeline_mode<synchronous>, transform_indices = @transform_4, window_bounds = array<i64: 1, 64>}, {pipeline_mode = #tpu.pipeline_mode<synchronous>, transform_indices = @transform_5, window_bounds = array<i64: 64, 64>}, {pipeline_mode = #tpu.pipeline_mode<synchronous>, transform_indices = @transform_6, window_bounds = array<i64: 1, 64>}, {pipeline_mode = #tpu.pipeline_mode<synchronous>, transform_indices = @transform_7, window_bounds = array<i64: 64, 128>}, {pipeline_mode = #tpu.pipeline_mode<synchronous>, transform_indices = @transform_8, window_bounds = array<i64: 1, 128>}, {pipeline_mode = #tpu.pipeline_mode<synchronous>, transform_indices = @transform_9, window_bounds = array<i64: 64, 64>}, {pipeline_mode = #tpu.pipeline_mode<synchronous>, transform_indices = @transform_10, window_bounds = array<i64: 1, 64>}, {transform_indices = @transform_11, window_bounds = array<i64: 1, 8, 64>}]} {
    %c0 = arith.constant 0 : index
    %c0_0 = arith.constant 0 : index
    %c0_1 = arith.constant 0 : index
    %0 = vector.load %arg1[%c0, %c0_0, %c0_1] : memref<1x8x64xf32, #tpu.memory_space<vmem>>, vector<1x8x64xf32>
    %1 = vector.shape_cast %0 : vector<1x8x64xf32> to vector<8x64xf32>
    %c0_2 = arith.constant 0 : index
    %c0_3 = arith.constant 0 : index
    %c0_4 = arith.constant 0 : index
    %2 = vector.load %arg2[%c0_2, %c0_3, %c0_4] : memref<1x16x64xf32, #tpu.memory_space<vmem>>, vector<1x16x64xf32>
    %3 = vector.shape_cast %2 : vector<1x16x64xf32> to vector<16x64xf32>
    %c0_5 = arith.constant 0 : index
    %c0_6 = arith.constant 0 : index
    %4 = vector.load %arg4[%c0_5, %c0_6] : memref<1x64xf32, #tpu.memory_space<vmem>>, vector<1x64xf32>
    %c0_7 = arith.constant 0 : index
    %c0_8 = arith.constant 0 : index
    %5 = vector.load %arg5[%c0_7, %c0_8] : memref<1x64xf32, #tpu.memory_space<vmem>>, vector<1x64xf32>
    %cst = arith.constant dense<0.000000e+00> : vector<8xf32>
    %6 = vector.multi_reduction <add>, %1, %cst [1] : vector<8x64xf32> to vector<8xf32>
    %7 = vector.shape_cast %6 : vector<8xf32> to vector<8x1xf32>
    %cst_9 = arith.constant 6.400000e+01 : f32
    %8 = vector.broadcast %cst_9 : f32 to vector<8x1xf32>
    %9 = arith.divf %7, %8 : vector<8x1xf32>
    %10 = vector.broadcast %9 : vector<8x1xf32> to vector<8x64xf32>
    %11 = arith.subf %1, %10 : vector<8x64xf32>
    %12 = arith.mulf %11, %11 : vector<8x64xf32>
    %cst_10 = arith.constant dense<0.000000e+00> : vector<8xf32>
    %13 = vector.multi_reduction <add>, %12, %cst_10 [1] : vector<8x64xf32> to vector<8xf32>
    %14 = vector.shape_cast %13 : vector<8xf32> to vector<8x1xf32>
    %cst_11 = arith.constant 6.400000e+01 : f32
    %15 = vector.broadcast %cst_11 : f32 to vector<8x1xf32>
    %16 = arith.divf %14, %15 : vector<8x1xf32>
    %cst_12 = arith.constant 9.99999974E-6 : f32
    %17 = vector.broadcast %cst_12 : f32 to vector<8x1xf32>
    %18 = arith.addf %16, %17 : vector<8x1xf32>
    %19 = math.rsqrt %18 : vector<8x1xf32>
    %20 = vector.broadcast %19 : vector<8x1xf32> to vector<8x64xf32>
    %21 = arith.mulf %11, %20 : vector<8x64xf32>
    %22 = vector.broadcast %4 : vector<1x64xf32> to vector<8x64xf32>
    %23 = arith.mulf %21, %22 : vector<8x64xf32>
    %24 = vector.broadcast %5 : vector<1x64xf32> to vector<8x64xf32>
    %25 = arith.addf %23, %24 : vector<8x64xf32>
    %26 = arith.truncf %25 : vector<8x64xf32> to vector<8x64xbf16>
    %c0_13 = arith.constant 0 : index
    %c0_14 = arith.constant 0 : index
    %27 = vector.load %arg6[%c0_13, %c0_14] : memref<64x64xbf16, #tpu.memory_space<vmem>>, vector<64x64xbf16>
    %cst_15 = arith.constant dense<0.000000e+00> : vector<8x64xf32>
    %28 = tpu.matmul %26, %27, %cst_15 {dimension_numbers = #tpu.dot_dimension_numbers<[1], [0], [0], [1], [0, 0, 1, 1], [], []>} : vector<8x64xbf16>, vector<64x64xbf16>, vector<8x64xf32> -> vector<8x64xf32>
    %c0_16 = arith.constant 0 : index
    %c0_17 = arith.constant 0 : index
    %29 = vector.load %arg7[%c0_16, %c0_17] : memref<1x64xf32, #tpu.memory_space<vmem>>, vector<1x64xf32>
    %30 = vector.broadcast %29 : vector<1x64xf32> to vector<8x64xf32>
    %31 = arith.addf %28, %30 : vector<8x64xf32>
    %32 = arith.truncf %3 : vector<16x64xf32> to vector<16x64xbf16>
    %c0_18 = arith.constant 0 : index
    %c0_19 = arith.constant 0 : index
    %33 = vector.load %arg8[%c0_18, %c0_19] : memref<64x128xbf16, #tpu.memory_space<vmem>>, vector<64x128xbf16>
    %cst_20 = arith.constant dense<0.000000e+00> : vector<16x128xf32>
    %34 = tpu.matmul %32, %33, %cst_20 {dimension_numbers = #tpu.dot_dimension_numbers<[1], [0], [0], [1], [0, 0, 1, 1], [], []>} : vector<16x64xbf16>, vector<64x128xbf16>, vector<16x128xf32> -> vector<16x128xf32>
    %c0_21 = arith.constant 0 : index
    %c0_22 = arith.constant 0 : index
    %35 = vector.load %arg9[%c0_21, %c0_22] : memref<1x128xf32, #tpu.memory_space<vmem>>, vector<1x128xf32>
    %36 = vector.broadcast %35 : vector<1x128xf32> to vector<16x128xf32>
    %37 = arith.addf %34, %36 : vector<16x128xf32>
    %c0_23 = arith.constant 0 : index
    %c0_24 = arith.constant 0 : index
    %c0_25 = arith.constant 0 : index
    %38 = vector.load %arg3[%c0_23, %c0_24, %c0_25] : memref<1x1x16xf32, #tpu.memory_space<vmem>>, vector<1x1x16xf32>
    %39 = vector.shape_cast %38 : vector<1x1x16xf32> to vector<1x16xf32>
    %cst_26 = arith.constant 0.000000e+00 : f32
    %40 = vector.broadcast %cst_26 : f32 to vector<1x16xf32>
    %41 = arith.cmpf ogt, %39, %40 : vector<1x16xf32>
    %42 = vector.shape_cast %41 : vector<1x16xi1> to vector<1x16xi1>
    %43 = vector.broadcast %42 : vector<1x16xi1> to vector<8x16xi1>
    %44 = vector.extract_strided_slice %37 {offsets = [0, 0], sizes = [16, 64], strides = [1, 1]} : vector<16x128xf32> to vector<16x64xf32>
    %45 = vector.extract_strided_slice %37 {offsets = [0, 64], sizes = [16, 64], strides = [1, 1]} : vector<16x128xf32> to vector<16x64xf32>
    %46 = vector.extract_strided_slice %31 {offsets = [0, 0], sizes = [8, 16], strides = [1, 1]} : vector<8x64xf32> to vector<8x16xf32>
    %47 = vector.extract_strided_slice %44 {offsets = [0, 0], sizes = [16, 16], strides = [1, 1]} : vector<16x64xf32> to vector<16x16xf32>
    %cst_27 = arith.constant dense<0.000000e+00> : vector<8x16xf32>
    %48 = tpu.matmul %46, %47, %cst_27 {dimension_numbers = #tpu.dot_dimension_numbers<[1], [1], [0], [0], [0, 0, 1, 0], [], []>} : vector<8x16xf32>, vector<16x16xf32>, vector<8x16xf32> -> vector<8x16xf32>
    %cst_28 = arith.constant 2.500000e-01 : f32
    %49 = vector.broadcast %cst_28 : f32 to vector<8x16xf32>
    %50 = arith.mulf %48, %49 : vector<8x16xf32>
    %cst_29 = arith.constant -3.40282347E+38 : f32
    %51 = vector.broadcast %cst_29 : f32 to vector<8x16xf32>
    %52 = arith.select %43, %50, %51 : vector<8x16xi1>, vector<8x16xf32>
    %cst_30 = arith.constant dense<0xFF800000> : vector<8xf32>
    %53 = vector.multi_reduction <maximumf>, %52, %cst_30 [1] : vector<8x16xf32> to vector<8xf32>
    %54 = vector.shape_cast %53 : vector<8xf32> to vector<8x1xf32>
    %55 = vector.broadcast %54 : vector<8x1xf32> to vector<8x16xf32>
    %56 = arith.subf %52, %55 : vector<8x16xf32>
    %57 = math.exp %56 : vector<8x16xf32>
    %cst_31 = arith.constant dense<0.000000e+00> : vector<8xf32>
    %58 = vector.multi_reduction <add>, %57, %cst_31 [1] : vector<8x16xf32> to vector<8xf32>
    %59 = vector.shape_cast %58 : vector<8xf32> to vector<8x1xf32>
    %60 = tpu.reciprocal %59 {approx = true} : vector<8x1xf32> -> vector<8x1xf32>
    %61 = vector.broadcast %60 : vector<8x1xf32> to vector<8x16xf32>
    %62 = arith.mulf %57, %61 : vector<8x16xf32>
    %cst_32 = arith.constant 0.000000e+00 : f32
    %63 = vector.broadcast %cst_32 : f32 to vector<8x16xf32>
    %64 = arith.select %43, %62, %63 : vector<8x16xi1>, vector<8x16xf32>
    %65 = vector.extract_strided_slice %45 {offsets = [0, 0], sizes = [16, 16], strides = [1, 1]} : vector<16x64xf32> to vector<16x16xf32>
    %cst_33 = arith.constant dense<0.000000e+00> : vector<8x16xf32>
    %66 = tpu.matmul %64, %65, %cst_33 {dimension_numbers = #tpu.dot_dimension_numbers<[1], [0], [0], [1], [0, 0, 1, 1], [], []>} : vector<8x16xf32>, vector<16x16xf32>, vector<8x16xf32> -> vector<8x16xf32>
    %67 = vector.extract_strided_slice %31 {offsets = [0, 16], sizes = [8, 16], strides = [1, 1]} : vector<8x64xf32> to vector<8x16xf32>
    %68 = vector.extract_strided_slice %44 {offsets = [0, 16], sizes = [16, 16], strides = [1, 1]} : vector<16x64xf32> to vector<16x16xf32>
    %cst_34 = arith.constant dense<0.000000e+00> : vector<8x16xf32>
    %69 = tpu.matmul %67, %68, %cst_34 {dimension_numbers = #tpu.dot_dimension_numbers<[1], [1], [0], [0], [0, 0, 1, 0], [], []>} : vector<8x16xf32>, vector<16x16xf32>, vector<8x16xf32> -> vector<8x16xf32>
    %cst_35 = arith.constant 2.500000e-01 : f32
    %70 = vector.broadcast %cst_35 : f32 to vector<8x16xf32>
    %71 = arith.mulf %69, %70 : vector<8x16xf32>
    %cst_36 = arith.constant -3.40282347E+38 : f32
    %72 = vector.broadcast %cst_36 : f32 to vector<8x16xf32>
    %73 = arith.select %43, %71, %72 : vector<8x16xi1>, vector<8x16xf32>
    %cst_37 = arith.constant dense<0xFF800000> : vector<8xf32>
    %74 = vector.multi_reduction <maximumf>, %73, %cst_37 [1] : vector<8x16xf32> to vector<8xf32>
    %75 = vector.shape_cast %74 : vector<8xf32> to vector<8x1xf32>
    %76 = vector.broadcast %75 : vector<8x1xf32> to vector<8x16xf32>
    %77 = arith.subf %73, %76 : vector<8x16xf32>
    %78 = math.exp %77 : vector<8x16xf32>
    %cst_38 = arith.constant dense<0.000000e+00> : vector<8xf32>
    %79 = vector.multi_reduction <add>, %78, %cst_38 [1] : vector<8x16xf32> to vector<8xf32>
    %80 = vector.shape_cast %79 : vector<8xf32> to vector<8x1xf32>
    %81 = tpu.reciprocal %80 {approx = true} : vector<8x1xf32> -> vector<8x1xf32>
    %82 = vector.broadcast %81 : vector<8x1xf32> to vector<8x16xf32>
    %83 = arith.mulf %78, %82 : vector<8x16xf32>
    %cst_39 = arith.constant 0.000000e+00 : f32
    %84 = vector.broadcast %cst_39 : f32 to vector<8x16xf32>
    %85 = arith.select %43, %83, %84 : vector<8x16xi1>, vector<8x16xf32>
    %86 = vector.extract_strided_slice %45 {offsets = [0, 16], sizes = [16, 16], strides = [1, 1]} : vector<16x64xf32> to vector<16x16xf32>
    %cst_40 = arith.constant dense<0.000000e+00> : vector<8x16xf32>
    %87 = tpu.matmul %85, %86, %cst_40 {dimension_numbers = #tpu.dot_dimension_numbers<[1], [0], [0], [1], [0, 0, 1, 1], [], []>} : vector<8x16xf32>, vector<16x16xf32>, vector<8x16xf32> -> vector<8x16xf32>
    %88 = vector.extract_strided_slice %31 {offsets = [0, 32], sizes = [8, 16], strides = [1, 1]} : vector<8x64xf32> to vector<8x16xf32>
    %89 = vector.extract_strided_slice %44 {offsets = [0, 32], sizes = [16, 16], strides = [1, 1]} : vector<16x64xf32> to vector<16x16xf32>
    %cst_41 = arith.constant dense<0.000000e+00> : vector<8x16xf32>
    %90 = tpu.matmul %88, %89, %cst_41 {dimension_numbers = #tpu.dot_dimension_numbers<[1], [1], [0], [0], [0, 0, 1, 0], [], []>} : vector<8x16xf32>, vector<16x16xf32>, vector<8x16xf32> -> vector<8x16xf32>
    %cst_42 = arith.constant 2.500000e-01 : f32
    %91 = vector.broadcast %cst_42 : f32 to vector<8x16xf32>
    %92 = arith.mulf %90, %91 : vector<8x16xf32>
    %cst_43 = arith.constant -3.40282347E+38 : f32
    %93 = vector.broadcast %cst_43 : f32 to vector<8x16xf32>
    %94 = arith.select %43, %92, %93 : vector<8x16xi1>, vector<8x16xf32>
    %cst_44 = arith.constant dense<0xFF800000> : vector<8xf32>
    %95 = vector.multi_reduction <maximumf>, %94, %cst_44 [1] : vector<8x16xf32> to vector<8xf32>
    %96 = vector.shape_cast %95 : vector<8xf32> to vector<8x1xf32>
    %97 = vector.broadcast %96 : vector<8x1xf32> to vector<8x16xf32>
    %98 = arith.subf %94, %97 : vector<8x16xf32>
    %99 = math.exp %98 : vector<8x16xf32>
    %cst_45 = arith.constant dense<0.000000e+00> : vector<8xf32>
    %100 = vector.multi_reduction <add>, %99, %cst_45 [1] : vector<8x16xf32> to vector<8xf32>
    %101 = vector.shape_cast %100 : vector<8xf32> to vector<8x1xf32>
    %102 = tpu.reciprocal %101 {approx = true} : vector<8x1xf32> -> vector<8x1xf32>
    %103 = vector.broadcast %102 : vector<8x1xf32> to vector<8x16xf32>
    %104 = arith.mulf %99, %103 : vector<8x16xf32>
    %cst_46 = arith.constant 0.000000e+00 : f32
    %105 = vector.broadcast %cst_46 : f32 to vector<8x16xf32>
    %106 = arith.select %43, %104, %105 : vector<8x16xi1>, vector<8x16xf32>
    %107 = vector.extract_strided_slice %45 {offsets = [0, 32], sizes = [16, 16], strides = [1, 1]} : vector<16x64xf32> to vector<16x16xf32>
    %cst_47 = arith.constant dense<0.000000e+00> : vector<8x16xf32>
    %108 = tpu.matmul %106, %107, %cst_47 {dimension_numbers = #tpu.dot_dimension_numbers<[1], [0], [0], [1], [0, 0, 1, 1], [], []>} : vector<8x16xf32>, vector<16x16xf32>, vector<8x16xf32> -> vector<8x16xf32>
    %109 = vector.extract_strided_slice %31 {offsets = [0, 48], sizes = [8, 16], strides = [1, 1]} : vector<8x64xf32> to vector<8x16xf32>
    %110 = vector.extract_strided_slice %44 {offsets = [0, 48], sizes = [16, 16], strides = [1, 1]} : vector<16x64xf32> to vector<16x16xf32>
    %cst_48 = arith.constant dense<0.000000e+00> : vector<8x16xf32>
    %111 = tpu.matmul %109, %110, %cst_48 {dimension_numbers = #tpu.dot_dimension_numbers<[1], [1], [0], [0], [0, 0, 1, 0], [], []>} : vector<8x16xf32>, vector<16x16xf32>, vector<8x16xf32> -> vector<8x16xf32>
    %cst_49 = arith.constant 2.500000e-01 : f32
    %112 = vector.broadcast %cst_49 : f32 to vector<8x16xf32>
    %113 = arith.mulf %111, %112 : vector<8x16xf32>
    %cst_50 = arith.constant -3.40282347E+38 : f32
    %114 = vector.broadcast %cst_50 : f32 to vector<8x16xf32>
    %115 = arith.select %43, %113, %114 : vector<8x16xi1>, vector<8x16xf32>
    %cst_51 = arith.constant dense<0xFF800000> : vector<8xf32>
    %116 = vector.multi_reduction <maximumf>, %115, %cst_51 [1] : vector<8x16xf32> to vector<8xf32>
    %117 = vector.shape_cast %116 : vector<8xf32> to vector<8x1xf32>
    %118 = vector.broadcast %117 : vector<8x1xf32> to vector<8x16xf32>
    %119 = arith.subf %115, %118 : vector<8x16xf32>
    %120 = math.exp %119 : vector<8x16xf32>
    %cst_52 = arith.constant dense<0.000000e+00> : vector<8xf32>
    %121 = vector.multi_reduction <add>, %120, %cst_52 [1] : vector<8x16xf32> to vector<8xf32>
    %122 = vector.shape_cast %121 : vector<8xf32> to vector<8x1xf32>
    %123 = tpu.reciprocal %122 {approx = true} : vector<8x1xf32> -> vector<8x1xf32>
    %124 = vector.broadcast %123 : vector<8x1xf32> to vector<8x16xf32>
    %125 = arith.mulf %120, %124 : vector<8x16xf32>
    %cst_53 = arith.constant 0.000000e+00 : f32
    %126 = vector.broadcast %cst_53 : f32 to vector<8x16xf32>
    %127 = arith.select %43, %125, %126 : vector<8x16xi1>, vector<8x16xf32>
    %128 = vector.extract_strided_slice %45 {offsets = [0, 48], sizes = [16, 16], strides = [1, 1]} : vector<16x64xf32> to vector<16x16xf32>
    %cst_54 = arith.constant dense<0.000000e+00> : vector<8x16xf32>
    %129 = tpu.matmul %127, %128, %cst_54 {dimension_numbers = #tpu.dot_dimension_numbers<[1], [0], [0], [1], [0, 0, 1, 1], [], []>} : vector<8x16xf32>, vector<16x16xf32>, vector<8x16xf32> -> vector<8x16xf32>
    %130 = tpu.concatenate %66, %87, %108, %129 in 1 : vector<8x16xf32>, vector<8x16xf32>, vector<8x16xf32>, vector<8x16xf32> -> vector<8x64xf32>
    %131 = arith.truncf %130 : vector<8x64xf32> to vector<8x64xbf16>
    %c0_55 = arith.constant 0 : index
    %c0_56 = arith.constant 0 : index
    %132 = vector.load %arg10[%c0_55, %c0_56] : memref<64x64xbf16, #tpu.memory_space<vmem>>, vector<64x64xbf16>
    %cst_57 = arith.constant dense<0.000000e+00> : vector<8x64xf32>
    %133 = tpu.matmul %131, %132, %cst_57 {dimension_numbers = #tpu.dot_dimension_numbers<[1], [0], [0], [1], [0, 0, 1, 1], [], []>} : vector<8x64xbf16>, vector<64x64xbf16>, vector<8x64xf32> -> vector<8x64xf32>
    %c0_58 = arith.constant 0 : index
    %c0_59 = arith.constant 0 : index
    %134 = vector.load %arg11[%c0_58, %c0_59] : memref<1x64xf32, #tpu.memory_space<vmem>>, vector<1x64xf32>
    %135 = vector.broadcast %134 : vector<1x64xf32> to vector<8x64xf32>
    %136 = arith.addf %133, %135 : vector<8x64xf32>
    %137 = arith.addf %1, %136 : vector<8x64xf32>
    %c0_60 = arith.constant 0 : index
    %c0_61 = arith.constant 0 : index
    %c0_62 = arith.constant 0 : index
    %138 = vector.load %arg12[%c0_60, %c0_61, %c0_62] : memref<1x8x64xf32, #tpu.memory_space<vmem>>, vector<1x8x64xf32>
    %139 = vector.shape_cast %138 : vector<1x8x64xf32> to vector<8x64xf32>
    %140 = vector.shape_cast %137 : vector<8x64xf32> to vector<1x8x64xf32>
    tpu.vector_store %arg12[%c0_60, %c0_61, %c0_62], %140 {strides = array<i32>} : memref<1x8x64xf32, #tpu.memory_space<vmem>>, vector<1x8x64xf32>,
    return
  }
  func.func @transform_0(%arg0: i32) -> (i32, i32, i32) {
    %c0_i32 = arith.constant 0 : i32
    %c0_i32_0 = arith.constant 0 : i32
    %c0_i32_1 = arith.constant 0 : i32
    return %arg0, %c0_i32, %c0_i32_0 : i32, i32, i32
  }
  func.func @transform_1(%arg0: i32) -> (i32, i32, i32) {
    %c0_i32 = arith.constant 0 : i32
    %c0_i32_0 = arith.constant 0 : i32
    %c0_i32_1 = arith.constant 0 : i32
    return %arg0, %c0_i32, %c0_i32_0 : i32, i32, i32
  }
  func.func @transform_2(%arg0: i32) -> (i32, i32, i32) {
    %c0_i32 = arith.constant 0 : i32
    %c0_i32_0 = arith.constant 0 : i32
    %c0_i32_1 = arith.constant 0 : i32
    return %arg0, %c0_i32, %c0_i32_0 : i32, i32, i32
  }
  func.func @transform_3(%arg0: i32) -> (i32, i32) {
    %c0_i32 = arith.constant 0 : i32
    %c0_i32_0 = arith.constant 0 : i32
    %c0_i32_1 = arith.constant 0 : i32
    return %c0_i32, %c0_i32_0 : i32, i32
  }
  func.func @transform_4(%arg0: i32) -> (i32, i32) {
    %c0_i32 = arith.constant 0 : i32
    %c0_i32_0 = arith.constant 0 : i32
    %c0_i32_1 = arith.constant 0 : i32
    return %c0_i32, %c0_i32_0 : i32, i32
  }
  func.func @transform_5(%arg0: i32) -> (i32, i32) {
    %c0_i32 = arith.constant 0 : i32
    %c0_i32_0 = arith.constant 0 : i32
    %c0_i32_1 = arith.constant 0 : i32
    return %c0_i32, %c0_i32_0 : i32, i32
  }
  func.func @transform_6(%arg0: i32) -> (i32, i32) {
    %c0_i32 = arith.constant 0 : i32
    %c0_i32_0 = arith.constant 0 : i32
    %c0_i32_1 = arith.constant 0 : i32
    return %c0_i32, %c0_i32_0 : i32, i32
  }
  func.func @transform_7(%arg0: i32) -> (i32, i32) {
    %c0_i32 = arith.constant 0 : i32
    %c0_i32_0 = arith.constant 0 : i32
    %c0_i32_1 = arith.constant 0 : i32
    return %c0_i32, %c0_i32_0 : i32, i32
  }
  func.func @transform_8(%arg0: i32) -> (i32, i32) {
    %c0_i32 = arith.constant 0 : i32
    %c0_i32_0 = arith.constant 0 : i32
    %c0_i32_1 = arith.constant 0 : i32
    return %c0_i32, %c0_i32_0 : i32, i32
  }
  func.func @transform_9(%arg0: i32) -> (i32, i32) {
    %c0_i32 = arith.constant 0 : i32
    %c0_i32_0 = arith.constant 0 : i32
    %c0_i32_1 = arith.constant 0 : i32
    return %c0_i32, %c0_i32_0 : i32, i32
  }
  func.func @transform_10(%arg0: i32) -> (i32, i32) {
    %c0_i32 = arith.constant 0 : i32
    %c0_i32_0 = arith.constant 0 : i32
    %c0_i32_1 = arith.constant 0 : i32
    return %c0_i32, %c0_i32_0 : i32, i32
  }
  func.func @transform_11(%arg0: i32) -> (i32, i32, i32) {
    %c0_i32 = arith.constant 0 : i32
    %c0_i32_0 = arith.constant 0 : i32
    %c0_i32_1 = arith.constant 0 : i32
    return %arg0, %c0_i32, %c0_i32_0 : i32, i32, i32
  }
}

module attributes {stable_mosaic.version = 11 : i64} {
  func.func @_ln_linear_kernel(%arg0: i32, %arg1: i32, %arg2: memref<16x64xf32, #tpu.memory_space<vmem>>, %arg3: memref<1x64xf32, #tpu.memory_space<vmem>>, %arg4: memref<1x64xf32, #tpu.memory_space<vmem>>, %arg5: memref<64x128xbf16, #tpu.memory_space<vmem>>, %arg6: memref<1x128xf32, #tpu.memory_space<vmem>>, %arg7: memref<16x128xf32, #tpu.memory_space<vmem>>) attributes {dimension_semantics = [#tpu.dimension_semantics<parallel>, #tpu.dimension_semantics<parallel>], iteration_bounds = array<i64: 1, 1>, scalar_prefetch = 0 : i64, scratch_operands = 0 : i64, tpu.core_type = #tpu.core_type<tc>, window_params = [{transform_indices = @transform_0, window_bounds = array<i64: 16, 64>}, {pipeline_mode = #tpu.pipeline_mode<synchronous>, transform_indices = @transform_1, window_bounds = array<i64: 1, 64>}, {pipeline_mode = #tpu.pipeline_mode<synchronous>, transform_indices = @transform_2, window_bounds = array<i64: 1, 64>}, {transform_indices = @transform_3, window_bounds = array<i64: 64, 128>}, {transform_indices = @transform_4, window_bounds = array<i64: 1, 128>}, {transform_indices = @transform_5, window_bounds = array<i64: 16, 128>}]} {
    %c0 = arith.constant 0 : index
    %c0_0 = arith.constant 0 : index
    %0 = vector.load %arg2[%c0, %c0_0] : memref<16x64xf32, #tpu.memory_space<vmem>>, vector<16x64xf32>
    %c0_1 = arith.constant 0 : index
    %c0_2 = arith.constant 0 : index
    %1 = vector.load %arg3[%c0_1, %c0_2] : memref<1x64xf32, #tpu.memory_space<vmem>>, vector<1x64xf32>
    %c0_3 = arith.constant 0 : index
    %c0_4 = arith.constant 0 : index
    %2 = vector.load %arg4[%c0_3, %c0_4] : memref<1x64xf32, #tpu.memory_space<vmem>>, vector<1x64xf32>
    %cst = arith.constant dense<0.000000e+00> : vector<16xf32>
    %3 = vector.multi_reduction <add>, %0, %cst [1] : vector<16x64xf32> to vector<16xf32>
    %4 = vector.shape_cast %3 : vector<16xf32> to vector<16x1xf32>
    %cst_5 = arith.constant 6.400000e+01 : f32
    %5 = vector.broadcast %cst_5 : f32 to vector<16x1xf32>
    %6 = arith.divf %4, %5 : vector<16x1xf32>
    %7 = vector.broadcast %6 : vector<16x1xf32> to vector<16x64xf32>
    %8 = arith.subf %0, %7 : vector<16x64xf32>
    %9 = arith.mulf %8, %8 : vector<16x64xf32>
    %cst_6 = arith.constant dense<0.000000e+00> : vector<16xf32>
    %10 = vector.multi_reduction <add>, %9, %cst_6 [1] : vector<16x64xf32> to vector<16xf32>
    %11 = vector.shape_cast %10 : vector<16xf32> to vector<16x1xf32>
    %cst_7 = arith.constant 6.400000e+01 : f32
    %12 = vector.broadcast %cst_7 : f32 to vector<16x1xf32>
    %13 = arith.divf %11, %12 : vector<16x1xf32>
    %cst_8 = arith.constant 9.99999974E-6 : f32
    %14 = vector.broadcast %cst_8 : f32 to vector<16x1xf32>
    %15 = arith.addf %13, %14 : vector<16x1xf32>
    %16 = math.rsqrt %15 : vector<16x1xf32>
    %17 = vector.broadcast %16 : vector<16x1xf32> to vector<16x64xf32>
    %18 = arith.mulf %8, %17 : vector<16x64xf32>
    %19 = vector.broadcast %1 : vector<1x64xf32> to vector<16x64xf32>
    %20 = arith.mulf %18, %19 : vector<16x64xf32>
    %21 = vector.broadcast %2 : vector<1x64xf32> to vector<16x64xf32>
    %22 = arith.addf %20, %21 : vector<16x64xf32>
    %23 = arith.truncf %22 : vector<16x64xf32> to vector<16x64xbf16>
    %c0_9 = arith.constant 0 : index
    %c0_10 = arith.constant 0 : index
    %24 = vector.load %arg5[%c0_9, %c0_10] : memref<64x128xbf16, #tpu.memory_space<vmem>>, vector<64x128xbf16>
    %cst_11 = arith.constant dense<0.000000e+00> : vector<16x128xf32>
    %25 = tpu.matmul %23, %24, %cst_11 {dimension_numbers = #tpu.dot_dimension_numbers<[1], [0], [0], [1], [0, 0, 1, 1], [], []>} : vector<16x64xbf16>, vector<64x128xbf16>, vector<16x128xf32> -> vector<16x128xf32>
    %c0_12 = arith.constant 0 : index
    %c0_13 = arith.constant 0 : index
    %26 = vector.load %arg6[%c0_12, %c0_13] : memref<1x128xf32, #tpu.memory_space<vmem>>, vector<1x128xf32>
    %27 = vector.broadcast %26 : vector<1x128xf32> to vector<16x128xf32>
    %28 = arith.addf %25, %27 : vector<16x128xf32>
    %c0_14 = arith.constant 0 : index
    %c0_15 = arith.constant 0 : index
    %29 = vector.load %arg7[%c0_14, %c0_15] : memref<16x128xf32, #tpu.memory_space<vmem>>, vector<16x128xf32>
    tpu.vector_store %arg7[%c0_14, %c0_15], %28 {strides = array<i32>} : memref<16x128xf32, #tpu.memory_space<vmem>>, vector<16x128xf32>,
    return
  }
  func.func @transform_0(%arg0: i32, %arg1: i32) -> (i32, i32) {
    %c0_i32 = arith.constant 0 : i32
    %c0_i32_0 = arith.constant 0 : i32
    return %arg0, %c0_i32 : i32, i32
  }
  func.func @transform_1(%arg0: i32, %arg1: i32) -> (i32, i32) {
    %c0_i32 = arith.constant 0 : i32
    %c0_i32_0 = arith.constant 0 : i32
    %c0_i32_1 = arith.constant 0 : i32
    return %c0_i32, %c0_i32_0 : i32, i32
  }
  func.func @transform_2(%arg0: i32, %arg1: i32) -> (i32, i32) {
    %c0_i32 = arith.constant 0 : i32
    %c0_i32_0 = arith.constant 0 : i32
    %c0_i32_1 = arith.constant 0 : i32
    return %c0_i32, %c0_i32_0 : i32, i32
  }
  func.func @transform_3(%arg0: i32, %arg1: i32) -> (i32, i32) {
    %c0_i32 = arith.constant 0 : i32
    %c0_i32_0 = arith.constant 0 : i32
    return %c0_i32, %arg1 : i32, i32
  }
  func.func @transform_4(%arg0: i32, %arg1: i32) -> (i32, i32) {
    %c0_i32 = arith.constant 0 : i32
    %c0_i32_0 = arith.constant 0 : i32
    return %c0_i32, %arg1 : i32, i32
  }
  func.func @transform_5(%arg0: i32, %arg1: i32) -> (i32, i32) {
    %c0_i32 = arith.constant 0 : i32
    return %arg0, %arg1 : i32, i32
  }
}

module attributes {stable_mosaic.version = 11 : i64} {
  func.func @_ffn_block_kernel(%arg0: i32, %arg1: memref<1x8x64xf32, #tpu.memory_space<vmem>>, %arg2: memref<1x64xf32, #tpu.memory_space<vmem>>, %arg3: memref<1x64xf32, #tpu.memory_space<vmem>>, %arg4: memref<64x128xbf16, #tpu.memory_space<vmem>>, %arg5: memref<1x128xf32, #tpu.memory_space<vmem>>, %arg6: memref<128x64xbf16, #tpu.memory_space<vmem>>, %arg7: memref<1x64xf32, #tpu.memory_space<vmem>>, %arg8: memref<1x8x64xf32, #tpu.memory_space<vmem>>) attributes {dimension_semantics = [#tpu.dimension_semantics<parallel>], iteration_bounds = array<i64: 2>, scalar_prefetch = 0 : i64, scratch_operands = 0 : i64, tpu.core_type = #tpu.core_type<tc>, window_params = [{transform_indices = @transform_0, window_bounds = array<i64: 1, 8, 64>}, {pipeline_mode = #tpu.pipeline_mode<synchronous>, transform_indices = @transform_1, window_bounds = array<i64: 1, 64>}, {pipeline_mode = #tpu.pipeline_mode<synchronous>, transform_indices = @transform_2, window_bounds = array<i64: 1, 64>}, {pipeline_mode = #tpu.pipeline_mode<synchronous>, transform_indices = @transform_3, window_bounds = array<i64: 64, 128>}, {pipeline_mode = #tpu.pipeline_mode<synchronous>, transform_indices = @transform_4, window_bounds = array<i64: 1, 128>}, {pipeline_mode = #tpu.pipeline_mode<synchronous>, transform_indices = @transform_5, window_bounds = array<i64: 128, 64>}, {pipeline_mode = #tpu.pipeline_mode<synchronous>, transform_indices = @transform_6, window_bounds = array<i64: 1, 64>}, {transform_indices = @transform_7, window_bounds = array<i64: 1, 8, 64>}]} {
    %c0 = arith.constant 0 : index
    %c0_0 = arith.constant 0 : index
    %c0_1 = arith.constant 0 : index
    %0 = vector.load %arg1[%c0, %c0_0, %c0_1] : memref<1x8x64xf32, #tpu.memory_space<vmem>>, vector<1x8x64xf32>
    %1 = vector.shape_cast %0 : vector<1x8x64xf32> to vector<8x64xf32>
    %c0_2 = arith.constant 0 : index
    %c0_3 = arith.constant 0 : index
    %2 = vector.load %arg2[%c0_2, %c0_3] : memref<1x64xf32, #tpu.memory_space<vmem>>, vector<1x64xf32>
    %c0_4 = arith.constant 0 : index
    %c0_5 = arith.constant 0 : index
    %3 = vector.load %arg3[%c0_4, %c0_5] : memref<1x64xf32, #tpu.memory_space<vmem>>, vector<1x64xf32>
    %cst = arith.constant dense<0.000000e+00> : vector<8xf32>
    %4 = vector.multi_reduction <add>, %1, %cst [1] : vector<8x64xf32> to vector<8xf32>
    %5 = vector.shape_cast %4 : vector<8xf32> to vector<8x1xf32>
    %cst_6 = arith.constant 6.400000e+01 : f32
    %6 = vector.broadcast %cst_6 : f32 to vector<8x1xf32>
    %7 = arith.divf %5, %6 : vector<8x1xf32>
    %8 = vector.broadcast %7 : vector<8x1xf32> to vector<8x64xf32>
    %9 = arith.subf %1, %8 : vector<8x64xf32>
    %10 = arith.mulf %9, %9 : vector<8x64xf32>
    %cst_7 = arith.constant dense<0.000000e+00> : vector<8xf32>
    %11 = vector.multi_reduction <add>, %10, %cst_7 [1] : vector<8x64xf32> to vector<8xf32>
    %12 = vector.shape_cast %11 : vector<8xf32> to vector<8x1xf32>
    %cst_8 = arith.constant 6.400000e+01 : f32
    %13 = vector.broadcast %cst_8 : f32 to vector<8x1xf32>
    %14 = arith.divf %12, %13 : vector<8x1xf32>
    %cst_9 = arith.constant 9.99999974E-6 : f32
    %15 = vector.broadcast %cst_9 : f32 to vector<8x1xf32>
    %16 = arith.addf %14, %15 : vector<8x1xf32>
    %17 = math.rsqrt %16 : vector<8x1xf32>
    %18 = vector.broadcast %17 : vector<8x1xf32> to vector<8x64xf32>
    %19 = arith.mulf %9, %18 : vector<8x64xf32>
    %20 = vector.broadcast %2 : vector<1x64xf32> to vector<8x64xf32>
    %21 = arith.mulf %19, %20 : vector<8x64xf32>
    %22 = vector.broadcast %3 : vector<1x64xf32> to vector<8x64xf32>
    %23 = arith.addf %21, %22 : vector<8x64xf32>
    %24 = arith.truncf %23 : vector<8x64xf32> to vector<8x64xbf16>
    %c0_10 = arith.constant 0 : index
    %c0_11 = arith.constant 0 : index
    %25 = vector.load %arg4[%c0_10, %c0_11] : memref<64x128xbf16, #tpu.memory_space<vmem>>, vector<64x128xbf16>
    %cst_12 = arith.constant dense<0.000000e+00> : vector<8x128xf32>
    %26 = tpu.matmul %24, %25, %cst_12 {dimension_numbers = #tpu.dot_dimension_numbers<[1], [0], [0], [1], [0, 0, 1, 1], [], []>} : vector<8x64xbf16>, vector<64x128xbf16>, vector<8x128xf32> -> vector<8x128xf32>
    %c0_13 = arith.constant 0 : index
    %c0_14 = arith.constant 0 : index
    %27 = vector.load %arg5[%c0_13, %c0_14] : memref<1x128xf32, #tpu.memory_space<vmem>>, vector<1x128xf32>
    %28 = vector.broadcast %27 : vector<1x128xf32> to vector<8x128xf32>
    %29 = arith.addf %26, %28 : vector<8x128xf32>
    %cst_15 = arith.constant 0.000000e+00 : f32
    %30 = vector.broadcast %cst_15 : f32 to vector<8x128xf32>
    %31 = arith.maximumf %29, %30 : vector<8x128xf32>
    %32 = arith.truncf %31 : vector<8x128xf32> to vector<8x128xbf16>
    %c0_16 = arith.constant 0 : index
    %c0_17 = arith.constant 0 : index
    %33 = vector.load %arg6[%c0_16, %c0_17] : memref<128x64xbf16, #tpu.memory_space<vmem>>, vector<128x64xbf16>
    %cst_18 = arith.constant dense<0.000000e+00> : vector<8x64xf32>
    %34 = tpu.matmul %32, %33, %cst_18 {dimension_numbers = #tpu.dot_dimension_numbers<[1], [0], [0], [1], [0, 0, 1, 1], [], []>} : vector<8x128xbf16>, vector<128x64xbf16>, vector<8x64xf32> -> vector<8x64xf32>
    %c0_19 = arith.constant 0 : index
    %c0_20 = arith.constant 0 : index
    %35 = vector.load %arg7[%c0_19, %c0_20] : memref<1x64xf32, #tpu.memory_space<vmem>>, vector<1x64xf32>
    %36 = vector.broadcast %35 : vector<1x64xf32> to vector<8x64xf32>
    %37 = arith.addf %34, %36 : vector<8x64xf32>
    %38 = arith.addf %1, %37 : vector<8x64xf32>
    %c0_21 = arith.constant 0 : index
    %c0_22 = arith.constant 0 : index
    %c0_23 = arith.constant 0 : index
    %39 = vector.load %arg8[%c0_21, %c0_22, %c0_23] : memref<1x8x64xf32, #tpu.memory_space<vmem>>, vector<1x8x64xf32>
    %40 = vector.shape_cast %39 : vector<1x8x64xf32> to vector<8x64xf32>
    %41 = vector.shape_cast %38 : vector<8x64xf32> to vector<1x8x64xf32>
    tpu.vector_store %arg8[%c0_21, %c0_22, %c0_23], %41 {strides = array<i32>} : memref<1x8x64xf32, #tpu.memory_space<vmem>>, vector<1x8x64xf32>,
    return
  }
  func.func @transform_0(%arg0: i32) -> (i32, i32, i32) {
    %c0_i32 = arith.constant 0 : i32
    %c0_i32_0 = arith.constant 0 : i32
    %c0_i32_1 = arith.constant 0 : i32
    return %arg0, %c0_i32, %c0_i32_0 : i32, i32, i32
  }
  func.func @transform_1(%arg0: i32) -> (i32, i32) {
    %c0_i32 = arith.constant 0 : i32
    %c0_i32_0 = arith.constant 0 : i32
    %c0_i32_1 = arith.constant 0 : i32
    return %c0_i32, %c0_i32_0 : i32, i32
  }
  func.func @transform_2(%arg0: i32) -> (i32, i32) {
    %c0_i32 = arith.constant 0 : i32
    %c0_i32_0 = arith.constant 0 : i32
    %c0_i32_1 = arith.constant 0 : i32
    return %c0_i32, %c0_i32_0 : i32, i32
  }
  func.func @transform_3(%arg0: i32) -> (i32, i32) {
    %c0_i32 = arith.constant 0 : i32
    %c0_i32_0 = arith.constant 0 : i32
    %c0_i32_1 = arith.constant 0 : i32
    return %c0_i32, %c0_i32_0 : i32, i32
  }
  func.func @transform_4(%arg0: i32) -> (i32, i32) {
    %c0_i32 = arith.constant 0 : i32
    %c0_i32_0 = arith.constant 0 : i32
    %c0_i32_1 = arith.constant 0 : i32
    return %c0_i32, %c0_i32_0 : i32, i32
  }
  func.func @transform_5(%arg0: i32) -> (i32, i32) {
    %c0_i32 = arith.constant 0 : i32
    %c0_i32_0 = arith.constant 0 : i32
    %c0_i32_1 = arith.constant 0 : i32
    return %c0_i32, %c0_i32_0 : i32, i32
  }
  func.func @transform_6(%arg0: i32) -> (i32, i32) {
    %c0_i32 = arith.constant 0 : i32
    %c0_i32_0 = arith.constant 0 : i32
    %c0_i32_1 = arith.constant 0 : i32
    return %c0_i32, %c0_i32_0 : i32, i32
  }
  func.func @transform_7(%arg0: i32) -> (i32, i32, i32) {
    %c0_i32 = arith.constant 0 : i32
    %c0_i32_0 = arith.constant 0 : i32
    %c0_i32_1 = arith.constant 0 : i32
    return %arg0, %c0_i32, %c0_i32_0 : i32, i32, i32
  }
}

module attributes {stable_mosaic.version = 11 : i64} {
  func.func @_label_smoothing_kernel(%arg0: i32, %arg1: memref<16x128xf32, #tpu.memory_space<vmem>>, %arg2: memref<16x1xi32, #tpu.memory_space<vmem>>, %arg3: memref<1x1xf32, #tpu.memory_space<vmem>>) attributes {dimension_semantics = [#tpu.dimension_semantics<arbitrary>], iteration_bounds = array<i64: 1>, scalar_prefetch = 0 : i64, scratch_operands = 0 : i64, tpu.core_type = #tpu.core_type<tc>, window_params = [{transform_indices = @transform_0, window_bounds = array<i64: 16, 128>}, {transform_indices = @transform_1, window_bounds = array<i64: 16, 1>}, {pipeline_mode = #tpu.pipeline_mode<synchronous>, transform_indices = @transform_2, window_bounds = array<i64: 1, 1>}]} {
    %c0_i32 = arith.constant 0 : i32
    %0 = arith.cmpi eq, %arg0, %c0_i32 : i32
    %1 = arith.extui %0 : i1 to i32
    %c0_i32_0 = arith.constant 0 : i32
    %2 = arith.cmpi ne, %1, %c0_i32_0 : i32
    scf.if %2 {
      %cst_21 = arith.constant 0.000000e+00 : f32
      %46 = vector.broadcast %cst_21 : f32 to vector<1x1xf32>
      %c0_22 = arith.constant 0 : index
      %c0_23 = arith.constant 0 : index
      %47 = vector.load %arg3[%c0_22, %c0_23] : memref<1x1xf32, #tpu.memory_space<vmem>>, vector<1x1xf32>
      tpu.vector_store %arg3[%c0_22, %c0_23], %46 {strides = array<i32>} : memref<1x1xf32, #tpu.memory_space<vmem>>, vector<1x1xf32>,
    } else {
    }
    %c0 = arith.constant 0 : index
    %c0_1 = arith.constant 0 : index
    %3 = vector.load %arg1[%c0, %c0_1] : memref<16x128xf32, #tpu.memory_space<vmem>>, vector<16x128xf32>
    %c0_2 = arith.constant 0 : index
    %c0_3 = arith.constant 0 : index
    %4 = vector.load %arg2[%c0_2, %c0_3] : memref<16x1xi32, #tpu.memory_space<vmem>>, vector<16x1xi32>
    %cst = arith.constant dense<0xFF800000> : vector<16xf32>
    %5 = vector.multi_reduction <maximumf>, %3, %cst [1] : vector<16x128xf32> to vector<16xf32>
    %6 = vector.shape_cast %5 : vector<16xf32> to vector<16x1xf32>
    %7 = vector.broadcast %6 : vector<16x1xf32> to vector<16x128xf32>
    %8 = arith.subf %3, %7 : vector<16x128xf32>
    %9 = math.exp %8 : vector<16x128xf32>
    %cst_4 = arith.constant dense<0.000000e+00> : vector<16xf32>
    %10 = vector.multi_reduction <add>, %9, %cst_4 [1] : vector<16x128xf32> to vector<16xf32>
    %11 = vector.shape_cast %10 : vector<16xf32> to vector<16x1xf32>
    %12 = math.log %11 : vector<16x1xf32>
    %13 = arith.addf %12, %6 : vector<16x1xf32>
    %cst_5 = arith.constant dense<0.000000e+00> : vector<16xf32>
    %14 = vector.multi_reduction <add>, %3, %cst_5 [1] : vector<16x128xf32> to vector<16xf32>
    %15 = vector.shape_cast %14 : vector<16xf32> to vector<16x1xf32>
    %cst_6 = arith.constant 1.280000e+02 : f32
    %16 = vector.broadcast %cst_6 : f32 to vector<16x1xf32>
    %17 = arith.mulf %16, %13 : vector<16x1xf32>
    %18 = arith.subf %15, %17 : vector<16x1xf32>
    %19 = tpu.iota {dimensions = array<i32: 1>} : vector<16x128xi32>
    %20 = vector.broadcast %4 : vector<16x1xi32> to vector<16x128xi32>
    %21 = arith.cmpi eq, %19, %20 : vector<16x128xi32>
    %cst_7 = arith.constant 0.000000e+00 : f32
    %22 = vector.broadcast %cst_7 : f32 to vector<16x128xf32>
    %23 = arith.select %21, %3, %22 : vector<16x128xi1>, vector<16x128xf32>
    %cst_8 = arith.constant dense<0.000000e+00> : vector<16xf32>
    %24 = vector.multi_reduction <add>, %23, %cst_8 [1] : vector<16x128xf32> to vector<16xf32>
    %25 = vector.shape_cast %24 : vector<16xf32> to vector<16x1xf32>
    %26 = arith.subf %25, %13 : vector<16x1xf32>
    %cst_9 = arith.constant 0.899212599 : f32
    %27 = vector.broadcast %cst_9 : f32 to vector<16x1xf32>
    %28 = arith.mulf %27, %26 : vector<16x1xf32>
    %cst_10 = arith.constant -0.809501707 : f32
    %29 = vector.broadcast %cst_10 : f32 to vector<16x1xf32>
    %30 = arith.subf %29, %28 : vector<16x1xf32>
    %cst_11 = arith.constant 7.87401571E-4 : f32
    %31 = vector.broadcast %cst_11 : f32 to vector<16x1xf32>
    %32 = arith.mulf %31, %18 : vector<16x1xf32>
    %33 = arith.subf %30, %32 : vector<16x1xf32>
    %c0_i32_12 = arith.constant 0 : i32
    %34 = vector.broadcast %c0_i32_12 : i32 to vector<16x1xi32>
    %35 = arith.cmpi eq, %4, %34 : vector<16x1xi32>
    %cst_13 = arith.constant 0.000000e+00 : f32
    %36 = vector.broadcast %cst_13 : f32 to vector<16x1xf32>
    %37 = arith.select %35, %36, %33 : vector<16x1xi1>, vector<16x1xf32>
    %c0_14 = arith.constant 0 : index
    %c0_15 = arith.constant 0 : index
    %38 = vector.load %arg3[%c0_14, %c0_15] : memref<1x1xf32, #tpu.memory_space<vmem>>, vector<1x1xf32>
    %cst_16 = arith.constant dense<0.000000e+00> : vector<1xf32>
    %39 = vector.multi_reduction <add>, %37, %cst_16 [0] : vector<16x1xf32> to vector<1xf32>
    %40 = vector.shape_cast %39 : vector<1xf32> to vector<1x1xf32>
    %41 = arith.addf %38, %40 : vector<1x1xf32>
    %c0_17 = arith.constant 0 : index
    %c0_18 = arith.constant 0 : index
    %42 = vector.load %arg3[%c0_17, %c0_18] : memref<1x1xf32, #tpu.memory_space<vmem>>, vector<1x1xf32>
    tpu.vector_store %arg3[%c0_17, %c0_18], %41 {strides = array<i32>} : memref<1x1xf32, #tpu.memory_space<vmem>>, vector<1x1xf32>,
    %c0_i32_19 = arith.constant 0 : i32
    %43 = arith.cmpi eq, %arg0, %c0_i32_19 : i32
    %44 = arith.extui %43 : i1 to i32
    %c0_i32_20 = arith.constant 0 : i32
    %45 = arith.cmpi ne, %44, %c0_i32_20 : i32
    scf.if %45 {
      %c0_21 = arith.constant 0 : index
      %c0_22 = arith.constant 0 : index
      %46 = vector.load %arg3[%c0_21, %c0_22] : memref<1x1xf32, #tpu.memory_space<vmem>>, vector<1x1xf32>
      %cst_23 = arith.constant 5.000000e-01 : f32
      %47 = vector.broadcast %cst_23 : f32 to vector<1x1xf32>
      %48 = arith.mulf %46, %47 : vector<1x1xf32>
      %c0_24 = arith.constant 0 : index
      %c0_25 = arith.constant 0 : index
      %49 = vector.load %arg3[%c0_24, %c0_25] : memref<1x1xf32, #tpu.memory_space<vmem>>, vector<1x1xf32>
      tpu.vector_store %arg3[%c0_24, %c0_25], %48 {strides = array<i32>} : memref<1x1xf32, #tpu.memory_space<vmem>>, vector<1x1xf32>,
    } else {
    }
    return
  }
  func.func @transform_0(%arg0: i32) -> (i32, i32) {
    %c0_i32 = arith.constant 0 : i32
    %c0_i32_0 = arith.constant 0 : i32
    return %arg0, %c0_i32 : i32, i32
  }
  func.func @transform_1(%arg0: i32) -> (i32, i32) {
    %c0_i32 = arith.constant 0 : i32
    %c0_i32_0 = arith.constant 0 : i32
    return %arg0, %c0_i32 : i32, i32
  }
  func.func @transform_2(%arg0: i32) -> (i32, i32) {
    %c0_i32 = arith.constant 0 : i32
    %c0_i32_0 = arith.constant 0 : i32
    %c0_i32_1 = arith.constant 0 : i32
    return %c0_i32, %c0_i32_0 : i32, i32
  }
}

</mosaic_0001>

<bundles_post_ra>
// kernel: transformer_forward.14
= control target key start
LH: loop header
LB: loop body
LE: loop exit
PB: predicated region body
PF: predicated region fallthrough
CT: control target
= control target key end

     0   :  { %s409_s15 = smov 0   ;;  %s441_s0 = inlined_call_operand.vmem [shape: f32[2,16,32], index: 0, kind: input, shape index: {}]   ;;  %s442_s1 = inlined_call_operand.vmem [shape: bf16[32,64], index: 1, kind: input, shape index: {}]   ;;  %s443_s2 = inlined_call_operand.vmem [shape: f32[1,64], index: 2, kind: input, shape index: {}]   ;;  %s444_s3 = inlined_call_operand.vmem [shape: f32[16,64], index: 3, kind: input, shape index: {}]   ;;  %s445_s4 = inlined_call_operand.vmem [shape: f32[2,16,64], index: 4, kind: output, shape index: {}]  }
   0x1 LB: > { %s334_s16 = sadd.s32 4294967295, %s380_s15   ;;  %p338_p0 = scmp.ge.s32.totalorder %s380_s15, 1  ;;  %s380_s15 = sphi %s409_s15, %s14_s15  }
   0x2   : > { %p162_p1 = scmp.lt.s32.totalorder %s380_s15, 3 }
   0x4   : > { %p163_p2 = pnand %p338_p0, %p162_p1 }
   0x5   : > { %v372_v0 = vld [vmem:[%s442_s1] sm:$0xff] (!%p163_p2)   ;;  %v382_v1 = vmov (!%p163_p2), 0.0   ;;  %v373_v2 = vld [vmem:[%s442_s1 + $0x8] sm:$0xff] (!%p163_p2)   ;;  %vm383_vm0 = vmmov (!%p163_p2), 0   ;;  %p188_p3 = scmp.lt.s32.totalorder (!%p163_p2), %s334_s16, 1  ;;  %vm225_vm1 = vcmask (!%p163_p2), 261120  }
   0x6   : > { %166 = sbr.rel (%p163_p2) target bundleno = 240 (0xf0), region = 36  ;;  %354 = vmatprep.subr.bf16.mxu0 (!%p163_p2), %v382_v1  ;;  %358 = vmatprep.mubr.msk.bf16.mxu0 (!%p163_p2), %vm383_vm0, %v382_v1  ;;  %v343_v6 = vld [vmem:[%s443_s2] ss:$0 sm:$0xff] (!%p163_p2)  ;;  %vm276_vm2 = vcmask (!%p163_p2), 523264   ;;  %v273_v15 = vld [vmem:[%s444_s3 + $0x8] sm:$0xff] (!%p163_p2) }
   0x7   : > { %355 = vmatpush3.bf16.msra.mxu0 (!%p163_p2), %v372_v0  ;;  %v272_v10 = vld [vmem:[%s444_s3] sm:$0xff] (!%p163_p2) }
   0x8   : > { %356 = vmatprep.subr.bf16.mxu0 (!%p163_p2), %v382_v1 }
   0xb   : > { %357 = vmatpush3.bf16.msra.mxu0 (!%p163_p2), %v373_v2 }
   0xd   : > { %s447_s16 = smov (!%p188_p3, %s334_s16), 1 }
   0xe   : > { %s349_s21 = sshll.u32 %s447_s16, 4 }
   0xf   : > { %s192_s24 = scalar_lea.vmem %s441_s0, %s349_s21  ;;  %s197_s5 = scalar_lea.vmem %s445_s4, %s349_s21 }
  0x10   : > { %v199_v3 = vld [vmem:[%s192_s24] sm:$0xff]  ;;  %v200_v4 = vld [vmem:[%s192_s24 + $0x8] sm:$0xff] }
  0x11   : > { %v201_v5 = vpack.c.bf16 %v200_v4, %v199_v3 }
  0x13   : > { %359 = vmatmul.mubr.msk.bf16.vlgmr.msra.gmra.mrb[0].mxu0 %vm225_vm1, %v201_v5 }
  0xe6   : > { %v263_v7 = vpop.f32.mrb[0].mxu0 }
  0xe7   : > { %v264_v8 = vadd.f32 %v343_v6, %v263_v7  ;;  %v360_v9 = vpop.f32.mrb[1].mxu0 }
  0xe8   : > { %v266_v11 = vpop.f32.mrb[2].mxu0 }
  0xe9   : > { %v270_v12 = vmul.f32 8.0, %v264_v8  ;;  %v267_v13 = vadd.f32 %v343_v6, %v266_v11  ;;  %v361_v14 = vpop.f32.mrb[3].mxu0 }
  0xeb   : > { %v274_v16 = vadd.f32 %v272_v10, %v270_v12  ;;  %v271_v17 = vmul.f32 8.0, %v267_v13 }
  0xed   : > { %277 = vst.msk [vmem:[%s197_s5] sm:$0xff] %vm276_vm2, %v274_v16  ;;  %v275_v18 = vadd.f32 %v273_v15, %v271_v17 }
  0xef   : > { %278 = vst.msk [vmem:[%s197_s5 + $0x8] sm:$0xff] %vm276_vm2, %v275_v18 }
  0xf0 PF: > { %s14_s15 = sadd.s32 1, %s380_s15  }
  0xf1   : > { %p11_p4 = scmp.ge.s32.totalorder %s14_s15, 4  }
  0xf3   :  { %13 = sbr.rel (!%p11_p4) target bundleno = 1 (0x1), region = 66 }

// kernel: transformer_forward.16
= control target key start
LH: loop header
LB: loop body
LE: loop exit
PB: predicated region body
PF: predicated region fallthrough
CT: control target
= control target key end

     0   :  { %s738_s24 = smov 0   ;;  %s827_s0 = inlined_call_operand.vmem [shape: f32[2,16,64], index: 0, kind: input, shape index: {}]   ;;  %s828_s1 = inlined_call_operand.vmem [shape: f32[1,64], index: 1, kind: input, shape index: {}]   ;;  %s829_s2 = inlined_call_operand.vmem [shape: f32[1,64], index: 2, kind: input, shape index: {}]   ;;  %s830_s3 = inlined_call_operand.vmem [shape: bf16[64,128], index: 3, kind: input, shape index: {}]   ;;  %s831_s4 = inlined_call_operand.vmem [shape: f32[1,128], index: 4, kind: input, shape index: {}]   ;;  %s832_s5 = inlined_call_operand.vmem [shape: bf16[128,64], index: 5, kind: input, shape index: {}]   ;;  %s833_s6 = inlined_call_operand.vmem [shape: f32[1,64], index: 6, kind: input, shape index: {}]   ;;  %s834_s7 = inlined_call_operand.vmem [shape: f32[2,16,64], index: 7, kind: output, shape index: {}]  }
   0x1 LB: > { %s586_s25 = sadd.s32 4294967295, %s694_s24   ;;  %p590_p0 = scmp.ge.s32.totalorder %s694_s24, 1  ;;  %s694_s24 = sphi %s738_s24, %s17_s24  }
   0x2   : > { %p237_p1 = scmp.lt.s32.totalorder %s694_s24, 3 }
   0x4   : > { %p238_p2 = pnand %p590_p0, %p237_p1 }
   0x5   : > { %p269_p3 = scmp.lt.s32.totalorder (!%p238_p2), %s586_s25, 1  ;;  %vm284_vm0 = vcmask (!%p238_p2), 523264   ;;  %v672_v14 = vld [vmem:[%s830_s3] sm:$0xff] (!%p238_p2)   ;;  %v696_v15 = vmov (!%p238_p2), 0.0   ;;  %v673_v16 = vld [vmem:[%s830_s3 + $0x8] sm:$0xff] (!%p238_p2)   ;;  %v674_v17 = vld [vmem:[%s830_s3 + $0x10] sm:$0xff] (!%p238_p2)  }
   0x6   : > { %241 = sbr.rel (%p238_p2) target bundleno = 775 (0x307), region = 48  ;;  %630 = vmatprep.subr.bf16.mxu0 (!%p238_p2), %v696_v15  ;;  %642 = vmatprep.subr.bf16.mxu1 (!%p238_p2), %v696_v15  ;;  %v675_v18 = vld [vmem:[%s830_s3 + $0x18] sm:$0xff] (!%p238_p2)   ;;  %vm697_vm1 = vmmov (!%p238_p2), 0   ;;  %v676_v19 = vld [vmem:[%s832_s5] sm:$0xff] (!%p238_p2)   ;;  %v677_v20 = vld [vmem:[%s832_s5 + $0x8] sm:$0xff] (!%p238_p2)  }
   0x7   : > { %631 = vmatpush3.bf16.msra.mxu0 (!%p238_p2), %v672_v14  ;;  %638 = vmatprep.mubr.msk.bf16.mxu0 (!%p238_p2), %vm697_vm1, %v696_v15  ;;  %v678_v21 = vld [vmem:[%s832_s5 + $0x10] sm:$0xff] (!%p238_p2)   ;;  %v679_v22 = vld [vmem:[%s832_s5 + $0x18] sm:$0xff] (!%p238_p2)   ;;  %v680_v23 = vld [vmem:[%s832_s5 + $0x20] sm:$0xff] (!%p238_p2)  }
   0x8   : > { %632 = vmatprep.subr.bf16.mxu0 (!%p238_p2), %v696_v15  ;;  %658 = vmatprep.mubr.msk.bf16.mxu1 (!%p238_p2), %vm697_vm1, %v696_v15  ;;  %v681_v24 = vld [vmem:[%s832_s5 + $0x28] sm:$0xff] (!%p238_p2)   ;;  %v595_v33 = vld [vmem:[%s828_s1] ss:$0 sm:$0xff] (!%p238_p2)  ;;  %v682_v42 = vld [vmem:[%s832_s5 + $0x30] sm:$0xff] (!%p238_p2)  }
   0x9   : > { %643 = vmatpush3.bf16.msra.mxu1 (!%p238_p2), %v676_v19  ;;  %v596_v37 = vld [vmem:[%s829_s2] ss:$0 sm:$0xff] (!%p238_p2)  ;;  %v683_v43 = vld [vmem:[%s832_s5 + $0x38] sm:$0xff] (!%p238_p2)  }
   0xa   : > { %644 = vmatprep.subr.bf16.mxu1 (!%p238_p2), %v696_v15  ;;  %v597_v44 = vld [vmem:[%s831_s4] ss:$0 sm:$0xff] (!%p238_p2) }
   0xb   : > { %633 = vmatpush3.bf16.msra.mxu0 (!%p238_p2), %v673_v16  ;;  %v603_v54 = vld [vmem:[%s833_s6] ss:$0 sm:$0xff] (!%p238_p2) }
   0xc   : > { %634 = vmatprep.subr.bf16.mxu0 (!%p238_p2), %v696_v15 }
   0xd   : > { %s836_s25 = smov (!%p269_p3, %s586_s25), 1  ;;  %645 = vmatpush3.bf16.msra.mxu1 %v677_v20 }
   0xe   : > { %s614_s26 = sshll.u32 %s836_s25, 4  ;;  %646 = vmatprep.subr.bf16.mxu1 %v696_v15 }
   0xf   : > { %s273_s29 = scalar_lea.vmem %s827_s0, %s614_s26  ;;  %635 = vmatpush3.bf16.msra.mxu0 %v674_v17  ;;  %s278_s21 = scalar_lea.vmem %s834_s7, %s614_s26 }
  0x10   : > { %v754_v0 = vld [vmem:[%s273_s29] sm:$0xff]  ;;  %v756_v1 = vld [vmem:[%s273_s29 + $0x8] sm:$0xff]  ;;  %636 = vmatprep.subr.bf16.mxu0 %v696_v15 }
  0x11   : > { %v285_v2 = vsel %vm284_vm0, %v754_v0, 0.0  ;;  %v288_v3 = vsel %vm284_vm0, %v756_v1, 0.0  ;;  %647 = vmatpush3.bf16.msra.mxu1 %v678_v21 }
  0x12   : > { %286 = vadd.xlane.f32.xlu0 %v285_v2  ;;  %648 = vmatprep.subr.bf16.mxu1 %v696_v15 }
  0x13   : > { %637 = vmatpush3.bf16.msra.mxu0 %v675_v18 }
  0x15   : > { %649 = vmatpush3.bf16.msra.mxu1 %v679_v22 }
  0x16   : > { %289 = vadd.xlane.f32.xlu0 %v288_v3  ;;  %650 = vmatprep.subr.bf16.mxu1 %v696_v15 }
  0x19   : > { %651 = vmatpush3.bf16.msra.mxu1 %v680_v23 }
  0x1a   : > { %652 = vmatprep.subr.bf16.mxu1 %v696_v15 }
  0x1d   : > { %653 = vmatpush3.bf16.msra.mxu1 %v681_v24 }
  0x1e   : > { %654 = vmatprep.subr.bf16.mxu1 %v696_v15 }
  0x21   : > { %655 = vmatpush3.bf16.msra.mxu1 %v682_v42 }
  0x22   : > { %656 = vmatprep.subr.bf16.mxu1 %v696_v15 }
  0x25   : > { %657 = vmatpush3.bf16.msra.mxu1 %v683_v43 }
  0x9f   : > { %v287_v4 = vpop.xlane.xlu0 %286 }
  0xa0   : > { %v292_v5 = vmul.f32 0.015625, %v287_v4 }
  0xa2   : > { %v294_v6 = vsub.f32 %v754_v0, %v292_v5 }
  0xa3   : > { %v290_v7 = vpop.xlane.xlu0 %289 }
  0xa4   : > { %v293_v8 = vmul.f32 0.015625, %v290_v7  ;;  %v296_v9 = vmul.f32 %v294_v6, %v294_v6 }
  0xa6   : > { %v295_v10 = vsub.f32 %v756_v1, %v293_v8  ;;  %v298_v11 = vsel %vm284_vm0, %v296_v9, 0.0 }
  0xa7   : > { %299 = vadd.xlane.f32.xlu1 %v298_v11 }
  0xa8   : > { %v297_v12 = vmul.f32 %v295_v10, %v295_v10 }
  0xaa   : > { %v301_v13 = vsel %vm284_vm0, %v297_v12, 0.0 }
  0xab   : > { %302 = vadd.xlane.f32.xlu1 %v301_v13 }
 0x134   : > { %v300_v25 = vpop.xlane.xlu1 %299 }
 0x135   : > { %v304_v26 = vmul.f32 0.015625, %v300_v25 }
 0x137   : > { %v306_v27 = vadd.f32 1e-05, %v304_v26 }
 0x138   : > { %v303_v28 = vpop.xlane.xlu1 %302 }
 0x139   : > { %684 = vrsqrt.f32 %v306_v27  ;;  %v305_v29 = vmul.f32 0.015625, %v303_v28 }
 0x13b   : > { %v307_v30 = vadd.f32 1e-05, %v305_v29 }
 0x13d   : > { %686 = vrsqrt.f32 %v307_v30 }
 0x143   : > { %v685_v31 = vpop.eup %684 }
 0x144   : > { %v310_v32 = vmul.f32 %v685_v31, %v294_v6 }
 0x146   : > { %v318_v36 = vmul.f32 %v595_v33, %v310_v32 }
 0x147   : > { %v687_v34 = vpop.eup %686 }
 0x148   : > { %v311_v35 = vmul.f32 %v687_v34, %v295_v10  ;;  %v326_v39 = vadd.f32 %v596_v37, %v318_v36 }
 0x14a   : > { %v319_v38 = vmul.f32 %v595_v33, %v311_v35 }
 0x14c   : > { %v327_v40 = vadd.f32 %v596_v37, %v319_v38 }
 0x14e   : > { %v328_v41 = vpack.c.bf16 %v327_v40, %v326_v39 }
 0x150   : > { %639 = vmatmul.mubr.msk.bf16.vlgmr.msra.gmra.mrb[0].mxu0 %vm284_vm0, %v328_v41 }
 0x223   : > { %v405_v45 = vpop.f32.mrb[0].mxu0 }
 0x224   : > { %v406_v46 = vadd.f32 %v597_v44, %v405_v45  ;;  %v640_v47 = vpop.f32.mrb[1].mxu0 }
 0x225   : > { %v408_v48 = vpop.f32.mrb[2].mxu0 }
 0x226   : > { %v409_v49 = vadd.f32 %v597_v44, %v408_v48  ;;  %v641_v50 = vpop.f32.mrb[3].mxu0  ;;  %v412_v51 = vmax.f32 %v406_v46, 0.0 }
 0x228   : > { %v413_v52 = vmax.f32 %v409_v49, 0.0 }
 0x22a   : > { %v414_v53 = vpack.c.bf16 %v413_v52, %v412_v51 }
 0x22c   : > { %659 = vmatmul.mubr.bf16.vlgmr.msra.gmra.mrb[0].mxu1 %v414_v53 }
 0x2ff   : > { %v520_v55 = vpop.f32.mrb[0].mxu1 }
 0x300   : > { %v521_v56 = vadd.f32 %v603_v54, %v520_v55  ;;  %v660_v57 = vpop.f32.mrb[1].mxu1 }
 0x301   : > { %v523_v58 = vpop.f32.mrb[2].mxu1 }
 0x302   : > { %v527_v59 = vadd.f32 %v521_v56, %v754_v0  ;;  %v524_v60 = vadd.f32 %v603_v54, %v523_v58  ;;  %v661_v61 = vpop.f32.mrb[3].mxu1 }
 0x304   : > { %529 = vst.msk [vmem:[%s278_s21] sm:$0xff] %vm284_vm0, %v527_v59  ;;  %v528_v62 = vadd.f32 %v524_v60, %v756_v1 }
 0x306   : > { %530 = vst.msk [vmem:[%s278_s21 + $0x8] sm:$0xff] %vm284_vm0, %v528_v62 }
 0x307 PF: > { %s17_s24 = sadd.s32 1, %s694_s24  }
 0x308   : > { %p14_p4 = scmp.ge.s32.totalorder %s17_s24, 4  }
 0x30a   :  { %16 = sbr.rel (!%p14_p4) target bundleno = 1 (0x1), region = 78 }

// kernel: transformer_forward.20
= control target key start
LH: loop header
LB: loop body
LE: loop exit
PB: predicated region body
PF: predicated region fallthrough
CT: control target
= control target key end

     0   :  { %s1528_s27 = smov 0   ;;  %s1706_s0 = inlined_call_operand.vmem [shape: f32[2,8,64], index: 0, kind: input, shape index: {}]   ;;  %s1707_s1 = inlined_call_operand.vmem [shape: f32[2,1,8], index: 1, kind: input, shape index: {}]   ;;  %s1708_s2 = inlined_call_operand.vmem [shape: f32[1,64], index: 2, kind: input, shape index: {}]   ;;  %s1709_s3 = inlined_call_operand.vmem [shape: f32[1,64], index: 3, kind: input, shape index: {}]   ;;  %s1710_s4 = inlined_call_operand.vmem [shape: bf16[64,192], index: 4, kind: input, shape index: {}]   ;;  %s1711_s5 = inlined_call_operand.vmem [shape: f32[1,192], index: 5, kind: input, shape index: {}]   ;;  %s1712_s6 = inlined_call_operand.vmem [shape: bf16[64,64], index: 6, kind: input, shape index: {}]   ;;  %s1713_s7 = inlined_call_operand.vmem [shape: f32[1,64], index: 7, kind: input, shape index: {}]   ;;  %s1714_s8 = inlined_call_operand.vmem [shape: f32[2,8,64], index: 8, kind: output, shape index: {}]  }
   0x1 LB: > { %s1302_s28 = sadd.s32 4294967295, %s1471_s27   ;;  %p1306_p0 = scmp.ge.s32.totalorder %s1471_s27, 1  ;;  %s1471_s27 = sphi %s1528_s27, %s18_s27  }
   0x2   : > { %p269_p1 = scmp.lt.s32.totalorder %s1471_s27, 3 }
   0x4   : > { %p270_p2 = pnand %p1306_p0, %p269_p1 }
   0x5   : > { %p304_p3 = scmp.lt.s32.totalorder (!%p270_p2), %s1302_s28, 1  ;;  %vm319_vm0 = vcmask (!%p270_p2), 523264   ;;  %v1431_v7 = vld [vmem:[%s1710_s4 + $0x4] ss:$8 sps:$4 sm:$0xff] (!%p270_p2)   ;;  %v1433_v8 = vld [vmem:[%s1710_s4] ss:$8 sps:$4 sm:$0xff] (!%p270_p2)   ;;  %v359_v10 = vlaneseq (!%p270_p2) }
   0x6   : > { %273 = sbr.rel (%p270_p2) target bundleno = 2280 (0x8e8), region = 52  ;;  %v1434_v9 = vld [vmem:[%s1710_s4 + $0x14] ss:$8 sps:$4 sm:$0xff] (!%p270_p2)   ;;  %412 = vmatprep.subr.bf16.mxu0 (!%p270_p2), %v1431_v7  ;;  %v1436_v12 = vld [vmem:[%s1710_s4 + $0x10] ss:$8 sps:$4 sm:$0xff] (!%p270_p2)   ;;  %v1473_v13 = vmov (!%p270_p2), 0  }
   0x7   : > { %v1563_v11 = vshrl.u32 (!%p270_p2), %v359_v10, 7  ;;  %413 = vmatpush1.bf16.msra.mxu0 (!%p270_p2), %v1433_v8  ;;  %444 = vmatprep.mubr.bf16.mxu0 (!%p270_p2), %v1473_v13  ;;  %v464_v15 = vand.u32 (!%p270_p2), 127, %v359_v10  ;;  %v1437_v16 = vld [vmem:[%s1710_s4 + $0x24] ss:$8 sps:$4 sm:$0xff] (!%p270_p2)   ;;  %v1439_v20 = vld [vmem:[%s1710_s4 + $0x20] ss:$8 sps:$4 sm:$0xff] (!%p270_p2)  }
   0x8   : > { %414 = vmatprep.subr.bf16.mxu0 (!%p270_p2), %v1434_v9  ;;  %v1440_v21 = vld [vmem:[%s1710_s4 + $0x34] ss:$8 sps:$4 sm:$0xff] (!%p270_p2)   ;;  %v1442_v23 = vld [vmem:[%s1710_s4 + $0x30] ss:$8 sps:$4 sm:$0xff] (!%p270_p2)   ;;  %v1309_v28 = vld [vmem:[%s1708_s2] ss:$0 sm:$0xff] (!%p270_p2) }
   0x9   : > { %v361_v17 = vsub.s32 (!%p270_p2), 0, %v1563_v11  ;;  %vm465_vm2 = vcmp.le.s32.totalorder (!%p270_p2), %v464_v15, %v1563_v11  ;;  %v1310_v30 = vld [vmem:[%s1709_s3] ss:$0 sm:$0xff] (!%p270_p2)  ;;  %v1474_v34 = vmov (!%p270_p2), 0.0   ;;  %vm1475_vm5 = vmmov (!%p270_p2), 0   ;;  %s1476_s17 = smov (!%p270_p2), 48  }
   0xa   : > { %1371 = vmatprep.subr.mxu1 (!%p270_p2), %v1474_v34  ;;  %1373 = vmatprep.mubr.msk.f32.mxu1 (!%p270_p2), %vm1475_vm5, %v1474_v34  ;;  %v357_v35 = vld [vmem:[%s1711_s5] sm:$0x3] (!%p270_p2)  ;;  %s1477_s18 = smov (!%p270_p2), 112   ;;  %vm470_vm6 = vcmask (!%p270_p2), 130048   ;;  %vm547_vm7 = vcmask (!%p270_p2), 64512   ;;  %v365_v49 = vsub.s32 (!%p270_p2), 1, %v1563_v11 }
   0xb   : > { %415 = vmatpush1.bf16.msra.mxu0 (!%p270_p2), %v1436_v12  ;;  %v362_v36 = vrot.slane (!%p270_p2), %v357_v35, %v361_v17  ;;  %s1479_s20 = smov (!%p270_p2), 32   ;;  %s1480_s21 = smov (!%p270_p2), 96   ;;  %v1445_v22 = vld [vmem:[%s1712_s6 + $0x10] sm:$0xff] (!%p270_p2)   ;;  %vm1151_vm8 = vcmask (!%p270_p2), 261120   ;;  %vm1153_vm9 = vcmask (!%p270_p2), 392192  }
   0xc   : > { %416 = vmatprep.subr.bf16.mxu0 (!%p270_p2), %v1437_v16  ;;  %v366_v50 = vrot.slane (!%p270_p2), %v357_v35, %v365_v49  ;;  %s1481_s22 = smov (!%p270_p2), 80   ;;  %s1482_s23 = smov (!%p270_p2), 16  }
   0xd   : > { %s1718_s28 = smov (!%p304_p3, %s1302_s28), 1 }
   0xe   : > { %s1307_s29 = sshll.u32 %s1718_s28, 3  ;;  %s310_s19 = scalar_lea.vmem %s1707_s1, %s1718_s28 }
   0xf   : > { %s307_s10 = scalar_lea.vmem %s1706_s0, %s1307_s29  ;;  %v453_v14 = vld [vmem:[%s310_s19] sm:$0x1]  ;;  %417 = vmatpush1.bf16.msra.mxu0 %v1439_v20  ;;  %s1478_s19 = smov 64  }
  0x10   : > { %v1544_v0 = vld [vmem:[%s307_s10] sm:$0xff]  ;;  %vm454_vm1 = vcmp.gt.f32.partialorder %v453_v14, 0.0  ;;  %418 = vmatprep.subr.bf16.mxu0 %v1440_v21 }
  0x11   : > { %v320_v1 = vsel %vm319_vm0, %v1544_v0, 0.0  ;;  %v455_v18 = vsel %vm454_vm1, 1, %v1473_v13 }
  0x12   : > { %321 = vadd.xlane.f32.xlu0 %v320_v1  ;;  %v459_v19 = vrot.slane %v455_v18, %v361_v17 }
  0x13   : > { %419 = vmatpush1.bf16.msra.mxu0 %v1442_v23 }
  0x14   : > { %vm460_vm3 = vcmp.eq.s32.totalorder %v459_v19, 1  ;;  %1361 = vmatprep.subr.mxu0 %v1474_v34 }
  0x15   : > { %vm1579_vm4 = vmand %vm460_vm3, %vm465_vm2 }
  0x9f   : > { %v322_v2 = vpop.xlane.xlu0 %321 }
  0xa0   : > { %v324_v3 = vmul.f32 0.015625, %v322_v2 }
  0xa2   : > { %v325_v4 = vsub.f32 %v1544_v0, %v324_v3 }
  0xa4   : > { %v326_v5 = vmul.f32 %v325_v4, %v325_v4 }
  0xa6   : > { %v327_v6 = vsel %vm319_vm0, %v326_v5, 0.0 }
  0xa7   : > { %328 = vadd.xlane.f32.xlu0 %v327_v6 }
 0x134   : > { %v329_v24 = vpop.xlane.xlu0 %328 }
 0x135   : > { %v330_v25 = vmul.f32 0.015625, %v329_v24 }
 0x137   : > { %v331_v26 = vadd.f32 1e-05, %v330_v25 }
 0x139   : > { %1447 = vrsqrt.f32 %v331_v26 }
 0x143   : > { %v1448_v27 = vpop.eup %1447 }
 0x144   : > { %v333_v29 = vmul.f32 %v1448_v27, %v325_v4 }
 0x146   : > { %v340_v31 = vmul.f32 %v1309_v28, %v333_v29 }
 0x148   : > { %v347_v32 = vadd.f32 %v1310_v30, %v340_v31 }
 0x14a   : > { %v348_v33 = vpack.c.bf16 %v347_v32, %v347_v32 }
 0x14c   : > { %1319 = vmatmul.mubr.msk.bf16.vlgmr.msra.gmra.mrb[0].mxu0 %vm319_vm0, %v348_v33 }
 0x14d   : > { %1363 = vmatprep.mubr.msk.f32.mxu0 %vm1475_vm5, %v1474_v34 }
 0x21f   : > { %v446_v37 = vpop.f32.mrb[0].mxu0 }
 0x220   : > { %v447_v38 = vadd.f32 %v446_v37, %v362_v36  ;;  %v448_v39 = vpop.f32.mrb[1].mxu0 }
 0x221   : > { %v450_v40 = vpop.f32.mrb[2].mxu0  ;;  %v1612_v51 = vadd.f32 %v448_v39, %v366_v50 }
 0x222   : > { %v451_v41 = vpop.f32.mrb[3].mxu0  ;;  %635 = vrot.lane.b32.xlu1 %v447_v38, %s1476_s17 }
 0x226   : > { %633 = vrot.lane.b32.xlu1 %v447_v38, %s1477_s18 }
 0x294   : > { %v636_v42 = vpop.permute.xlu1 %635 }
 0x295   : > { %1372 = vmatpush3.xpose.msk.msra.mxu1 %vm470_vm6, %v636_v42 }
 0x296   : > { %1376 = vmatprep.subr.mxu1 %v1474_v34 }
 0x298   : > { %v634_v43 = vpop.permute.xlu1 %633 }
 0x299   : > { %1374 = vmatmul.mubr.msk.f32.vlgmr.msra.gmra.mrb[0].mxu1 %vm470_vm6, %v634_v43 }
 0x29a   : > { %1378 = vmatprep.mubr.msk.f32.mxu1 %vm1475_vm5, %v1474_v34 }
 0x36c   : > { %v707_v44 = vpop.f32.mrb[0].mxu1 }
 0x36d   : > { %v711_v45 = vmul.f32 0.25, %v707_v44  ;;  %v1375_v46 = vpop.f32.mrb[1].mxu1 }
 0x36f   : > { %v712_v47 = vsel %vm1579_vm4, %v711_v45, -3.4028235e+38 }
 0x370   : > { %v713_v48 = vsel %vm547_vm7, %v712_v47, -inf }
 0x371   : > { %714 = vmax.xlane.f32.xlu0 %v713_v48 }
 0x387   : > { %726 = vrot.lane.b32.xlu0 %v1612_v51, %s1477_s18 }
 0x38b   : > { %468 = vrot.lane.b32.xlu0 %v447_v38, %s1478_s19 }
 0x38f   : > { %804 = vrot.lane.b32.xlu0 %v447_v38, %s1479_s20 }
 0x393   : > { %802 = vrot.lane.b32.xlu0 %v447_v38, %s1480_s21 }
 0x397   : > { %970 = vrot.lane.b32.xlu0 %v447_v38, %s1481_s22 }
 0x3fe   : > { %v715_v52 = vpop.xlane.xlu0 %714 }
 0x3ff   : > { %v716_v53 = vsub.f32 %v712_v47, %v715_v52 }
 0x401   : > { %v717_v54 = vmul.f32 1.442695, %v716_v53 }
 0x402   : > { %v727_v55 = vpop.permute.xlu0 %726 }
 0x403   : > { %1449 = vpow2.f32 %v717_v54  ;;  %1377 = vmatpush3.msra.mxu1 %v727_v55  ;;  %v1443_v54 = vld [vmem:[%s1712_s6] sm:$0xff]   ;;  %v1444_v55 = vld [vmem:[%s1712_s6 + $0x8] sm:$0xff]  }
 0x404   : > { %1381 = vmatprep.subr.mxu1 %v1474_v34 }
 0x406   : > { %v469_v56 = vpop.permute.xlu0 %468 }
 0x407   : > { %1362 = vmatpush3.xpose.msk.msra.mxu0 %vm470_vm6, %v469_v56  ;;  %v1446_v56 = vld [vmem:[%s1712_s6 + $0x18] sm:$0xff]  }
 0x408   : > { %1366 = vmatprep.subr.mxu0 %v1474_v34 }
 0x40a   : > { %1364 = vmatmul.mubr.msk.f32.vlgmr.msra.gmra.mrb[4].mxu0 %vm470_vm6, %v447_v38  ;;  %v805_v60 = vpop.permute.xlu0 %804 }
 0x40b   : > { %1367 = vmatpush3.msra.mxu0 %v1612_v51  ;;  %1368 = vmatprep.mubr.msk.f32.mxu0 %vm1475_vm5, %v1474_v34 }
 0x40c   : > { %1386 = vmatprep.subr.mxu0 %v1474_v34 }
 0x40d   : > { %v1450_v57 = vpop.eup %1449 }
 0x40e   : > { %v719_v58 = vsel %vm547_vm7, %v1450_v57, 0.0  ;;  %v803_v1 = vpop.permute.xlu0 %802 }
 0x40f   : > { %720 = vadd.xlane.f32.xlu1 %v719_v58 }
 0x412   : > { %v971_v3 = vpop.permute.xlu0 %970 }
 0x420   : > { %972 = vrot.lane.b32.xlu1 %v447_v38, %s1482_s23 }
 0x49c   : > { %v721_v59 = vpop.xlane.xlu1 %720 }
 0x49d   : > { %1451 = vrcp.f32 %v721_v59 }
 0x4a0   : > { %v973_v2 = vpop.permute.xlu1 %972 }
 0x4a7   : > { %v1452_v61 = vpop.eup %1451 }
 0x4a8   : > { %v723_v62 = vmul.f32 %v1452_v61, %v1450_v57 }
 0x4aa   : > { %v724_v63 = vsel %vm1579_vm4, %v723_v62, 0.0 }
 0x4ab   : > { %1379 = vmatmul.mubr.msk.f32.vlgmr.msra.gmra.mrb[2].mxu1 %vm547_vm7, %v724_v63 }
 0x4ac   : > { %1382 = vmatpush3.xpose.msk.msra.mxu1 %vm470_vm6, %v805_v60  ;;  %1383 = vmatprep.mubr.msk.f32.mxu1 %vm1475_vm5, %v1474_v34 }
 0x4ad   : > { %1391 = vmatprep.subr.mxu1 %v1474_v34 }
 0x4af   : > { %1384 = vmatmul.mubr.msk.f32.vlgmr.msra.gmra.mrb[4].mxu1 %vm470_vm6, %v803_v1 }
 0x4b0   : > { %1392 = vmatpush3.xpose.msk.msra.mxu1 %vm470_vm6, %v973_v2  ;;  %1393 = vmatprep.mubr.msk.f32.mxu1 %vm1475_vm5, %v1474_v34 }
 0x4b1   : > { %1401 = vmatprep.subr.bf16.mxu1 %v1474_v34 }
 0x4b3   : > { %1394 = vmatmul.mubr.msk.f32.vlgmr.msra.gmra.mrb[6].mxu1 %vm470_vm6, %v971_v3 }
 0x4b4   : > { %1409 = vmatprep.mubr.msk.bf16.mxu1 %vm1475_vm5, %v1474_v34  ;;  %1402 = vmatpush3.bf16.msra.mxu1 %v1443_v54 }
 0x4b5   : > { %1403 = vmatprep.subr.bf16.mxu1 %v1474_v34 }
 0x4b8   : > { %1404 = vmatpush3.bf16.msra.mxu1 %v1444_v55 }
 0x4b9   : > { %1405 = vmatprep.subr.bf16.mxu1 %v1474_v34 }
 0x4bc   : > { %1406 = vmatpush3.bf16.msra.mxu1 %v1445_v22 }
 0x4bd   : > { %1407 = vmatprep.subr.bf16.mxu1 %v1474_v34 }
 0x4c0   : > { %1408 = vmatpush3.bf16.msra.mxu1 %v1446_v56 }
 0x4dd   : > { %v541_v4 = vpop.f32.mrb[4].mxu0 }
 0x4de   : > { %v545_v5 = vmul.f32 0.25, %v541_v4  ;;  %v1365_v6 = vpop.f32.mrb[5].mxu0  ;;  %v1332_v4 = vld [vmem:[%s1713_s7] ss:$0 sm:$0xff] }
 0x4e0   : > { %v546_v7 = vsel %vm1579_vm4, %v545_v5, -3.4028235e+38 }
 0x4e1   : > { %v548_v8 = vsel %vm547_vm7, %v546_v7, -inf }
 0x4e2   : > { %549 = vmax.xlane.f32.xlu0 %v548_v8 }
 0x56f   : > { %v550_v9 = vpop.xlane.xlu0 %549 }
 0x570   : > { %v551_v10 = vsub.f32 %v546_v7, %v550_v9 }
 0x572   : > { %v552_v11 = vmul.f32 1.442695, %v551_v10 }
 0x574   : > { %1453 = vpow2.f32 %v552_v11 }
 0x57e   : > { %v798_v12 = vpop.f32.mrb[2].mxu1  ;;  %v1454_v25 = vpop.eup %1453 }
 0x57f   : > { %v1380_v13 = vpop.f32.mrb[3].mxu1  ;;  %v554_v26 = vsel %vm547_vm7, %v1454_v25, 0.0 }
 0x582   : > { %v876_v14 = vpop.f32.mrb[4].mxu1 }
 0x583   : > { %v880_v15 = vmul.f32 0.25, %v876_v14  ;;  %v1385_v16 = vpop.f32.mrb[5].mxu1 }
 0x585   : > { %v881_v17 = vsel %vm1579_vm4, %v880_v15, -3.4028235e+38 }
 0x586   : > { %v1044_v18 = vpop.f32.mrb[6].mxu1  ;;  %v882_v19 = vsel %vm547_vm7, %v881_v17, -inf }
 0x587   : > { %v1048_v20 = vmul.f32 0.25, %v1044_v18  ;;  %883 = vmax.xlane.f32.xlu1 %v882_v19  ;;  %v1395_v21 = vpop.f32.mrb[7].mxu1 }
 0x589   : > { %v1049_v23 = vsel %vm1579_vm4, %v1048_v20, -3.4028235e+38 }
 0x58a   : > { %v1050_v24 = vsel %vm547_vm7, %v1049_v23, -inf }
 0x58b   : > { %1051 = vmax.xlane.f32.xlu0 %v1050_v24 }
 0x58f   : > { %555 = vadd.xlane.f32.xlu0 %v554_v26 }
 0x598   : > { %1062 = vrot.lane.b32.xlu1 %v1612_v51, %s1481_s22 }
 0x59c   : > { %1139 = vrot.lane.b32.xlu1 %v798_v12, %s1482_s23 }
 0x614   : > { %v884_v27 = vpop.xlane.xlu1 %883 }
 0x615   : > { %v885_v28 = vsub.f32 %v881_v17, %v884_v27 }
 0x617   : > { %v886_v29 = vmul.f32 1.442695, %v885_v28 }
 0x618   : > { %v1052_v30 = vpop.xlane.xlu0 %1051  ;;  %v1063_v49 = vpop.permute.xlu1 %1062 }
 0x619   : > { %1455 = vpow2.f32 %v886_v29  ;;  %v1053_v31 = vsub.f32 %v1049_v23, %v1052_v30 }
 0x61b   : > { %v1054_v32 = vmul.f32 1.442695, %v1053_v31 }
 0x61c   : > { %v556_v33 = vpop.xlane.xlu0 %555  ;;  %v1140_v61 = vpop.permute.xlu1 %1139 }
 0x61d   : > { %1457 = vpow2.f32 %v1054_v32 }
 0x61e   : > { %1459 = vrcp.f32 %v556_v33 }
 0x623   : > { %v1456_v35 = vpop.eup %1455 }
 0x624   : > { %v888_v36 = vsel %vm547_vm7, %v1456_v35, 0.0 }
 0x625   : > { %889 = vadd.xlane.f32.xlu0 %v888_v36 }
 0x627   : > { %v1458_v37 = vpop.eup %1457 }
 0x628   : > { %v1460_v38 = vpop.eup %1459  ;;  %v1056_v39 = vsel %vm547_vm7, %v1458_v37, 0.0 }
 0x629   : > { %1057 = vadd.xlane.f32.xlu0 %v1056_v39  ;;  %v558_v40 = vmul.f32 %v1460_v38, %v1454_v25 }
 0x62b   : > { %v559_v41 = vsel %vm1579_vm4, %v558_v40, 0.0 }
 0x62c   : > { %1369 = vmatmul.mubr.msk.f32.vlgmr.msra.gmra.mrb[6].mxu0 %vm547_vm7, %v559_v41 }
 0x62d   : > { %1388 = vmatprep.mubr.msk.f32.mxu0 %vm1475_vm5, %v1474_v34 }
 0x63f   : > { %894 = vrot.lane.b32.xlu0 %v1612_v51, %s1480_s21 }
 0x6b2   : > { %v890_v42 = vpop.xlane.xlu0 %889 }
 0x6b3   : > { %1461 = vrcp.f32 %v890_v42 }
 0x6b6   : > { %v1058_v43 = vpop.xlane.xlu0 %1057 }
 0x6b7   : > { %1463 = vrcp.f32 %v1058_v43 }
 0x6ba   : > { %v895_v44 = vpop.permute.xlu0 %894 }
 0x6bb   : > { %1387 = vmatpush3.msra.mxu0 %v895_v44 }
 0x6bc   : > { %1396 = vmatprep.subr.mxu0 %v1474_v34 }
 0x6bd   : > { %v1462_v45 = vpop.eup %1461 }
 0x6be   : > { %v892_v46 = vmul.f32 %v1462_v45, %v1456_v35 }
 0x6c0   : > { %v893_v47 = vsel %vm1579_vm4, %v892_v46, 0.0 }
 0x6c1   : > { %v1464_v48 = vpop.eup %1463  ;;  %1389 = vmatmul.mubr.msk.f32.vlgmr.msra.gmra.mrb[8].mxu0 %vm547_vm7, %v893_v47 }
 0x6c2   : > { %1397 = vmatpush3.msra.mxu0 %v1063_v49  ;;  %1398 = vmatprep.mubr.msk.f32.mxu0 %vm1475_vm5, %v1474_v34  ;;  %v1060_v50 = vmul.f32 %v1464_v48, %v1458_v37 }
 0x6c4   : > { %v1061_v51 = vsel %vm1579_vm4, %v1060_v50, 0.0 }
 0x6c5   : > { %1399 = vmatmul.mubr.msk.f32.vlgmr.msra.gmra.mrb[10].mxu0 %vm547_vm7, %v1061_v51 }
 0x6ff   : > { %v629_v52 = vpop.f32.mrb[6].mxu0 }
 0x700   : > { %v1370_v53 = vpop.f32.mrb[7].mxu0  ;;  %v1150_v34 = vsel %vm470_vm6, %v629_v52, %v1140_v61 }
 0x794   : > { %v966_v57 = vpop.f32.mrb[8].mxu0 }
 0x795   : > { %1143 = vrot.lane.b32.xlu1 %v966_v57, %s1479_s20  ;;  %v1390_v58 = vpop.f32.mrb[9].mxu0 }
 0x798   : > { %v1134_v59 = vpop.f32.mrb[10].mxu0 }
 0x799   : > { %1147 = vrot.lane.b32.xlu0 %v1134_v59, %s1476_s17  ;;  %v1400_v60 = vpop.f32.mrb[11].mxu0  ;;  %s314_s17 = scalar_lea.vmem %s1714_s8, %s1307_s29 }
 0x807   : > { %v1144_v62 = vpop.permute.xlu1 %1143 }
 0x808   : > { %v1152_v63 = vsel %vm1151_vm8, %v1150_v34, %v1144_v62 }
 0x80b   : > { %v1148_v1 = vpop.permute.xlu0 %1147 }
 0x80c   : > { %v1154_v2 = vsel %vm1153_vm9, %v1152_v63, %v1148_v1 }
 0x80d   : > { %v1155_v3 = vpack.c.bf16 %v1154_v2, %v1154_v2 }
 0x80f   : > { %1410 = vmatmul.mubr.msk.bf16.vlgmr.msra.gmra.mrb[8].mxu1 %vm319_vm0, %v1155_v3 }
 0x8e2   : > { %v1232_v5 = vpop.f32.mrb[8].mxu1 }
 0x8e3   : > { %v1233_v6 = vadd.f32 %v1332_v4, %v1232_v5  ;;  %v1411_v7 = vpop.f32.mrb[9].mxu1 }
 0x8e4   : > { %v1235_v8 = vpop.f32.mrb[10].mxu1 }
 0x8e5   : > { %v1238_v9 = vadd.f32 %v1233_v6, %v1544_v0  ;;  %v1412_v10 = vpop.f32.mrb[11].mxu1 }
 0x8e7   : > { %1239 = vst.msk [vmem:[%s314_s17] sm:$0xff] %vm319_vm0, %v1238_v9 }
 0x8e8 PF: > { %s18_s27 = sadd.s32 1, %s1471_s27  }
 0x8e9   : > { %p15_p4 = scmp.ge.s32.totalorder %s18_s27, 4  }
 0x8eb   :  { %17 = sbr.rel (!%p15_p4) target bundleno = 1 (0x1), region = 85 }

// kernel: transformer_forward.15
= control target key start
LH: loop header
LB: loop body
LE: loop exit
PB: predicated region body
PF: predicated region fallthrough
CT: control target
= control target key end

     0   :  { %s1869_s27 = smov 0   ;;  %s2100_s0 = inlined_call_operand.vmem [shape: f32[2,16,64], index: 0, kind: input, shape index: {}]   ;;  %s2101_s1 = inlined_call_operand.vmem [shape: f32[2,1,16], index: 1, kind: input, shape index: {}]   ;;  %s2102_s2 = inlined_call_operand.vmem [shape: f32[1,64], index: 2, kind: input, shape index: {}]   ;;  %s2103_s3 = inlined_call_operand.vmem [shape: f32[1,64], index: 3, kind: input, shape index: {}]   ;;  %s2104_s4 = inlined_call_operand.vmem [shape: bf16[64,192], index: 4, kind: input, shape index: {}]   ;;  %s2105_s5 = inlined_call_operand.vmem [shape: f32[1,192], index: 5, kind: input, shape index: {}]   ;;  %s2106_s6 = inlined_call_operand.vmem [shape: bf16[64,64], index: 6, kind: input, shape index: {}]   ;;  %s2107_s7 = inlined_call_operand.vmem [shape: f32[1,64], index: 7, kind: input, shape index: {}]   ;;  %s2108_s8 = inlined_call_operand.vmem [shape: f32[2,16,64], index: 8, kind: output, shape index: {}]  }
   0x1 LB: > { %s1487_s28 = sadd.s32 4294967295, %s1812_s27   ;;  %p1491_p0 = scmp.ge.s32.totalorder %s1812_s27, 1  ;;  %s1812_s27 = sphi %s1869_s27, %s18_s27  }
   0x2   : > { %p270_p1 = scmp.lt.s32.totalorder %s1812_s27, 3 }
   0x4   : > { %p271_p2 = pnand %p1491_p0, %p270_p1 }
   0x5   : > { %p307_p3 = scmp.lt.s32.totalorder (!%p271_p2), %s1487_s28, 1  ;;  %vm325_vm0 = vcmask (!%p271_p2), 523264   ;;  %v1754_v14 = vld [vmem:[%s2104_s4 + $0x4] ss:$8 sps:$4 sm:$0xff] (!%p271_p2)   ;;  %v1756_v15 = vld [vmem:[%s2104_s4] ss:$8 sps:$4 sm:$0xff] (!%p271_p2)   ;;  %v380_v21 = vlaneseq (!%p271_p2) }
   0x6   : > { %274 = sbr.rel (%p271_p2) target bundleno = 2915 (0xb63), region = 52  ;;  %433 = vmatprep.subr.bf16.mxu0 (!%p271_p2), %v1754_v14  ;;  %v1757_v16 = vld [vmem:[%s2104_s4 + $0x14] ss:$8 sps:$4 sm:$0xff] (!%p271_p2)   ;;  %v1759_v17 = vld [vmem:[%s2104_s4 + $0x10] ss:$8 sps:$4 sm:$0xff] (!%p271_p2)   ;;  %v1814_v23 = vmov (!%p271_p2), 0  }
   0x7   : > { %434 = vmatpush1.bf16.msra.mxu0 (!%p271_p2), %v1756_v15  ;;  %v1760_v18 = vld [vmem:[%s2104_s4 + $0x24] ss:$8 sps:$4 sm:$0xff] (!%p271_p2)   ;;  %v1762_v19 = vld [vmem:[%s2104_s4 + $0x20] ss:$8 sps:$4 sm:$0xff] (!%p271_p2)   ;;  %v1763_v20 = vld [vmem:[%s2104_s4 + $0x34] ss:$8 sps:$4 sm:$0xff] (!%p271_p2)   ;;  %465 = vmatprep.mubr.bf16.mxu0 (!%p271_p2), %v1814_v23 }
   0x8   : > { %435 = vmatprep.subr.bf16.mxu0 (!%p271_p2), %v1757_v16  ;;  %v1765_v22 = vld [vmem:[%s2104_s4 + $0x30] ss:$8 sps:$4 sm:$0xff] (!%p271_p2)   ;;  %v381_v25 = vshrl.u32 (!%p271_p2), %v380_v21, 7  ;;  %v1496_v37 = vld [vmem:[%s2102_s2] ss:$0 sm:$0xff] (!%p271_p2)  ;;  %vm490_vm2 = vcmask (!%p271_p2), 130048  }
   0x9   : > { %v1497_v41 = vld [vmem:[%s2103_s3] ss:$0 sm:$0xff] (!%p271_p2)  ;;  %s1815_s17 = smov (!%p271_p2), 64   ;;  %s1816_s18 = smov (!%p271_p2), 112   ;;  %vm1960_vm3 = vmpackc.low (!%p271_p2), %vm490_vm2, %vm490_vm2  ;;  %vm1823_vm5 = vmmov (!%p271_p2), 0   ;;  %vm1329_vm6 = vcmask (!%p271_p2), 261120  }
   0xa   : > { %v382_v27 = vsub.s32 (!%p271_p2), 0, %v381_v25  ;;  %v378_v46 = vld [vmem:[%s2105_s5] sm:$0x3] (!%p271_p2)  ;;  %v386_v47 = vsub.s32 (!%p271_p2), 1, %v381_v25  ;;  %s1817_s19 = smov (!%p271_p2), 32   ;;  %s1818_s20 = smov (!%p271_p2), 96  }
   0xb   : > { %436 = vmatpush1.bf16.msra.mxu0 (!%p271_p2), %v1759_v17  ;;  %s1819_s21 = smov (!%p271_p2), 48   ;;  %s1820_s22 = smov (!%p271_p2), 16   ;;  %vm1332_vm7 = vcmask (!%p271_p2), 392192  }
   0xc   : > { %437 = vmatprep.subr.bf16.mxu0 (!%p271_p2), %v1760_v18  ;;  %v383_v48 = vrot.slane (!%p271_p2), %v378_v46, %v382_v27  ;;  %v387_v50 = vrot.slane (!%p271_p2), %v378_v46, %v386_v47  ;;  %s1821_s23 = smov (!%p271_p2), 80  }
   0xd   : > { %s2112_s28 = smov (!%p307_p3, %s1487_s28), 1 }
   0xe   : > { %s1539_s29 = sshll.u32 %s2112_s28, 4  ;;  %s314_s30 = scalar_lea.vmem %s2101_s1, %s2112_s28 }
   0xf   : > { %s311_s10 = scalar_lea.vmem %s2100_s0, %s1539_s29  ;;  %438 = vmatpush1.bf16.msra.mxu0 %v1762_v19  ;;  %v476_v24 = vld [vmem:[%s314_s30] sm:$0x1] }
  0x10   : > { %v1885_v0 = vld [vmem:[%s311_s10] sm:$0xff]  ;;  %v1887_v1 = vld [vmem:[%s311_s10 + $0x8] sm:$0xff]  ;;  %439 = vmatprep.subr.bf16.mxu0 %v1763_v20  ;;  %vm477_vm1 = vcmp.gt.f32.partialorder %v476_v24, 0.0 }
  0x11   : > { %v326_v2 = vsel %vm325_vm0, %v1885_v0, 0.0  ;;  %v329_v3 = vsel %vm325_vm0, %v1887_v1, 0.0  ;;  %v478_v26 = vsel %vm477_vm1, 1, %v1814_v23 }
  0x12   : > { %327 = vadd.xlane.f32.xlu0 %v326_v2  ;;  %v1925_v28 = vrot.slane %v478_v26, %v382_v27 }
  0x13   : > { %440 = vmatpush1.bf16.msra.mxu0 %v1765_v22 }
  0x14   : > { %vm483_vm4 = vcmp.eq.s32.totalorder %v1925_v28, 1  ;;  %v1768_v28 = vld [vmem:[%s2106_s6 + $0x10] sm:$0xff]  }
  0x16   : > { %330 = vadd.xlane.f32.xlu0 %v329_v3 }
  0x9f   : > { %v328_v4 = vpop.xlane.xlu0 %327 }
  0xa0   : > { %v333_v5 = vmul.f32 0.015625, %v328_v4 }
  0xa2   : > { %v335_v6 = vsub.f32 %v1885_v0, %v333_v5 }
  0xa3   : > { %v331_v7 = vpop.xlane.xlu0 %330 }
  0xa4   : > { %v334_v8 = vmul.f32 0.015625, %v331_v7  ;;  %v337_v9 = vmul.f32 %v335_v6, %v335_v6 }
  0xa6   : > { %v336_v10 = vsub.f32 %v1887_v1, %v334_v8  ;;  %v339_v11 = vsel %vm325_vm0, %v337_v9, 0.0 }
  0xa7   : > { %340 = vadd.xlane.f32.xlu1 %v339_v11 }
  0xa8   : > { %v338_v12 = vmul.f32 %v336_v10, %v336_v10 }
  0xaa   : > { %v342_v13 = vsel %vm325_vm0, %v338_v12, 0.0 }
  0xab   : > { %343 = vadd.xlane.f32.xlu1 %v342_v13 }
 0x134   : > { %v341_v29 = vpop.xlane.xlu1 %340 }
 0x135   : > { %v345_v30 = vmul.f32 0.015625, %v341_v29 }
 0x137   : > { %v347_v31 = vadd.f32 1e-05, %v345_v30 }
 0x138   : > { %v344_v32 = vpop.xlane.xlu1 %343 }
 0x139   : > { %1770 = vrsqrt.f32 %v347_v31  ;;  %v346_v33 = vmul.f32 0.015625, %v344_v32 }
 0x13b   : > { %v348_v34 = vadd.f32 1e-05, %v346_v33 }
 0x13d   : > { %1772 = vrsqrt.f32 %v348_v34 }
 0x143   : > { %v1771_v35 = vpop.eup %1770 }
 0x144   : > { %v351_v36 = vmul.f32 %v1771_v35, %v335_v6 }
 0x146   : > { %v359_v40 = vmul.f32 %v1496_v37, %v351_v36 }
 0x147   : > { %v1773_v38 = vpop.eup %1772 }
 0x148   : > { %v352_v39 = vmul.f32 %v1773_v38, %v336_v10  ;;  %v367_v43 = vadd.f32 %v1497_v41, %v359_v40 }
 0x14a   : > { %v360_v42 = vmul.f32 %v1496_v37, %v352_v39 }
 0x14c   : > { %v368_v44 = vadd.f32 %v1497_v41, %v360_v42 }
 0x14e   : > { %v369_v45 = vpack.c.bf16 %v368_v44, %v367_v43 }
 0x150   : > { %1506 = vmatmul.mubr.msk.bf16.vlgmr.msra.gmra.mrb[0].mxu0 %vm325_vm0, %v369_v45 }
 0x223   : > { %v467_v49 = vpop.f32.mrb[0].mxu0 }
 0x224   : > { %v1937_v51 = vadd.f32 %v467_v49, %v383_v48  ;;  %v469_v52 = vpop.f32.mrb[1].mxu0 }
 0x225   : > { %v471_v53 = vpop.f32.mrb[2].mxu0  ;;  %v470_v56 = vadd.f32 %v469_v52, %v387_v50 }
 0x226   : > { %v1939_v54 = vadd.f32 %v471_v53, %v383_v48  ;;  %v473_v55 = vpop.f32.mrb[3].mxu0  ;;  %1582 = vmatprep.mubr.msk.f32.mxu0 %vm490_vm2, %v1937_v51 }
 0x227   : > { %v474_v57 = vadd.f32 %v473_v55, %v387_v50 }
 0x228   : > { %v1945_v58 = vpack.i.bf16 %v1939_v54, %v1937_v51 }
 0x229   : > { %v1652_v59 = vpack.c.bf16 %v474_v57, %v470_v56  ;;  %v1947_v60 = vpack.i.bf16 %v474_v57, %v470_v56 }
 0x22a   : > { %1705 = vrot.lane.b32.xlu0 %v1945_v58, %s1815_s17  ;;  %s319_s17 = scalar_lea.vmem %s2108_s8, %s1539_s29 }
 0x22b   : > { %1653 = vmatprep.subr.bf16.mxu1 %v1652_v59 }
 0x22c   : > { %1655 = vmatpush3.bf16.msra.mxu1 %v1652_v59 }
 0x22e   : > { %683 = vrot.lane.b32.xlu0 %v1937_v51, %s1816_s18 }
 0x232   : > { %1715 = vrot.lane.b32.xlu0 %v1945_v58, %s1817_s19 }
 0x236   : > { %685 = vrot.lane.b32.xlu0 %v1939_v54, %s1816_s18 }
 0x23a   : > { %893 = vrot.lane.b32.xlu0 %v1939_v54, %s1818_s20 }
 0x29c   : > { %v1706_v61 = vpop.permute.xlu0 %1705 }
 0x29d   : > { %v1708_v62 = vunpack.i.h.bf16 %v1706_v61  ;;  %v1707_v63 = vunpack.i.l.bf16 %v1706_v61 }
 0x29f   : > { %v1646_v3 = vpack.c.bf16 %v1708_v62, %v1707_v63 }
 0x2a0   : > { %v684_v24 = vpop.permute.xlu0 %683 }
 0x2a1   : > { %1648 = vmatprep.subr.msk.bf16.mxu0 %vm1960_vm3, %v1646_v3 }
 0x2a2   : > { %1651 = vmatpush3.bf16.xpose.msk.msra.mxu0 %vm1960_vm3, %v1646_v3 }
 0x2a4   : > { %v1716_v31 = vpop.permute.xlu0 %1715 }
 0x2a5   : > { %v1718_v34 = vunpack.i.h.bf16 %v1716_v31  ;;  %v1717_v35 = vunpack.i.l.bf16 %v1716_v31 }
 0x2a7   : > { %v1666_v39 = vpack.c.bf16 %v1718_v34, %v1717_v35 }
 0x2a8   : > { %v686_v40 = vpop.permute.xlu0 %685 }
 0x2a9   : > { %1583 = vmatmul.mubr.msk.f32.vlgmr.msra.gmra.mrb[4].mxu0 %vm490_vm2, %v1939_v54 }
 0x2ac   : > { %v894_v42 = vpop.permute.xlu0 %893 }
 0x37c   : > { %v1584_v4 = vpop.f32.mrb[4].mxu0 }
 0x37d   : > { %v565_v5 = vpop.f32.mrb[5].mxu0  ;;  %v575_v6 = vmul.f32 0.25, %v1584_v4 }
 0x37e   : > { %v574_v7 = vmul.f32 0.25, %v565_v5 }
 0x37f   : > { %v577_v10 = vsel %vm483_vm4, %v575_v6, -3.4028235e+38 }
 0x380   : > { %v576_v8 = vsel %vm483_vm4, %v574_v7, -3.4028235e+38  ;;  %v581_v11 = vsel %vm490_vm2, %v577_v10, -inf }
 0x381   : > { %v578_v9 = vsel %vm490_vm2, %v576_v8, -inf }
 0x382   : > { %579 = vmax.xlane.f32.xlu1 %v578_v9 }
 0x386   : > { %582 = vmax.xlane.f32.xlu1 %v581_v11 }
 0x40f   : > { %v580_v12 = vpop.xlane.xlu1 %579 }
 0x410   : > { %v584_v13 = vsub.f32 %v576_v8, %v580_v12 }
 0x412   : > { %v586_v16 = vmul.f32 1.442695, %v584_v13 }
 0x413   : > { %v583_v14 = vpop.xlane.xlu1 %582 }
 0x414   : > { %v585_v15 = vsub.f32 %v577_v10, %v583_v14 }
 0x416   : > { %v588_v17 = vmul.f32 1.442695, %v585_v15 }
 0x418   : > { %1774 = vpow2.f32 %v588_v17 }
 0x419   : > { %1776 = vpow2.f32 %v586_v16 }
 0x422   : > { %v1775_v18 = vpop.eup %1774 }
 0x423   : > { %v593_v19 = vsel %vm490_vm2, %v1775_v18, 0.0  ;;  %v1777_v20 = vpop.eup %1776 }
 0x424   : > { %594 = vadd.xlane.f32.xlu1 %v593_v19  ;;  %v590_v21 = vsel %vm490_vm2, %v1777_v20, 0.0 }
 0x428   : > { %591 = vadd.xlane.f32.xlu1 %v590_v21 }
 0x439   : > { %1710 = vrot.lane.b32.xlu1 %v1945_v58, %s1819_s21 }
 0x43d   : > { %891 = vrot.lane.b32.xlu1 %v1937_v51, %s1818_s20 }
 0x4b1   : > { %v595_v22 = vpop.xlane.xlu1 %594 }
 0x4b2   : > { %1778 = vrcp.f32 %v595_v22 }
 0x4b5   : > { %v592_v23 = vpop.xlane.xlu1 %591 }
 0x4b6   : > { %1780 = vrcp.f32 %v592_v23 }
 0x4b9   : > { %v1711_v25 = vpop.permute.xlu1 %1710 }
 0x4ba   : > { %v1713_v26 = vunpack.i.h.bf16 %v1711_v25  ;;  %v1712_v27 = vunpack.i.l.bf16 %v1711_v25 }
 0x4bc   : > { %v1656_v29 = vpack.c.bf16 %v1713_v26, %v1712_v27  ;;  %v1779_v30 = vpop.eup %1778 }
 0x4bd   : > { %v599_v33 = vmul.f32 %v1779_v30, %v1775_v18  ;;  %v892_v41 = vpop.permute.xlu1 %891 }
 0x4be   : > { %1658 = vmatprep.subr.msk.bf16.mxu1 %vm1960_vm3, %v1656_v29 }
 0x4bf   : > { %v601_v38 = vsel %vm483_vm4, %v599_v33, 0.0 }
 0x4c0   : > { %v1781_v32 = vpop.eup %1780 }
 0x4c1   : > { %v598_v36 = vmul.f32 %v1781_v32, %v1777_v20 }
 0x4c3   : > { %v600_v37 = vsel %vm483_vm4, %v598_v36, 0.0 }
 0x4c4   : > { %1589 = vmatprep.mubr.msk.f32.mxu1 %vm490_vm2, %v600_v37 }
 0x4c5   : > { %1590 = vmatmul.mubr.msk.f32.vlgmr.msra.gmra.mrb[0].mxu1 %vm490_vm2, %v601_v38 }
 0x4c6   : > { %1661 = vmatpush3.bf16.xpose.msk.msra.mxu1 %vm1960_vm3, %v1656_v29  ;;  %1596 = vmatprep.mubr.msk.f32.mxu1 %vm490_vm2, %v684_v24 }
 0x4c7   : > { %1668 = vmatprep.subr.msk.bf16.mxu1 %vm1960_vm3, %v1666_v39 }
 0x4cd   : > { %1597 = vmatmul.mubr.msk.f32.vlgmr.msra.gmra.mrb[2].mxu1 %vm490_vm2, %v686_v40 }
 0x4ce   : > { %1671 = vmatpush3.bf16.xpose.msk.msra.mxu1 %vm1960_vm3, %v1666_v39  ;;  %1610 = vmatprep.mubr.msk.f32.mxu1 %vm490_vm2, %v892_v41 }
 0x4d5   : > { %1611 = vmatmul.mubr.msk.f32.vlgmr.msra.gmra.mrb[4].mxu1 %vm490_vm2, %v894_v42 }
 0x598   : > { %v2001_v43 = vpop.f32.mrb[0].mxu1 }
 0x599   : > { %v2003_v44 = vpop.f32.mrb[1].mxu1 }
 0x5a0   : > { %v1598_v45 = vpop.f32.mrb[2].mxu1 }
 0x5a1   : > { %v775_v46 = vmul.f32 0.25, %v1598_v45  ;;  %v765_v47 = vpop.f32.mrb[3].mxu1 }
 0x5a2   : > { %v774_v48 = vmul.f32 0.25, %v765_v47 }
 0x5a3   : > { %v777_v49 = vsel %vm483_vm4, %v775_v46, -3.4028235e+38 }
 0x5a4   : > { %v781_v50 = vsel %vm490_vm2, %v777_v49, -inf  ;;  %v776_v52 = vsel %vm483_vm4, %v774_v48, -3.4028235e+38 }
 0x5a5   : > { %782 = vmax.xlane.f32.xlu0 %v781_v50  ;;  %v778_v53 = vsel %vm490_vm2, %v776_v52, -inf }
 0x5a6   : > { %779 = vmax.xlane.f32.xlu1 %v778_v53 }
 0x5a8   : > { %v1612_v55 = vpop.f32.mrb[4].mxu1 }
 0x5a9   : > { %v973_v56 = vpop.f32.mrb[5].mxu1  ;;  %v983_v57 = vmul.f32 0.25, %v1612_v55 }
 0x5aa   : > { %v982_v59 = vmul.f32 0.25, %v973_v56 }
 0x5ab   : > { %v985_v63 = vsel %vm483_vm4, %v983_v57, -3.4028235e+38 }
 0x5ac   : > { %v984_v61 = vsel %vm483_vm4, %v982_v59, -3.4028235e+38  ;;  %v989_v3 = vsel %vm490_vm2, %v985_v63, -inf }
 0x5ad   : > { %v986_v62 = vsel %vm490_vm2, %v984_v61, -inf }
 0x5ae   : > { %987 = vmax.xlane.f32.xlu0 %v986_v62 }
 0x5b2   : > { %990 = vmax.xlane.f32.xlu0 %v989_v3 }
 0x5b7   : > { %1720 = vrot.lane.b32.xlu1 %v1947_v60, %s1816_s18 }
 0x632   : > { %v783_v4 = vpop.xlane.xlu0 %782 }
 0x633   : > { %v785_v5 = vsub.f32 %v777_v49, %v783_v4  ;;  %v780_v6 = vpop.xlane.xlu1 %779 }
 0x634   : > { %v784_v7 = vsub.f32 %v776_v52, %v780_v6 }
 0x635   : > { %v788_v8 = vmul.f32 1.442695, %v785_v5 }
 0x636   : > { %v786_v9 = vmul.f32 1.442695, %v784_v7 }
 0x637   : > { %1782 = vpow2.f32 %v788_v8  ;;  %v1721_v10 = vpop.permute.xlu1 %1720 }
 0x638   : > { %1784 = vpow2.f32 %v786_v9  ;;  %v1723_v11 = vunpack.i.h.bf16 %v1721_v10  ;;  %v1722_v12 = vunpack.i.l.bf16 %v1721_v10 }
 0x63a   : > { %v1662_v13 = vpack.c.bf16 %v1723_v11, %v1722_v12 }
 0x63b   : > { %v988_v14 = vpop.xlane.xlu0 %987 }
 0x63c   : > { %1663 = vmatprep.subr.bf16.mxu0 %v1662_v13  ;;  %v992_v24 = vsub.f32 %v984_v61, %v988_v14 }
 0x63d   : > { %1665 = vmatpush3.bf16.msra.mxu0 %v1662_v13 }
 0x63e   : > { %v994_v25 = vmul.f32 1.442695, %v992_v24 }
 0x63f   : > { %v991_v15 = vpop.xlane.xlu0 %990 }
 0x640   : > { %v993_v16 = vsub.f32 %v985_v63, %v991_v15 }
 0x641   : > { %v1783_v17 = vpop.eup %1782 }
 0x642   : > { %v1785_v18 = vpop.eup %1784  ;;  %v996_v19 = vmul.f32 1.442695, %v993_v16  ;;  %v793_v20 = vsel %vm490_vm2, %v1783_v17, 0.0 }
 0x643   : > { %794 = vadd.xlane.f32.xlu0 %v793_v20  ;;  %v790_v21 = vsel %vm490_vm2, %v1785_v18, 0.0 }
 0x644   : > { %1786 = vpow2.f32 %v996_v19  ;;  %791 = vadd.xlane.f32.xlu1 %v790_v21 }
 0x645   : > { %1788 = vpow2.f32 %v994_v25 }
 0x64e   : > { %v1787_v22 = vpop.eup %1786 }
 0x64f   : > { %v1001_v23 = vsel %vm490_vm2, %v1787_v22, 0.0  ;;  %v1789_v26 = vpop.eup %1788 }
 0x650   : > { %1002 = vadd.xlane.f32.xlu0 %v1001_v23  ;;  %v998_v27 = vsel %vm490_vm2, %v1789_v26, 0.0 }
 0x655   : > { %1730 = vrot.lane.b32.xlu1 %v1945_v58, %s1820_s22 }
 0x659   : > { %1097 = vrot.lane.b32.xlu1 %v1937_v51, %s1821_s23 }
 0x666   : > { %1725 = vrot.lane.b32.xlu0 %v1947_v60, %s1818_s20 }
 0x67d   : > { %999 = vadd.xlane.f32.xlu1 %v998_v27 }
 0x68e   : > { %1099 = vrot.lane.b32.xlu1 %v1939_v54, %s1821_s23 }
 0x6d0   : > { %v795_v29 = vpop.xlane.xlu0 %794 }
 0x6d1   : > { %1790 = vrcp.f32 %v795_v29  ;;  %v792_v58 = vpop.xlane.xlu1 %791 }
 0x6d2   : > { %1792 = vrcp.f32 %v792_v58 }
 0x6d5   : > { %v1731_v34 = vpop.permute.xlu1 %1730 }
 0x6d6   : > { %v1733_v54 = vunpack.i.h.bf16 %v1731_v34  ;;  %v1732_v38 = vunpack.i.l.bf16 %v1731_v34 }
 0x6d8   : > { %v1676_v42 = vpack.c.bf16 %v1733_v54, %v1732_v38 }
 0x6d9   : > { %v1098_v45 = vpop.permute.xlu1 %1097 }
 0x6db   : > { %v1791_v30 = vpop.eup %1790 }
 0x6dc   : > { %v1793_v31 = vpop.eup %1792  ;;  %v799_v51 = vmul.f32 %v1791_v30, %v1783_v17 }
 0x6dd   : > { %v1003_v32 = vpop.xlane.xlu0 %1002  ;;  %v798_v33 = vmul.f32 %v1793_v31, %v1785_v18  ;;  %v1766_v31 = vld [vmem:[%s2106_s6] sm:$0xff]  }
 0x6de   : > { %v801_v36 = vsel %vm483_vm4, %v799_v51, 0.0  ;;  %1794 = vrcp.f32 %v1003_v32  ;;  %v1822_v51 = vmov 0.0   ;;  %v1767_v32 = vld [vmem:[%s2106_s6 + $0x8] sm:$0xff]  }
 0x6df   : > { %v800_v35 = vsel %vm483_vm4, %v798_v33, 0.0  ;;  %v1769_v33 = vld [vmem:[%s2106_s6 + $0x18] sm:$0xff]  }
 0x6e0   : > { %1603 = vmatprep.mubr.msk.f32.mxu0 %vm490_vm2, %v800_v35 }
 0x6e1   : > { %v1726_v37 = vpop.permute.xlu0 %1725  ;;  %1604 = vmatmul.mubr.msk.f32.vlgmr.msra.gmra.mrb[6].mxu0 %vm490_vm2, %v801_v36 }
 0x6e2   : > { %v1728_v39 = vunpack.i.h.bf16 %v1726_v37  ;;  %v1727_v40 = vunpack.i.l.bf16 %v1726_v37 }
 0x6e4   : > { %v1672_v41 = vpack.c.bf16 %v1728_v39, %v1727_v40 }
 0x6e6   : > { %1673 = vmatprep.subr.bf16.mxu0 %v1672_v41 }
 0x6e7   : > { %1675 = vmatpush3.bf16.msra.mxu0 %v1672_v41 }
 0x6e8   : > { %1678 = vmatprep.subr.msk.bf16.mxu0 %vm1960_vm3, %v1676_v42  ;;  %v1795_v47 = vpop.eup %1794 }
 0x6e9   : > { %v1007_v49 = vmul.f32 %v1795_v47, %v1787_v22 }
 0x6eb   : > { %v1009_v53 = vsel %vm483_vm4, %v1007_v49, 0.0 }
 0x70a   : > { %v1000_v46 = vpop.xlane.xlu1 %999 }
 0x70b   : > { %1796 = vrcp.f32 %v1000_v46 }
 0x70e   : > { %v1100_v55 = vpop.permute.xlu1 %1099 }
 0x715   : > { %v1797_v48 = vpop.eup %1796 }
 0x716   : > { %v1006_v50 = vmul.f32 %v1797_v48, %v1789_v26 }
 0x718   : > { %v1008_v52 = vsel %vm483_vm4, %v1006_v50, 0.0 }
 0x719   : > { %1617 = vmatprep.mubr.msk.f32.mxu0 %vm490_vm2, %v1008_v52 }
 0x71a   : > { %1618 = vmatmul.mubr.msk.f32.vlgmr.msra.gmra.mrb[8].mxu0 %vm490_vm2, %v1009_v53 }
 0x71b   : > { %1681 = vmatpush3.bf16.xpose.msk.msra.mxu0 %vm1960_vm3, %v1676_v42  ;;  %1624 = vmatprep.mubr.msk.f32.mxu0 %vm490_vm2, %v1098_v45 }
 0x722   : > { %1625 = vmatmul.mubr.msk.f32.vlgmr.msra.gmra.mrb[10].mxu0 %vm490_vm2, %v1100_v55 }
 0x7b4   : > { %v1605_v56 = vpop.f32.mrb[6].mxu0 }
 0x7b5   : > { %v882_v57 = vpop.f32.mrb[7].mxu0 }
 0x7b6   : > { %v1739_v59 = vpack.i.bf16 %v1605_v56, %v882_v57  ;;  %v1531_v56 = vld [vmem:[%s2107_s7] ss:$0 sm:$0xff] }
 0x7ed   : > { %v1619_v61 = vpop.f32.mrb[8].mxu0 }
 0x7ee   : > { %v1088_v62 = vpop.f32.mrb[9].mxu0 }
 0x7ef   : > { %v1744_v63 = vpack.i.bf16 %v1619_v61, %v1088_v62 }
 0x7f5   : > { %v1626_v3 = vpop.f32.mrb[10].mxu0 }
 0x7f6   : > { %v1189_v4 = vmul.f32 0.25, %v1626_v3  ;;  %v1179_v5 = vpop.f32.mrb[11].mxu0 }
 0x7f7   : > { %v1188_v6 = vmul.f32 0.25, %v1179_v5 }
 0x7f8   : > { %v1191_v7 = vsel %vm483_vm4, %v1189_v4, -3.4028235e+38 }
 0x7f9   : > { %v1195_v2 = vsel %vm490_vm2, %v1191_v7, -inf  ;;  %v1190_v8 = vsel %vm483_vm4, %v1188_v6, -3.4028235e+38 }
 0x7fa   : > { %1196 = vmax.xlane.f32.xlu1 %v1195_v2  ;;  %v1192_v9 = vsel %vm490_vm2, %v1190_v8, -inf }
 0x7fb   : > { %1193 = vmax.xlane.f32.xlu0 %v1192_v9 }
 0x80b   : > { %1740 = vrot.lane.b32.xlu1 %v1739_v59, %s1820_s22 }
 0x80f   : > { %1745 = vrot.lane.b32.xlu1 %v1744_v63, %s1817_s19 }
 0x887   : > { %v1197_v10 = vpop.xlane.xlu1 %1196 }
 0x888   : > { %v1199_v11 = vsub.f32 %v1191_v7, %v1197_v10  ;;  %v1194_v12 = vpop.xlane.xlu0 %1193 }
 0x889   : > { %v1198_v13 = vsub.f32 %v1190_v8, %v1194_v12 }
 0x88a   : > { %v1202_v14 = vmul.f32 1.442695, %v1199_v11 }
 0x88b   : > { %v1200_v15 = vmul.f32 1.442695, %v1198_v13  ;;  %v1741_v37 = vpop.permute.xlu1 %1740 }
 0x88c   : > { %1798 = vpow2.f32 %v1202_v14  ;;  %v1743_v38 = vunpack.i.h.bf16 %v1741_v37  ;;  %v1742_v39 = vunpack.i.l.bf16 %v1741_v37 }
 0x88d   : > { %1800 = vpow2.f32 %v1200_v15 }
 0x88e   : > { %v1328_v45 = vsel %vm490_vm2, %v2001_v43, %v1743_v38  ;;  %v1327_v46 = vsel %vm490_vm2, %v2003_v44, %v1742_v39 }
 0x88f   : > { %v1746_v54 = vpop.permute.xlu1 %1745 }
 0x890   : > { %v1748_v40 = vunpack.i.h.bf16 %v1746_v54  ;;  %v1747_v41 = vunpack.i.l.bf16 %v1746_v54 }
 0x892   : > { %v1330_v49 = vsel %vm1329_vm6, %v1327_v46, %v1747_v41  ;;  %v1331_v50 = vsel %vm1329_vm6, %v1328_v45, %v1748_v40 }
 0x896   : > { %v1799_v16 = vpop.eup %1798 }
 0x897   : > { %v1207_v17 = vsel %vm490_vm2, %v1799_v16, 0.0  ;;  %v1801_v18 = vpop.eup %1800 }
 0x898   : > { %1208 = vadd.xlane.f32.xlu0 %v1207_v17  ;;  %v1204_v19 = vsel %vm490_vm2, %v1801_v18, 0.0 }
 0x89c   : > { %1205 = vadd.xlane.f32.xlu0 %v1204_v19 }
 0x8b2   : > { %1735 = vrot.lane.b32.xlu0 %v1947_v60, %s1821_s23 }
 0x925   : > { %v1209_v20 = vpop.xlane.xlu0 %1208 }
 0x926   : > { %1802 = vrcp.f32 %v1209_v20 }
 0x929   : > { %v1206_v21 = vpop.xlane.xlu0 %1205 }
 0x92a   : > { %1804 = vrcp.f32 %v1206_v21 }
 0x92d   : > { %v1736_v22 = vpop.permute.xlu0 %1735 }
 0x92e   : > { %v1738_v23 = vunpack.i.h.bf16 %v1736_v22  ;;  %v1737_v24 = vunpack.i.l.bf16 %v1736_v22 }
 0x930   : > { %v1682_v25 = vpack.c.bf16 %v1738_v23, %v1737_v24  ;;  %v1803_v26 = vpop.eup %1802 }
 0x931   : > { %v1213_v29 = vmul.f32 %v1803_v26, %v1799_v16 }
 0x932   : > { %1683 = vmatprep.subr.bf16.mxu1 %v1682_v25 }
 0x933   : > { %1685 = vmatpush3.bf16.msra.mxu1 %v1682_v25  ;;  %v1215_v60 = vsel %vm483_vm4, %v1213_v29, 0.0 }
 0x934   : > { %v1805_v27 = vpop.eup %1804  ;;  %1634 = vmatprep.subr.bf16.mxu1 %v1822_v51 }
 0x935   : > { %v1212_v58 = vmul.f32 %v1805_v27, %v1801_v18 }
 0x937   : > { %v1214_v30 = vsel %vm483_vm4, %v1212_v58, 0.0 }
 0x938   : > { %1631 = vmatprep.mubr.msk.f32.mxu1 %vm490_vm2, %v1214_v30 }
 0x939   : > { %1632 = vmatmul.mubr.msk.f32.vlgmr.msra.gmra.mrb[6].mxu1 %vm490_vm2, %v1215_v60 }
 0x93a   : > { %1635 = vmatpush3.bf16.msra.mxu1 %v1766_v31  ;;  %1642 = vmatprep.mubr.msk.bf16.mxu1 %vm1823_vm5, %v1822_v51 }
 0x93b   : > { %1636 = vmatprep.subr.bf16.mxu1 %v1822_v51 }
 0x93e   : > { %1637 = vmatpush3.bf16.msra.mxu1 %v1767_v32 }
 0x93f   : > { %1638 = vmatprep.subr.bf16.mxu1 %v1822_v51 }
 0x942   : > { %1639 = vmatpush3.bf16.msra.mxu1 %v1768_v28 }
 0x943   : > { %1640 = vmatprep.subr.bf16.mxu1 %v1822_v51 }
 0x946   : > { %1641 = vmatpush3.bf16.msra.mxu1 %v1769_v33 }
 0xa0c   : > { %v1633_v34 = vpop.f32.mrb[6].mxu1 }
 0xa0d   : > { %v1294_v35 = vpop.f32.mrb[7].mxu1 }
 0xa0e   : > { %v1749_v36 = vpack.i.bf16 %v1633_v34, %v1294_v35 }
 0xa10   : > { %1750 = vrot.lane.b32.xlu1 %v1749_v36, %s1819_s21 }
 0xa82   : > { %v1751_v42 = vpop.permute.xlu1 %1750 }
 0xa83   : > { %v1753_v47 = vunpack.i.h.bf16 %v1751_v42  ;;  %v1752_v48 = vunpack.i.l.bf16 %v1751_v42 }
 0xa85   : > { %v1334_v52 = vsel %vm1332_vm7, %v1331_v50, %v1753_v47  ;;  %v1333_v53 = vsel %vm1332_vm7, %v1330_v49, %v1752_v48 }
 0xa86   : > { %v1335_v55 = vpack.c.bf16 %v1334_v52, %v1333_v53 }
 0xa88   : > { %1643 = vmatmul.mubr.msk.bf16.vlgmr.msra.gmra.mrb[8].mxu1 %vm325_vm0, %v1335_v55 }
 0xb5b   : > { %v1412_v57 = vpop.f32.mrb[8].mxu1 }
 0xb5c   : > { %v1413_v59 = vadd.f32 %v1531_v56, %v1412_v57  ;;  %v1644_v61 = vpop.f32.mrb[9].mxu1 }
 0xb5d   : > { %v1415_v43 = vpop.f32.mrb[10].mxu1 }
 0xb5e   : > { %v1419_v44 = vadd.f32 %v1413_v59, %v1885_v0  ;;  %v1416_v62 = vadd.f32 %v1531_v56, %v1415_v43  ;;  %v1645_v63 = vpop.f32.mrb[11].mxu1 }
 0xb60   : > { %1421 = vst.msk [vmem:[%s319_s17] sm:$0xff] %vm325_vm0, %v1419_v44  ;;  %v1420_v3 = vadd.f32 %v1416_v62, %v1887_v1 }
 0xb62   : > { %1422 = vst.msk [vmem:[%s319_s17 + $0x8] sm:$0xff] %vm325_vm0, %v1420_v3 }
 0xb63 PF: > { %s18_s27 = sadd.s32 1, %s1812_s27  }
 0xb64   : > { %p15_p4 = scmp.ge.s32.totalorder %s18_s27, 4  }
 0xb66   :  { %17 = sbr.rel (!%p15_p4) target bundleno = 1 (0x1), region = 85 }

// kernel: transformer_forward.19
= control target key start
LH: loop header
LB: loop body
LE: loop exit
PB: predicated region body
PF: predicated region fallthrough
CT: control target
= control target key end

     0   :  { %s331_s12 = smov 0   ;;  %s367_s0 = inlined_call_operand.vmem [shape: f32[2,16,64], index: 0, kind: input, shape index: {}]   ;;  %s368_s1 = inlined_call_operand.vmem [shape: f32[1,64], index: 1, kind: input, shape index: {}]   ;;  %s369_s2 = inlined_call_operand.vmem [shape: f32[1,64], index: 2, kind: input, shape index: {}]   ;;  %s370_s3 = inlined_call_operand.vmem [shape: f32[2,16,64], index: 3, kind: output, shape index: {}]  }
   0x1 LB: > { %s276_s13 = sadd.s32 4294967295, %s309_s12   ;;  %p280_p0 = scmp.ge.s32.totalorder %s309_s12, 1  ;;  %s309_s12 = sphi %s331_s12, %s13_s12  }
   0x2   : > { %p137_p1 = scmp.lt.s32.totalorder %s309_s12, 3 }
   0x4   : > { %p138_p2 = pnand %p280_p0, %p137_p1 }
   0x5   : > { %p161_p3 = scmp.lt.s32.totalorder (!%p138_p2), %s276_s13, 1  ;;  %vm175_vm0 = vcmask (!%p138_p2), 523264   ;;  %v285_v21 = vld [vmem:[%s368_s1] ss:$0 sm:$0xff] (!%p138_p2) }
   0x6   : > { %141 = sbr.rel (%p138_p2) target bundleno = 335 (0x14f), region = 32  ;;  %v286_v23 = vld [vmem:[%s369_s2] ss:$0 sm:$0xff] (!%p138_p2) }
   0xd   : > { %s372_s13 = smov (!%p161_p3, %s276_s13), 1 }
   0xe   : > { %s289_s14 = sshll.u32 %s372_s13, 4 }
   0xf   : > { %s165_s17 = scalar_lea.vmem %s367_s0, %s289_s14  ;;  %s170_s24 = scalar_lea.vmem %s370_s3, %s289_s14 }
  0x10   : > { %v171_v0 = vld [vmem:[%s165_s17] sm:$0xff]  ;;  %v172_v1 = vld [vmem:[%s165_s17 + $0x8] sm:$0xff] }
  0x11   : > { %v176_v2 = vsel %vm175_vm0, %v171_v0, 0.0  ;;  %v179_v3 = vsel %vm175_vm0, %v172_v1, 0.0 }
  0x12   : > { %177 = vadd.xlane.f32.xlu0 %v176_v2 }
  0x16   : > { %180 = vadd.xlane.f32.xlu0 %v179_v3 }
  0x9f   : > { %v178_v4 = vpop.xlane.xlu0 %177 }
  0xa0   : > { %v183_v5 = vmul.f32 0.015625, %v178_v4 }
  0xa2   : > { %v185_v6 = vsub.f32 %v171_v0, %v183_v5 }
  0xa3   : > { %v181_v7 = vpop.xlane.xlu0 %180 }
  0xa4   : > { %v184_v8 = vmul.f32 0.015625, %v181_v7  ;;  %v187_v9 = vmul.f32 %v185_v6, %v185_v6 }
  0xa6   : > { %v186_v10 = vsub.f32 %v172_v1, %v184_v8  ;;  %v189_v11 = vsel %vm175_vm0, %v187_v9, 0.0 }
  0xa7   : > { %190 = vadd.xlane.f32.xlu1 %v189_v11 }
  0xa8   : > { %v188_v12 = vmul.f32 %v186_v10, %v186_v10 }
  0xaa   : > { %v192_v13 = vsel %vm175_vm0, %v188_v12, 0.0 }
  0xab   : > { %193 = vadd.xlane.f32.xlu1 %v192_v13 }
 0x134   : > { %v191_v14 = vpop.xlane.xlu1 %190 }
 0x135   : > { %v195_v15 = vmul.f32 0.015625, %v191_v14 }
 0x137   : > { %v197_v16 = vadd.f32 1e-05, %v195_v15 }
 0x138   : > { %v194_v17 = vpop.xlane.xlu1 %193 }
 0x139   : > { %299 = vrsqrt.f32 %v197_v16  ;;  %v196_v18 = vmul.f32 0.015625, %v194_v17 }
 0x13b   : > { %v198_v19 = vadd.f32 1e-05, %v196_v18 }
 0x13d   : > { %301 = vrsqrt.f32 %v198_v19 }
 0x143   : > { %v300_v20 = vpop.eup %299 }
 0x144   : > { %v201_v22 = vmul.f32 %v300_v20, %v185_v6 }
 0x146   : > { %v209_v24 = vmul.f32 %v285_v21, %v201_v22 }
 0x147   : > { %v302_v25 = vpop.eup %301 }
 0x148   : > { %v217_v26 = vadd.f32 %v286_v23, %v209_v24  ;;  %v202_v27 = vmul.f32 %v302_v25, %v186_v10 }
 0x14a   : > { %219 = vst.msk [vmem:[%s170_s24] sm:$0xff] %vm175_vm0, %v217_v26  ;;  %v210_v28 = vmul.f32 %v285_v21, %v202_v27 }
 0x14c   : > { %v218_v29 = vadd.f32 %v286_v23, %v210_v28 }
 0x14e   : > { %220 = vst.msk [vmem:[%s170_s24 + $0x8] sm:$0xff] %vm175_vm0, %v218_v29 }
 0x14f PF: > { %s13_s12 = sadd.s32 1, %s309_s12  }
 0x150   : > { %p10_p4 = scmp.ge.s32.totalorder %s13_s12, 4  }
 0x152   :  { %12 = sbr.rel (!%p10_p4) target bundleno = 1 (0x1), region = 62 }

// kernel: transformer_forward.26
= control target key start
LH: loop header
LB: loop body
LE: loop exit
PB: predicated region body
PF: predicated region fallthrough
CT: control target
= control target key end

     0   :  { %vm25_vm0 = vcmask 523264   ;;  %v194_v15 = vmov 0.0   ;;  %vm195_vm1 = vmmov 0   ;;  %s264_s0 = inlined_call_operand.vmem [shape: f32[16,64], index: 0, kind: input, shape index: {}]   ;;  %s265_s3 = inlined_call_operand.vmem [shape: bf16[64,128], index: 3, kind: input, shape index: {}]   ;;  %s266_s1 = inlined_call_operand.vmem [shape: f32[1,64], index: 1, kind: input, shape index: {}]   ;;  %s267_s2 = inlined_call_operand.vmem [shape: f32[1,64], index: 2, kind: input, shape index: {}]   ;;  %s268_s4 = inlined_call_operand.vmem [shape: f32[1,128], index: 4, kind: input, shape index: {}]   ;;  %s269_s5 = inlined_call_operand.vmem [shape: f32[16,128], index: 5, kind: output, shape index: {}]  }
   0x1   :  { %v21_v0 = vld [vmem:[%s264_s0] sm:$0xff]  ;;  %v22_v1 = vld [vmem:[%s264_s0 + $0x8] sm:$0xff]  ;;  %172 = vmatprep.subr.bf16.mxu0 %v194_v15  ;;  %v188_v17 = vld [vmem:[%s265_s3 + $0x10] sm:$0xff]   ;;  %180 = vmatprep.mubr.msk.bf16.mxu0 %vm195_vm1, %v194_v15 }
   0x2   :  { %v26_v2 = vsel %vm25_vm0, %v21_v0, 0.0  ;;  %v29_v3 = vsel %vm25_vm0, %v22_v1, 0.0  ;;  %v186_v14 = vld [vmem:[%s265_s3] sm:$0xff]   ;;  %v187_v16 = vld [vmem:[%s265_s3 + $0x8] sm:$0xff]   ;;  %v189_v18 = vld [vmem:[%s265_s3 + $0x18] sm:$0xff]  }
   0x3   :  { %27 = vadd.xlane.f32.xlu0 %v26_v2  ;;  %173 = vmatpush3.bf16.msra.mxu0 %v186_v14  ;;  %v159_v27 = vld [vmem:[%s266_s1] ss:$0 sm:$0xff] }
   0x4   :  { %174 = vmatprep.subr.bf16.mxu0 %v194_v15  ;;  %v160_v31 = vld [vmem:[%s267_s2] ss:$0 sm:$0xff] }
   0x5   :  { %v161_v36 = vld [vmem:[%s268_s4] ss:$0 sm:$0xff] }
   0x7   :  { %30 = vadd.xlane.f32.xlu0 %v29_v3  ;;  %175 = vmatpush3.bf16.msra.mxu0 %v187_v16 }
   0x8   :  { %176 = vmatprep.subr.bf16.mxu0 %v194_v15 }
   0xb   :  { %177 = vmatpush3.bf16.msra.mxu0 %v188_v17 }
   0xc   :  { %178 = vmatprep.subr.bf16.mxu0 %v194_v15 }
   0xf   :  { %179 = vmatpush3.bf16.msra.mxu0 %v189_v18 }
  0x90   :  { %v28_v4 = vpop.xlane.xlu0 %27 }
  0x91   :  { %v33_v5 = vmul.f32 0.015625, %v28_v4 }
  0x93   :  { %v35_v6 = vsub.f32 %v21_v0, %v33_v5 }
  0x94   :  { %v31_v7 = vpop.xlane.xlu0 %30 }
  0x95   :  { %v34_v8 = vmul.f32 0.015625, %v31_v7  ;;  %v37_v9 = vmul.f32 %v35_v6, %v35_v6 }
  0x97   :  { %v36_v10 = vsub.f32 %v22_v1, %v34_v8  ;;  %v39_v11 = vsel %vm25_vm0, %v37_v9, 0.0 }
  0x98   :  { %40 = vadd.xlane.f32.xlu1 %v39_v11 }
  0x99   :  { %v38_v12 = vmul.f32 %v36_v10, %v36_v10 }
  0x9b   :  { %v42_v13 = vsel %vm25_vm0, %v38_v12, 0.0 }
  0x9c   :  { %43 = vadd.xlane.f32.xlu1 %v42_v13 }
 0x125   :  { %v41_v19 = vpop.xlane.xlu1 %40 }
 0x126   :  { %v45_v20 = vmul.f32 0.015625, %v41_v19 }
 0x128   :  { %v47_v21 = vadd.f32 1e-05, %v45_v20 }
 0x129   :  { %v44_v22 = vpop.xlane.xlu1 %43 }
 0x12a   :  { %190 = vrsqrt.f32 %v47_v21  ;;  %v46_v23 = vmul.f32 0.015625, %v44_v22 }
 0x12c   :  { %v48_v24 = vadd.f32 1e-05, %v46_v23 }
 0x12e   :  { %192 = vrsqrt.f32 %v48_v24 }
 0x134   :  { %v191_v25 = vpop.eup %190 }
 0x135   :  { %v51_v26 = vmul.f32 %v191_v25, %v35_v6 }
 0x137   :  { %v59_v30 = vmul.f32 %v159_v27, %v51_v26 }
 0x138   :  { %v193_v28 = vpop.eup %192 }
 0x139   :  { %v52_v29 = vmul.f32 %v193_v28, %v36_v10  ;;  %v67_v33 = vadd.f32 %v160_v31, %v59_v30 }
 0x13b   :  { %v60_v32 = vmul.f32 %v159_v27, %v52_v29 }
 0x13d   :  { %v68_v34 = vadd.f32 %v160_v31, %v60_v32 }
 0x13f   :  { %v69_v35 = vpack.c.bf16 %v68_v34, %v67_v33 }
 0x141   :  { %181 = vmatmul.mubr.msk.bf16.vlgmr.msra.gmra.mrb[0].mxu0 %vm25_vm0, %v69_v35 }
 0x214   :  { %v146_v37 = vpop.f32.mrb[0].mxu0 }
 0x215   :  { %v147_v38 = vadd.f32 %v161_v36, %v146_v37  ;;  %v182_v39 = vpop.f32.mrb[1].mxu0 }
 0x216   :  { %v149_v40 = vpop.f32.mrb[2].mxu0 }
 0x217   :  { %153 = vst [vmem:[%s269_s5] sm:$0xff] %v147_v38  ;;  %v150_v41 = vadd.f32 %v161_v36, %v149_v40  ;;  %v183_v42 = vpop.f32.mrb[3].mxu0 }
 0x219   :  { %154 = vst [vmem:[%s269_s5 + $0x8] sm:$0xff] %v150_v41 }

// kernel: transformer_forward.21
= control target key start
LH: loop header
LB: loop body
LE: loop exit
PB: predicated region body
PF: predicated region fallthrough
CT: control target
= control target key end

     0   :  { %s1870_s17 = smov 0   ;;  %s2071_s0 = inlined_call_operand.vmem [shape: f32[2,8,64], index: 0, kind: input, shape index: {}]   ;;  %s2072_s1 = inlined_call_operand.vmem [shape: f32[2,16,64], index: 1, kind: input, shape index: {}]   ;;  %s2073_s2 = inlined_call_operand.vmem [shape: f32[2,1,16], index: 2, kind: input, shape index: {}]   ;;  %s2074_s3 = inlined_call_operand.vmem [shape: f32[1,64], index: 3, kind: input, shape index: {}]   ;;  %s2075_s4 = inlined_call_operand.vmem [shape: f32[1,64], index: 4, kind: input, shape index: {}]   ;;  %s2076_s5 = inlined_call_operand.vmem [shape: bf16[64,64], index: 5, kind: input, shape index: {}]   ;;  %s2077_s6 = inlined_call_operand.vmem [shape: f32[1,64], index: 6, kind: input, shape index: {}]   ;;  %s2078_s7 = inlined_call_operand.vmem [shape: bf16[64,128], index: 7, kind: input, shape index: {}]   ;;  %s2079_s8 = inlined_call_operand.vmem [shape: f32[1,128], index: 8, kind: input, shape index: {}]   ;;  %s2080_s9 = inlined_call_operand.vmem [shape: bf16[64,64], index: 9, kind: input, shape index: {}]   ;;  %s2081_s10 = inlined_call_operand.vmem [shape: f32[1,64], index: 10, kind: input, shape index: {}]   ;;  %s2082_s11 = inlined_call_operand.vmem [shape: f32[2,8,64], index: 11, kind: output, shape index: {}]  }
   0x1 LB: > { %s1500_s18 = sadd.s32 4294967295, %s1797_s17   ;;  %p1504_p0 = scmp.ge.s32.totalorder %s1797_s17, 1  ;;  %s1797_s17 = sphi %s1870_s17, %s21_s17  }
   0x2   : > { %p354_p1 = scmp.lt.s32.totalorder %s1797_s17, 3 }
   0x4   : > { %p355_p2 = pnand %p1504_p0, %p354_p1 }
   0x5   : > { %p400_p3 = scmp.lt.s32.totalorder (!%p355_p2), %s1500_s18, 1  ;;  %vm422_vm0 = vcmask (!%p355_p2), 523264   ;;  %v1761_v2 = vld [vmem:[%s2078_s7] sm:$0xff] (!%p355_p2)   ;;  %v1799_v3 = vmov (!%p355_p2), 0.0   ;;  %v1762_v4 = vld [vmem:[%s2078_s7 + $0x8] sm:$0xff] (!%p355_p2)   ;;  %v1763_v5 = vld [vmem:[%s2078_s7 + $0x10] sm:$0xff] (!%p355_p2)   ;;  %v621_v58 = vlaneseq (!%p355_p2) }
   0x6   : > { %358 = sbr.rel (%p355_p2) target bundleno = 2285 (0x8ed), region = 64  ;;  %1599 = vmatprep.subr.bf16.mxu1 (!%p355_p2), %v1799_v3  ;;  %1587 = vmatprep.subr.bf16.mxu0 (!%p355_p2), %v1799_v3  ;;  %v1764_v6 = vld [vmem:[%s2078_s7 + $0x18] sm:$0xff] (!%p355_p2)   ;;  %vm1800_vm1 = vmmov (!%p355_p2), 0   ;;  %v1765_v15 = vld [vmem:[%s2076_s5] sm:$0xff] (!%p355_p2)   ;;  %v1766_v16 = vld [vmem:[%s2076_s5 + $0x8] sm:$0xff] (!%p355_p2)   ;;  %v1801_v19 = vmov (!%p355_p2), 0.0|0.0  }
   0x7   : > { %1600 = vmatpush3.bf16.msra.mxu1 (!%p355_p2), %v1761_v2  ;;  %1607 = vmatprep.mubr.msk.bf16.mxu1 (!%p355_p2), %vm1800_vm1, %v1799_v3  ;;  %v1767_v17 = vld [vmem:[%s2076_s5 + $0x10] sm:$0xff] (!%p355_p2)   ;;  %v1768_v18 = vld [vmem:[%s2076_s5 + $0x18] sm:$0xff] (!%p355_p2)   ;;  %v1509_v24 = vld [vmem:[%s2074_s3] ss:$0 sm:$0xff] (!%p355_p2)  ;;  %vm626_vm2 = vcmask (!%p355_p2), 130048   ;;  %s1802_s14 = smov (!%p355_p2), 112  }
   0x8   : > { %1601 = vmatprep.subr.bf16.mxu1 (!%p355_p2), %v1799_v3  ;;  %1595 = vmatprep.mubr.msk.bf16.mxu0 (!%p355_p2), %vm1800_vm1, %v1799_v3  ;;  %v1510_v26 = vld [vmem:[%s2075_s4] ss:$0 sm:$0xff] (!%p355_p2)  ;;  %vm1951_vm3 = vmpackc.low (!%p355_p2), %vm626_vm2, %vm626_vm2  ;;  %v622_v60 = vshrl.u32 (!%p355_p2), %v621_v58, 7  ;;  %s1805_s24 = smov (!%p355_p2), 32   ;;  %s1806_s25 = smov (!%p355_p2), 80   ;;  %vm1337_vm6 = vcmask (!%p355_p2), 261120  }
   0x9   : > { %1588 = vmatpush3.bf16.msra.mxu0 (!%p355_p2), %v1765_v15  ;;  %v1517_v30 = vld [vmem:[%s2079_s8] ss:$0 sm:$0xff] (!%p355_p2)  ;;  %s1807_s26 = smov (!%p355_p2), 64   ;;  %s1808_s27 = smov (!%p355_p2), 16   ;;  %vm1339_vm7 = vcmask (!%p355_p2), 392192  }
   0xa   : > { %1589 = vmatprep.subr.bf16.mxu0 (!%p355_p2), %v1799_v3  ;;  %v1511_v43 = vld [vmem:[%s2077_s6] ss:$0 sm:$0xff] (!%p355_p2)  ;;  %v623_v63 = vsub.s32 (!%p355_p2), 0, %v622_v60  ;;  %s1809_s28 = smov (!%p355_p2), 48  }
   0xb   : > { %1602 = vmatpush3.bf16.msra.mxu1 (!%p355_p2), %v1762_v4 }
   0xc   : > { %1603 = vmatprep.subr.bf16.mxu1 (!%p355_p2), %v1799_v3 }
   0xd   : > { %s2086_s18 = smov (!%p400_p3, %s1500_s18), 1  ;;  %1590 = vmatpush3.bf16.msra.mxu0 %v1766_v16 }
   0xe   : > { %s1505_s19 = sshll.u32 %s2086_s18, 3  ;;  %s1547_s12 = sshll.u32 %s2086_s18, 4  ;;  %1591 = vmatprep.subr.bf16.mxu0 %v1799_v3 }
   0xf   : > { %s403_s22 = scalar_lea.vmem %s2071_s0, %s1505_s19  ;;  %1604 = vmatpush3.bf16.msra.mxu1 %v1763_v5  ;;  %s408_s15 = scalar_lea.vmem %s2072_s1, %s1547_s12 }
  0x10   : > { %v1886_v0 = vld [vmem:[%s403_s22] sm:$0xff]  ;;  %1605 = vmatprep.subr.bf16.mxu1 %v1799_v3  ;;  %v419_v13 = vld [vmem:[%s408_s15 + $0x8] sm:$0xff]  ;;  %s411_s23 = scalar_lea.vmem %s2073_s2, %s2086_s18 }
  0x11   : > { %v423_v1 = vsel %vm422_vm0, %v1886_v0, 0.0  ;;  %v418_v12 = vld [vmem:[%s408_s15] sm:$0xff]  ;;  %1592 = vmatpush3.bf16.msra.mxu0 %v1767_v17  ;;  %s1803_s15 = smov 96  }
  0x12   : > { %424 = vadd.xlane.f32.xlu0 %v423_v1  ;;  %v534_v14 = vpack.c.bf16 %v419_v13, %v418_v12  ;;  %1593 = vmatprep.subr.bf16.mxu0 %v1799_v3  ;;  %v618_v59 = vld [vmem:[%s411_s23] sm:$0x1]  ;;  %v1804_v1 = vmov 0  }
  0x13   : > { %1606 = vmatpush3.bf16.msra.mxu1 %v1764_v6  ;;  %vm619_vm4 = vcmp.gt.f32.partialorder %v618_v59, 0.0 }
  0x14   : > { %1683 = vmatprep.subr.bf16.mxu1 %v1801_v19  ;;  %v620_v2 = vsel %vm619_vm4, 1, %v1804_v1 }
  0x15   : > { %1594 = vmatpush3.bf16.msra.mxu0 %v1768_v18  ;;  %v1984_v4 = vrot.slane %v620_v2, %v623_v63 }
  0x16   : > { %1608 = vmatmul.mubr.msk.bf16.vlgmr.msra.gmra.mrb[0].mxu1 %vm422_vm0, %v534_v14  ;;  %1679 = vmatprep.subr.bf16.mxu0 %v1801_v19 }
  0x17   : > { %1622 = vmatprep.mubr.msk.f32.mxu1 %vm1800_vm1, %v1799_v3  ;;  %vm625_vm5 = vcmp.eq.s32.totalorder %v1984_v4, 1  ;;  %v1771_v4 = vld [vmem:[%s2080_s9 + $0x10] sm:$0xff]  }
  0x9f   : > { %v425_v7 = vpop.xlane.xlu0 %424 }
  0xa0   : > { %v427_v8 = vmul.f32 0.015625, %v425_v7 }
  0xa2   : > { %v428_v9 = vsub.f32 %v1886_v0, %v427_v8 }
  0xa4   : > { %v429_v10 = vmul.f32 %v428_v9, %v428_v9 }
  0xa6   : > { %v430_v11 = vsel %vm422_vm0, %v429_v10, 0.0 }
  0xa7   : > { %431 = vadd.xlane.f32.xlu0 %v430_v11 }
  0xe9   : > { %v611_v31 = vpop.f32.mrb[0].mxu1 }
  0xea   : > { %v612_v32 = vadd.f32 %v1517_v30, %v611_v31  ;;  %v1609_v33 = vpop.f32.mrb[1].mxu1 }
  0xeb   : > { %v614_v34 = vpop.f32.mrb[2].mxu1 }
  0xec   : > { %v615_v35 = vadd.f32 %v1517_v30, %v614_v34  ;;  %v1610_v36 = vpop.f32.mrb[3].mxu1 }
  0xee   : > { %v1955_v38 = vpack.i.bf16 %v615_v35, %v612_v32  ;;  %v1680_v39 = vpack.c.bf16 %v615_v35, %v612_v32 }
  0xf0   : > { %1727 = vrot.lane.b32.xlu1 %v1955_v38, %s1802_s14 }
  0xf4   : > { %1732 = vrot.lane.b32.xlu1 %v1955_v38, %s1803_s15 }
 0x134   : > { %v432_v20 = vpop.xlane.xlu0 %431 }
 0x135   : > { %v433_v21 = vmul.f32 0.015625, %v432_v20 }
 0x137   : > { %v434_v22 = vadd.f32 1e-05, %v433_v21 }
 0x139   : > { %1773 = vrsqrt.f32 %v434_v22 }
 0x143   : > { %v1774_v23 = vpop.eup %1773 }
 0x144   : > { %v436_v25 = vmul.f32 %v1774_v23, %v428_v9 }
 0x146   : > { %v443_v27 = vmul.f32 %v1509_v24, %v436_v25 }
 0x148   : > { %v450_v28 = vadd.f32 %v1510_v26, %v443_v27 }
 0x14a   : > { %v451_v29 = vpack.c.bf16 %v450_v28, %v450_v28 }
 0x14c   : > { %1596 = vmatmul.mubr.msk.bf16.vlgmr.msra.gmra.mrb[0].mxu0 %vm422_vm0, %v451_v29 }
 0x14d   : > { %1615 = vmatprep.mubr.msk.f32.mxu0 %vm1800_vm1, %v1799_v3  ;;  %1682 = vmatpush3.bf16.xpose.msk.msra.mxu0 %vm1951_vm3, %v1680_v39 }
 0x14e   : > { %1686 = vmatprep.subr.bf16.mxu0 %v1801_v19 }
 0x162   : > { %v1728_v40 = vpop.permute.xlu1 %1727 }
 0x163   : > { %v1730_v41 = vunpack.i.h.bf16 %v1728_v40  ;;  %v1729_v42 = vunpack.i.l.bf16 %v1728_v40 }
 0x165   : > { %v1687_v47 = vpack.c.bf16 %v1730_v41, %v1729_v42 }
 0x166   : > { %v1733_v50 = vpop.permute.xlu1 %1732 }
 0x167   : > { %v1735_v51 = vunpack.i.h.bf16 %v1733_v50  ;;  %v1734_v52 = vunpack.i.l.bf16 %v1733_v50 }
 0x169   : > { %v1694_v53 = vpack.c.bf16 %v1735_v51, %v1734_v52 }
 0x21f   : > { %v528_v44 = vpop.f32.mrb[0].mxu0 }
 0x220   : > { %v529_v45 = vadd.f32 %v1511_v43, %v528_v44  ;;  %v1597_v46 = vpop.f32.mrb[1].mxu0 }
 0x221   : > { %v531_v48 = vpop.f32.mrb[2].mxu0 }
 0x222   : > { %974 = vrot.lane.b32.xlu1 %v529_v45, %s1803_s15  ;;  %799 = vrot.lane.b32.xlu0 %v529_v45, %s1802_s14  ;;  %v1598_v49 = vpop.f32.mrb[3].mxu0 }
 0x223   : > { %1616 = vmatmul.mubr.msk.f32.vlgmr.msra.gmra.mrb[4].mxu0 %vm626_vm2, %v529_v45 }
 0x224   : > { %1689 = vmatpush3.bf16.xpose.msk.msra.mxu0 %vm1951_vm3, %v1687_v47  ;;  %1629 = vmatprep.mubr.msk.f32.mxu0 %vm1800_vm1, %v1799_v3 }
 0x225   : > { %1693 = vmatprep.subr.bf16.mxu0 %v1801_v19 }
 0x294   : > { %v800_v54 = vpop.permute.xlu0 %799  ;;  %v975_v55 = vpop.permute.xlu1 %974 }
 0x295   : > { %1630 = vmatmul.mubr.msk.f32.vlgmr.msra.gmra.mrb[6].mxu0 %vm626_vm2, %v800_v54 }
 0x296   : > { %1696 = vmatpush3.bf16.xpose.msk.msra.mxu0 %vm1951_vm3, %v1694_v53  ;;  %1643 = vmatprep.mubr.msk.f32.mxu0 %vm1800_vm1, %v1799_v3 }
 0x297   : > { %1697 = vmatprep.subr.bf16.mxu0 %v1801_v19 }
 0x29d   : > { %1644 = vmatmul.mubr.msk.f32.vlgmr.msra.gmra.mrb[8].mxu0 %vm626_vm2, %v975_v55 }
 0x29e   : > { %1650 = vmatprep.mubr.msk.f32.mxu0 %vm1800_vm1, %v1799_v3 }
 0x2f6   : > { %v702_v56 = vpop.f32.mrb[4].mxu0 }
 0x2f7   : > { %v1617_v57 = vpop.f32.mrb[5].mxu0  ;;  %v706_v10 = vmul.f32 0.25, %v702_v56 }
 0x2f9   : > { %v707_v11 = vsel %vm625_vm5, %v706_v10, -3.4028235e+38 }
 0x2fa   : > { %v708_v12 = vsel %vm626_vm2, %v707_v11, -inf }
 0x368   : > { %v877_v61 = vpop.f32.mrb[6].mxu0 }
 0x369   : > { %v1631_v62 = vpop.f32.mrb[7].mxu0  ;;  %v881_v23 = vmul.f32 0.25, %v877_v61 }
 0x36b   : > { %v882_v24 = vsel %vm625_vm5, %v881_v23, -3.4028235e+38  ;;  %v1770_v23 = vld [vmem:[%s2080_s9 + $0x8] sm:$0xff]  }
 0x36c   : > { %v883_v25 = vsel %vm626_vm2, %v882_v24, -inf }
 0x370   : > { %v1052_v5 = vpop.f32.mrb[8].mxu0 }
 0x371   : > { %v1056_v6 = vmul.f32 0.25, %v1052_v5  ;;  %v1645_v7 = vpop.f32.mrb[9].mxu0 }
 0x373   : > { %v1057_v8 = vsel %vm625_vm5, %v1056_v6, -3.4028235e+38 }
 0x374   : > { %v1058_v9 = vsel %vm626_vm2, %v1057_v8, -inf }
 0x375   : > { %1059 = vmax.xlane.f32.xlu1 %v1058_v9 }
 0x386   : > { %1737 = vrot.lane.b32.xlu1 %v1955_v38, %s1805_s24 }
 0x38a   : > { %1149 = vrot.lane.b32.xlu1 %v529_v45, %s1806_s25 }
 0x3ae   : > { %709 = vmax.xlane.f32.xlu1 %v708_v12 }
 0x402   : > { %v1060_v13 = vpop.xlane.xlu1 %1059 }
 0x403   : > { %v1061_v14 = vsub.f32 %v1057_v8, %v1060_v13 }
 0x405   : > { %v1062_v15 = vmul.f32 1.442695, %v1061_v14 }
 0x406   : > { %v1738_v16 = vpop.permute.xlu1 %1737 }
 0x407   : > { %1775 = vpow2.f32 %v1062_v15  ;;  %v1740_v17 = vunpack.i.h.bf16 %v1738_v16  ;;  %v1739_v18 = vunpack.i.l.bf16 %v1738_v16 }
 0x409   : > { %v1698_v20 = vpack.c.bf16 %v1740_v17, %v1739_v18 }
 0x40a   : > { %v1150_v34 = vpop.permute.xlu1 %1149 }
 0x40b   : > { %1699 = vmatpush3.bf16.msra.mxu0 %v1698_v20 }
 0x40c   : > { %1700 = vmatprep.subr.bf16.mxu0 %v1801_v19 }
 0x411   : > { %v1776_v21 = vpop.eup %1775 }
 0x412   : > { %v1064_v22 = vsel %vm626_vm2, %v1776_v21, 0.0 }
 0x413   : > { %1065 = vadd.xlane.f32.xlu0 %v1064_v22  ;;  %v1769_v22 = vld [vmem:[%s2080_s9] sm:$0xff]  }
 0x429   : > { %1742 = vrot.lane.b32.xlu0 %v1955_v38, %s1806_s25  ;;  %s415_s25 = scalar_lea.vmem %s2082_s11, %s1505_s19 }
 0x43b   : > { %v710_v35 = vpop.xlane.xlu1 %709 }
 0x43c   : > { %v711_v36 = vsub.f32 %v707_v11, %v710_v35  ;;  %v1539_v35 = vld [vmem:[%s2081_s10] ss:$0 sm:$0xff] }
 0x43e   : > { %v712_v40 = vmul.f32 1.442695, %v711_v36 }
 0x448   : > { %884 = vmax.xlane.f32.xlu0 %v883_v25 }
 0x4a0   : > { %v1066_v26 = vpop.xlane.xlu0 %1065 }
 0x4a1   : > { %1777 = vrcp.f32 %v1066_v26 }
 0x4a2   : > { %1779 = vpow2.f32 %v712_v40 }
 0x4a4   : > { %v1743_v27 = vpop.permute.xlu0 %1742 }
 0x4a5   : > { %v1745_v28 = vunpack.i.h.bf16 %v1743_v27  ;;  %v1744_v29 = vunpack.i.l.bf16 %v1743_v27 }
 0x4a7   : > { %v1701_v32 = vpack.c.bf16 %v1745_v28, %v1744_v29 }
 0x4ab   : > { %v1778_v30 = vpop.eup %1777 }
 0x4ac   : > { %v1068_v31 = vmul.f32 %v1778_v30, %v1776_v21  ;;  %v1780_v49 = vpop.eup %1779 }
 0x4ad   : > { %v714_v50 = vsel %vm626_vm2, %v1780_v49, 0.0 }
 0x4ae   : > { %v1069_v33 = vsel %vm625_vm5, %v1068_v31, 0.0 }
 0x4af   : > { %1651 = vmatmul.mubr.msk.f32.vlgmr.msra.gmra.mrb[10].mxu0 %vm626_vm2, %v1069_v33 }
 0x4b0   : > { %1703 = vmatpush3.bf16.xpose.msk.msra.mxu0 %vm1951_vm3, %v1701_v32  ;;  %1657 = vmatprep.mubr.msk.f32.mxu0 %vm1800_vm1, %v1799_v3 }
 0x4b7   : > { %1658 = vmatmul.mubr.msk.f32.vlgmr.msra.gmra.mrb[12].mxu0 %vm626_vm2, %v1150_v34 }
 0x4d5   : > { %v885_v39 = vpop.xlane.xlu0 %884 }
 0x4d6   : > { %v886_v41 = vsub.f32 %v882_v24, %v885_v39  ;;  %v1772_v24 = vld [vmem:[%s2080_s9 + $0x18] sm:$0xff]  }
 0x4d8   : > { %v887_v44 = vmul.f32 1.442695, %v886_v41 }
 0x4da   : > { %1781 = vpow2.f32 %v887_v44 }
 0x4e4   : > { %v1782_v51 = vpop.eup %1781 }
 0x4e5   : > { %v889_v52 = vsel %vm626_vm2, %v1782_v51, 0.0 }
 0x582   : > { %v1145_v42 = vpop.f32.mrb[10].mxu0 }
 0x583   : > { %v1652_v43 = vpop.f32.mrb[11].mxu0 }
 0x58a   : > { %v1227_v45 = vpop.f32.mrb[12].mxu0 }
 0x58b   : > { %v1231_v46 = vmul.f32 0.25, %v1227_v45  ;;  %v1659_v37 = vpop.f32.mrb[13].mxu0 }
 0x58d   : > { %v1232_v47 = vsel %vm625_vm5, %v1231_v46, -3.4028235e+38 }
 0x58e   : > { %v1233_v48 = vsel %vm626_vm2, %v1232_v47, -inf }
 0x58f   : > { %1234 = vmax.xlane.f32.xlu1 %v1233_v48 }
 0x593   : > { %715 = vadd.xlane.f32.xlu1 %v714_v50 }
 0x597   : > { %890 = vadd.xlane.f32.xlu1 %v889_v52 }
 0x5a8   : > { %1747 = vrot.lane.b32.xlu1 %v1955_v38, %s1807_s26 }
 0x5ac   : > { %1757 = vrot.lane.b32.xlu1 %v1955_v38, %s1808_s27 }
 0x61c   : > { %v1235_v53 = vpop.xlane.xlu1 %1234 }
 0x61d   : > { %v1236_v54 = vsub.f32 %v1232_v47, %v1235_v53 }
 0x61f   : > { %v1237_v55 = vmul.f32 1.442695, %v1236_v54 }
 0x620   : > { %v716_v56 = vpop.xlane.xlu1 %715 }
 0x621   : > { %1783 = vpow2.f32 %v1237_v55 }
 0x622   : > { %1785 = vrcp.f32 %v716_v56 }
 0x624   : > { %v891_v57 = vpop.xlane.xlu1 %890 }
 0x625   : > { %1787 = vrcp.f32 %v891_v57 }
 0x628   : > { %v1748_v58 = vpop.permute.xlu1 %1747 }
 0x629   : > { %v1750_v59 = vunpack.i.h.bf16 %v1748_v58  ;;  %v1749_v60 = vunpack.i.l.bf16 %v1748_v58 }
 0x62b   : > { %v1784_v61 = vpop.eup %1783  ;;  %v1684_v62 = vpack.c.bf16 %v1750_v59, %v1749_v60 }
 0x62c   : > { %v1786_v63 = vpop.eup %1785  ;;  %v1239_v1 = vsel %vm626_vm2, %v1784_v61, 0.0  ;;  %v1758_v8 = vpop.permute.xlu1 %1757 }
 0x62d   : > { %1240 = vadd.xlane.f32.xlu0 %v1239_v1  ;;  %1685 = vmatpush3.bf16.msra.mxu1 %v1684_v62  ;;  %v718_v2 = vmul.f32 %v1786_v63, %v1780_v49  ;;  %v1760_v12 = vunpack.i.h.bf16 %v1758_v8  ;;  %v1759_v13 = vunpack.i.l.bf16 %v1758_v8 }
 0x62e   : > { %1690 = vmatprep.subr.bf16.mxu1 %v1801_v19 }
 0x62f   : > { %v719_v5 = vsel %vm625_vm5, %v718_v2, 0.0  ;;  %v1788_v7 = vpop.eup %1787  ;;  %v1705_v17 = vpack.c.bf16 %v1760_v12, %v1759_v13 }
 0x630   : > { %1623 = vmatmul.mubr.msk.f32.vlgmr.msra.gmra.mrb[4].mxu1 %vm626_vm2, %v719_v5  ;;  %v893_v15 = vmul.f32 %v1788_v7, %v1782_v51 }
 0x631   : > { %1636 = vmatprep.mubr.msk.f32.mxu1 %vm1800_vm1, %v1799_v3 }
 0x643   : > { %1752 = vrot.lane.b32.xlu0 %v1955_v38, %s1809_s28  ;;  %v894_v38 = vsel %vm625_vm5, %v893_v15, 0.0 }
 0x647   : > { %1329 = vrot.lane.b32.xlu0 %v1145_v42, %s1805_s24 }
 0x6ba   : > { %v1241_v6 = vpop.xlane.xlu0 %1240 }
 0x6bb   : > { %1789 = vrcp.f32 %v1241_v6 }
 0x6be   : > { %v1753_v9 = vpop.permute.xlu0 %1752 }
 0x6bf   : > { %v1755_v10 = vunpack.i.h.bf16 %v1753_v9  ;;  %v1754_v11 = vunpack.i.l.bf16 %v1753_v9 }
 0x6c1   : > { %v1691_v14 = vpack.c.bf16 %v1755_v10, %v1754_v11 }
 0x6c3   : > { %1692 = vmatpush3.bf16.msra.mxu1 %v1691_v14 }
 0x6c4   : > { %1704 = vmatprep.subr.bf16.mxu1 %v1801_v19 }
 0x6c5   : > { %v1790_v16 = vpop.eup %1789 }
 0x6c6   : > { %1637 = vmatmul.mubr.msk.f32.vlgmr.msra.gmra.mrb[6].mxu1 %vm626_vm2, %v894_v38  ;;  %v1243_v18 = vmul.f32 %v1790_v16, %v1784_v61 }
 0x6c7   : > { %1706 = vmatpush3.bf16.msra.mxu1 %v1705_v17  ;;  %1664 = vmatprep.mubr.msk.f32.mxu1 %vm1800_vm1, %v1799_v3 }
 0x6c8   : > { %v1244_v20 = vsel %vm625_vm5, %v1243_v18, 0.0  ;;  %1667 = vmatprep.subr.bf16.mxu1 %v1799_v3 }
 0x6ca   : > { %1665 = vmatmul.mubr.msk.f32.vlgmr.msra.gmra.mrb[8].mxu1 %vm626_vm2, %v1244_v20 }
 0x6cb   : > { %1675 = vmatprep.mubr.msk.bf16.mxu1 %vm1800_vm1, %v1799_v3  ;;  %1668 = vmatpush3.bf16.msra.mxu1 %v1769_v22 }
 0x6cc   : > { %1669 = vmatprep.subr.bf16.mxu1 %v1799_v3 }
 0x6cf   : > { %1670 = vmatpush3.bf16.msra.mxu1 %v1770_v23 }
 0x6d0   : > { %1671 = vmatprep.subr.bf16.mxu1 %v1799_v3 }
 0x6d3   : > { %1672 = vmatpush3.bf16.msra.mxu1 %v1771_v4 }
 0x6d4   : > { %1673 = vmatprep.subr.bf16.mxu1 %v1799_v3  ;;  %v1330_v3 = vpop.permute.xlu0 %1329 }
 0x6d7   : > { %1674 = vmatpush3.bf16.msra.mxu1 %v1772_v24 }
 0x703   : > { %v795_v19 = vpop.f32.mrb[4].mxu1 }
 0x704   : > { %v1624_v21 = vpop.f32.mrb[5].mxu1 }
 0x799   : > { %v970_v25 = vpop.f32.mrb[6].mxu1 }
 0x79a   : > { %1325 = vrot.lane.b32.xlu1 %v970_v25, %s1808_s27  ;;  %v1638_v26 = vpop.f32.mrb[7].mxu1 }
 0x79d   : > { %v1320_v27 = vpop.f32.mrb[8].mxu1 }
 0x79e   : > { %1333 = vrot.lane.b32.xlu1 %v1320_v27, %s1809_s28  ;;  %v1666_v28 = vpop.f32.mrb[9].mxu1 }
 0x80c   : > { %v1326_v29 = vpop.permute.xlu1 %1325 }
 0x80d   : > { %v1336_v30 = vsel %vm626_vm2, %v795_v19, %v1326_v29 }
 0x80e   : > { %v1338_v31 = vsel %vm1337_vm6, %v1336_v30, %v1330_v3 }
 0x810   : > { %v1334_v32 = vpop.permute.xlu1 %1333 }
 0x811   : > { %v1340_v33 = vsel %vm1339_vm7, %v1338_v31, %v1334_v32 }
 0x812   : > { %v1341_v34 = vpack.c.bf16 %v1340_v33, %v1340_v33 }
 0x814   : > { %1676 = vmatmul.mubr.msk.bf16.vlgmr.msra.gmra.mrb[12].mxu1 %vm422_vm0, %v1341_v34 }
 0x8e7   : > { %v1418_v36 = vpop.f32.mrb[12].mxu1 }
 0x8e8   : > { %v1419_v39 = vadd.f32 %v1539_v35, %v1418_v36  ;;  %v1677_v40 = vpop.f32.mrb[13].mxu1 }
 0x8e9   : > { %v1421_v41 = vpop.f32.mrb[14].mxu1 }
 0x8ea   : > { %v1424_v42 = vadd.f32 %v1419_v39, %v1886_v0  ;;  %v1678_v43 = vpop.f32.mrb[15].mxu1 }
 0x8ec   : > { %1425 = vst.msk [vmem:[%s415_s25] sm:$0xff] %vm422_vm0, %v1424_v42 }
 0x8ed PF: > { %s21_s17 = sadd.s32 1, %s1797_s17  }
 0x8ee   : > { %p18_p4 = scmp.ge.s32.totalorder %s21_s17, 4  }
 0x8f0   :  { %20 = sbr.rel (!%p18_p4) target bundleno = 1 (0x1), region = 100 }

// kernel: transformer_forward.27
= control target key start
LH: loop header
LB: loop body
LE: loop exit
PB: predicated region body
PF: predicated region fallthrough
CT: control target
= control target key end

     0   :  { %v151_v2 = vmov 0   ;;  %s204_s0 = inlined_call_operand.vmem [shape: f32[16,128], index: 0, kind: input, shape index: {}]   ;;  %s205_s1 = inlined_call_operand.vmem [shape: s32[16,1], index: 1, kind: input, shape index: {}]   ;;  %s206_s2 = inlined_call_operand.hbm [shape: f32[1,1], index: 2, kind: output, shape index: {}]  }
   0x1   :  { %v18_v0 = vld [vmem:[%s204_s0] sm:$0xff]  ;;  %117 = vset.pattern.permute.xlu1 %v151_v2 }
   0x2   :  { %v175_v1 = vld [vmem:[%s205_s1] sm:$0xff]  ;;  %22 = vmax.xlane.f32.xlu0 %v18_v0 }
   0x3   :  { %7 = vsyncpa [#allocation3], 0  ;;  %v19_v3 = vld [vmem:[%s204_s0 + $0x8] sm:$0xff]  ;;  %53 = vperm.xlu1 %117, %v175_v1   ;;  %118 = vset.pattern.permute.xlu0 %v151_v2  ;;  %v50_v10 = vlaneseq  ;;  %vm16_vm2 = vcmask 0   ;;  %v152_v19 = vmov 0.0   ;;  %vm76_vm3 = vcmp.eq.s32.totalorder %v175_v1, 0 }
   0x4   :  { %v184_v4 = vld [vmem:[%s205_s1 + $0x8] sm:$0xff]  ;;  %17 = vst.msk [vmem:[#allocation2] sm:$0x1] %vm16_vm2, %v152_v19  ;;  %vm81_vm5 = vcmask 7168   ;;  %s153_s0 = smov [#allocation2]  }
   0x5   :  { %v51_v13 = vand.u32 127, %v50_v10  ;;  %vm77_vm4 = vcmp.eq.s32.totalorder %v184_v4, 0  ;;  %s106_s1 = sshll.u32 %s153_s0, 4  ;;  %s107_s1 = int_to_ptr.vmem [resolvable:$true] %s106_s1 }
   0x6   :  { %24 = vmax.xlane.f32.xlu0 %v19_v3  ;;  %s127_s17 = scalar_lea.vmem %s107_s1, 16  ;;  %s131_s18 = scalar_lea.vmem %s107_s1, 32 }
   0x7   :  { %56 = vperm.xlu1 %117, %v184_v4   ;;  %p128_p0 = scmp.ne.s32.totalorder %s107_s1, %s127_s17  ;;  %p132_p1 = scmp.lt.s32.totalorder %s107_s1, %s107_s1 }
   0x8   :  { %p133_p2 = scmp.lt.s32.totalorder %s131_s18, %s127_s17 }
   0xa   :  { %p134_p3 = por %p133_p2, %p132_p1 }
   0xb   :  { %v80_v56 = vld [vmem:[#allocation2] sm:$0x1] }
   0xc   :  { %p135_p4 = pnand %p134_p3, %p128_p0 }
  0x82   :  { %v54_v12 = vpop.permute.xlu1 %53 }
  0x83   :  { %vm58_vm0 = vcmp.eq.s32.totalorder %v51_v13, %v54_v12 }
  0x84   :  { %v60_v16 = vsel %vm58_vm0, %v18_v0, 0.0 }
  0x86   :  { %v57_v15 = vpop.permute.xlu1 %56 }
  0x87   :  { %vm59_vm1 = vcmp.eq.s32.totalorder %v51_v13, %v57_v15 }
  0x88   :  { %v61_v18 = vsel %vm59_vm1, %v19_v3, 0.0 }
  0x8f   :  { %v23_v5 = vpop.xlane.xlu0 %22 }
  0x90   :  { %v26_v6 = vsub.f32 %v18_v0, %v23_v5 }
  0x92   :  { %v28_v7 = vmul.f32 1.442695, %v26_v6 }
  0x93   :  { %v25_v8 = vpop.xlane.xlu0 %24 }
  0x94   :  { %119 = vpow2.f32 %v28_v7  ;;  %v27_v9 = vsub.f32 %v19_v3, %v25_v8 }
  0x96   :  { %v30_v11 = vmul.f32 1.442695, %v27_v9 }
  0x98   :  { %121 = vpow2.f32 %v30_v11 }
  0x9e   :  { %v120_v14 = vpop.eup %119 }
  0x9f   :  { %32 = vadd.xlane.f32.xlu0 %v120_v14 }
  0xa2   :  { %v122_v17 = vpop.eup %121 }
  0xa3   :  { %34 = vadd.xlane.f32.xlu1 %v122_v17  ;;  %62 = vadd.xlane.f32.xlu0 %v60_v16 }
  0xa7   :  { %64 = vadd.xlane.f32.xlu0 %v61_v18 }
  0xab   :  { %42 = vadd.xlane.f32.xlu0 %v18_v0 }
  0xaf   :  { %44 = vadd.xlane.f32.xlu0 %v19_v3 }
 0x12c   :  { %v33_v20 = vpop.xlane.xlu0 %32 }
 0x12d   :  { %123 = vlog2.f32 %v33_v20 }
 0x130   :  { %v35_v21 = vpop.xlane.xlu1 %34  ;;  %v63_v22 = vpop.xlane.xlu0 %62 }
 0x131   :  { %125 = vlog2.f32 %v35_v21 }
 0x134   :  { %v65_v23 = vpop.xlane.xlu0 %64 }
 0x137   :  { %v124_v24 = vpop.eup %123 }
 0x138   :  { %v37_v25 = vmul.f32 0.6931472, %v124_v24  ;;  %v43_v26 = vpop.xlane.xlu0 %42 }
 0x13a   :  { %v40_v27 = vadd.f32 %v37_v25, %v23_v5 }
 0x13b   :  { %v126_v28 = vpop.eup %125 }
 0x13c   :  { %v39_v29 = vmul.f32 0.6931472, %v126_v28  ;;  %v66_v30 = vsub.f32 %v63_v22, %v40_v27  ;;  %v46_v31 = vmul.f32 128.0, %v40_v27  ;;  %v45_v35 = vpop.xlane.xlu0 %44 }
 0x13e   :  { %v68_v32 = vmul.f32 0.8992126, %v66_v30  ;;  %v41_v33 = vadd.f32 %v39_v29, %v25_v8  ;;  %v48_v34 = vsub.f32 %v43_v26, %v46_v31 }
 0x140   :  { %v70_v36 = vsub.f32 -0.8095017, %v68_v32  ;;  %v67_v37 = vsub.f32 %v65_v23, %v41_v33  ;;  %v72_v38 = vmul.f32 0.0007874016, %v48_v34  ;;  %v47_v39 = vmul.f32 128.0, %v41_v33 }
 0x142   :  { %v69_v40 = vmul.f32 0.8992126, %v67_v37  ;;  %v74_v41 = vsub.f32 %v70_v36, %v72_v38  ;;  %v49_v42 = vsub.f32 %v45_v35, %v47_v39 }
 0x144   :  { %v71_v43 = vsub.f32 -0.8095017, %v69_v40  ;;  %v73_v44 = vmul.f32 0.0007874016, %v49_v42  ;;  %v78_v45 = vsel %vm76_vm3, 0.0, %v74_v41 }
 0x145   :  { %v82_v48 = vsel %vm81_vm5, %v78_v45, 0.0 }
 0x146   :  { %v75_v46 = vsub.f32 %v71_v43, %v73_v44 }
 0x148   :  { %v79_v47 = vsel %vm77_vm4, 0.0, %v75_v46 }
 0x149   :  { %v83_v49 = vsel %vm81_vm5, %v79_v47, 0.0 }
 0x14a   :  { %v84_v50 = vadd.f32 %v83_v49, %v82_v48 }
 0x14c   :  { %v85_v51 = vrot.slane %v84_v50, 4 }
 0x14e   :  { %v86_v52 = vadd.f32 %v85_v51, %v84_v50 }
 0x150   :  { %v87_v53 = vrot.slane %v86_v52, 2 }
 0x152   :  { %v88_v54 = vadd.f32 %v87_v53, %v86_v52 }
 0x154   :  { %v89_v55 = vrot.slane %v88_v54, 1 }
 0x156   :  { %v90_v57 = vadd.f32 %v89_v55, %v88_v54 }
 0x158   :  { %v91_v58 = vadd.f32 %v90_v57, %v80_v56 }
 0x15a   :  { %93 = vst.msk [vmem:[#allocation2] sm:$0x1] %vm16_vm2, %v91_v58 }
 0x161   :  { %v97_v59 = vld [vmem:[#allocation2] sm:$0x1] }
 0x162   :  { %v98_v60 = vmul.f32 0.5, %v97_v59 }
 0x164   :  { %99 = vst.msk [vmem:[#allocation2] sm:$0x1] %vm16_vm2, %v98_v60 }
 0x165   :  { %138 = shalt.err (!%p135_p4)
}
 0x166   :  { %s139_s21 = scalar_lea.hbm %s206_s2, 16 }
 0x167   :  { %p140_p5 = scmp.ne.s32.totalorder %s206_s2, %s139_s21  ;;  %p143_p6 = scmp.lt.u32.totalorder %s139_s21, %s206_s2 }
 0x169   :  { %p145_p7 = pnand %p143_p6, %p140_p5 }
 0x16b   :  { %148 = shalt.err (!%p145_p7)
}
 0x16c   :  { %109 = dma.vmem_to_hbm [thread:$0]  %s107_s1, 16, %s206_s2, [#allocation3]  }
 0x16d   :  { %149 = dma.done.wait [#allocation3], 16  }
 0x16e   :  { %150 = vsyncadd [#allocation3], 4294967280 }
 0x16f   :  { %113 = vsyncpa [#allocation3], 1 }

// kernel: transformer_forward.22
= control target key start
LH: loop header
LB: loop body
LE: loop exit
PB: predicated region body
PF: predicated region fallthrough
CT: control target
= control target key end

     0   :  { %s704_s24 = smov 0   ;;  %s785_s0 = inlined_call_operand.vmem [shape: f32[2,8,64], index: 0, kind: input, shape index: {}]   ;;  %s786_s1 = inlined_call_operand.vmem [shape: f32[1,64], index: 1, kind: input, shape index: {}]   ;;  %s787_s2 = inlined_call_operand.vmem [shape: f32[1,64], index: 2, kind: input, shape index: {}]   ;;  %s788_s3 = inlined_call_operand.vmem [shape: bf16[64,128], index: 3, kind: input, shape index: {}]   ;;  %s789_s4 = inlined_call_operand.vmem [shape: f32[1,128], index: 4, kind: input, shape index: {}]   ;;  %s790_s5 = inlined_call_operand.vmem [shape: bf16[128,64], index: 5, kind: input, shape index: {}]   ;;  %s791_s6 = inlined_call_operand.vmem [shape: f32[1,64], index: 6, kind: input, shape index: {}]   ;;  %s792_s7 = inlined_call_operand.vmem [shape: f32[2,8,64], index: 7, kind: output, shape index: {}]  }
   0x1 LB: > { %s558_s25 = sadd.s32 4294967295, %s660_s24   ;;  %p562_p0 = scmp.ge.s32.totalorder %s660_s24, 1  ;;  %s660_s24 = sphi %s704_s24, %s17_s24  }
   0x2   : > { %p236_p1 = scmp.lt.s32.totalorder %s660_s24, 3 }
   0x4   : > { %p237_p2 = pnand %p562_p0, %p236_p1 }
   0x5   : > { %p266_p3 = scmp.lt.s32.totalorder (!%p237_p2), %s558_s25, 1  ;;  %vm278_vm0 = vcmask (!%p237_p2), 523264   ;;  %v640_v7 = vld [vmem:[%s788_s3] sm:$0xff] (!%p237_p2)   ;;  %v662_v8 = vmov (!%p237_p2), 0.0   ;;  %v641_v9 = vld [vmem:[%s788_s3 + $0x8] sm:$0xff] (!%p237_p2)   ;;  %v642_v10 = vld [vmem:[%s788_s3 + $0x10] sm:$0xff] (!%p237_p2)  }
   0x6   : > { %240 = sbr.rel (%p237_p2) target bundleno = 767 (0x2ff), region = 48  ;;  %598 = vmatprep.subr.bf16.mxu0 (!%p237_p2), %v662_v8  ;;  %610 = vmatprep.subr.bf16.mxu1 (!%p237_p2), %v662_v8  ;;  %v643_v11 = vld [vmem:[%s788_s3 + $0x18] sm:$0xff] (!%p237_p2)   ;;  %vm663_vm1 = vmmov (!%p237_p2), 0   ;;  %v644_v12 = vld [vmem:[%s790_s5] sm:$0xff] (!%p237_p2)   ;;  %v645_v13 = vld [vmem:[%s790_s5 + $0x8] sm:$0xff] (!%p237_p2)  }
   0x7   : > { %599 = vmatpush3.bf16.msra.mxu0 (!%p237_p2), %v640_v7  ;;  %606 = vmatprep.mubr.msk.bf16.mxu0 (!%p237_p2), %vm663_vm1, %v662_v8  ;;  %v646_v14 = vld [vmem:[%s790_s5 + $0x10] sm:$0xff] (!%p237_p2)   ;;  %v647_v15 = vld [vmem:[%s790_s5 + $0x18] sm:$0xff] (!%p237_p2)   ;;  %v648_v16 = vld [vmem:[%s790_s5 + $0x20] sm:$0xff] (!%p237_p2)  }
   0x8   : > { %600 = vmatprep.subr.bf16.mxu0 (!%p237_p2), %v662_v8  ;;  %626 = vmatprep.mubr.msk.bf16.mxu1 (!%p237_p2), %vm663_vm1, %v662_v8  ;;  %v649_v17 = vld [vmem:[%s790_s5 + $0x28] sm:$0xff] (!%p237_p2)   ;;  %v565_v22 = vld [vmem:[%s786_s1] ss:$0 sm:$0xff] (!%p237_p2)  ;;  %v650_v28 = vld [vmem:[%s790_s5 + $0x30] sm:$0xff] (!%p237_p2)  }
   0x9   : > { %611 = vmatpush3.bf16.msra.mxu1 (!%p237_p2), %v644_v12  ;;  %v566_v24 = vld [vmem:[%s787_s2] ss:$0 sm:$0xff] (!%p237_p2)  ;;  %v651_v29 = vld [vmem:[%s790_s5 + $0x38] sm:$0xff] (!%p237_p2)  }
   0xa   : > { %612 = vmatprep.subr.bf16.mxu1 (!%p237_p2), %v662_v8  ;;  %v567_v30 = vld [vmem:[%s789_s4] ss:$0 sm:$0xff] (!%p237_p2) }
   0xb   : > { %601 = vmatpush3.bf16.msra.mxu0 (!%p237_p2), %v641_v9  ;;  %v573_v38 = vld [vmem:[%s791_s6] ss:$0 sm:$0xff] (!%p237_p2) }
   0xc   : > { %602 = vmatprep.subr.bf16.mxu0 (!%p237_p2), %v662_v8 }
   0xd   : > { %s794_s25 = smov (!%p266_p3, %s558_s25), 1  ;;  %613 = vmatpush3.bf16.msra.mxu1 %v645_v13 }
   0xe   : > { %s563_s26 = sshll.u32 %s794_s25, 3  ;;  %614 = vmatprep.subr.bf16.mxu1 %v662_v8 }
   0xf   : > { %s269_s29 = scalar_lea.vmem %s785_s0, %s563_s26  ;;  %603 = vmatpush3.bf16.msra.mxu0 %v642_v10  ;;  %s273_s21 = scalar_lea.vmem %s792_s7, %s563_s26 }
  0x10   : > { %v720_v0 = vld [vmem:[%s269_s29] sm:$0xff]  ;;  %604 = vmatprep.subr.bf16.mxu0 %v662_v8 }
  0x11   : > { %v279_v1 = vsel %vm278_vm0, %v720_v0, 0.0  ;;  %615 = vmatpush3.bf16.msra.mxu1 %v646_v14 }
  0x12   : > { %280 = vadd.xlane.f32.xlu0 %v279_v1  ;;  %616 = vmatprep.subr.bf16.mxu1 %v662_v8 }
  0x13   : > { %605 = vmatpush3.bf16.msra.mxu0 %v643_v11 }
  0x15   : > { %617 = vmatpush3.bf16.msra.mxu1 %v647_v15 }
  0x16   : > { %618 = vmatprep.subr.bf16.mxu1 %v662_v8 }
  0x19   : > { %619 = vmatpush3.bf16.msra.mxu1 %v648_v16 }
  0x1a   : > { %620 = vmatprep.subr.bf16.mxu1 %v662_v8 }
  0x1d   : > { %621 = vmatpush3.bf16.msra.mxu1 %v649_v17 }
  0x1e   : > { %622 = vmatprep.subr.bf16.mxu1 %v662_v8 }
  0x21   : > { %623 = vmatpush3.bf16.msra.mxu1 %v650_v28 }
  0x22   : > { %624 = vmatprep.subr.bf16.mxu1 %v662_v8 }
  0x25   : > { %625 = vmatpush3.bf16.msra.mxu1 %v651_v29 }
  0x9f   : > { %v281_v2 = vpop.xlane.xlu0 %280 }
  0xa0   : > { %v283_v3 = vmul.f32 0.015625, %v281_v2 }
  0xa2   : > { %v284_v4 = vsub.f32 %v720_v0, %v283_v3 }
  0xa4   : > { %v285_v5 = vmul.f32 %v284_v4, %v284_v4 }
  0xa6   : > { %v286_v6 = vsel %vm278_vm0, %v285_v5, 0.0 }
  0xa7   : > { %287 = vadd.xlane.f32.xlu0 %v286_v6 }
 0x134   : > { %v288_v18 = vpop.xlane.xlu0 %287 }
 0x135   : > { %v289_v19 = vmul.f32 0.015625, %v288_v18 }
 0x137   : > { %v290_v20 = vadd.f32 1e-05, %v289_v19 }
 0x139   : > { %652 = vrsqrt.f32 %v290_v20 }
 0x143   : > { %v653_v21 = vpop.eup %652 }
 0x144   : > { %v292_v23 = vmul.f32 %v653_v21, %v284_v4 }
 0x146   : > { %v299_v25 = vmul.f32 %v565_v22, %v292_v23 }
 0x148   : > { %v306_v26 = vadd.f32 %v566_v24, %v299_v25 }
 0x14a   : > { %v307_v27 = vpack.c.bf16 %v306_v26, %v306_v26 }
 0x14c   : > { %607 = vmatmul.mubr.msk.bf16.vlgmr.msra.gmra.mrb[0].mxu0 %vm278_vm0, %v307_v27 }
 0x21f   : > { %v384_v31 = vpop.f32.mrb[0].mxu0 }
 0x220   : > { %v385_v32 = vadd.f32 %v567_v30, %v384_v31  ;;  %v608_v33 = vpop.f32.mrb[1].mxu0 }
 0x221   : > { %v387_v34 = vpop.f32.mrb[2].mxu0 }
 0x222   : > { %v390_v35 = vmax.f32 %v385_v32, 0.0  ;;  %v609_v36 = vpop.f32.mrb[3].mxu0 }
 0x224   : > { %v391_v37 = vpack.c.bf16 %v390_v35, %v390_v35 }
 0x226   : > { %627 = vmatmul.mubr.bf16.vlgmr.msra.gmra.mrb[0].mxu1 %v391_v37 }
 0x2f9   : > { %v497_v39 = vpop.f32.mrb[0].mxu1 }
 0x2fa   : > { %v498_v40 = vadd.f32 %v573_v38, %v497_v39  ;;  %v628_v41 = vpop.f32.mrb[1].mxu1 }
 0x2fb   : > { %v500_v42 = vpop.f32.mrb[2].mxu1 }
 0x2fc   : > { %v503_v43 = vadd.f32 %v498_v40, %v720_v0  ;;  %v629_v44 = vpop.f32.mrb[3].mxu1 }
 0x2fe   : > { %504 = vst.msk [vmem:[%s273_s21] sm:$0xff] %vm278_vm0, %v503_v43 }
 0x2ff PF: > { %s17_s24 = sadd.s32 1, %s660_s24  }
 0x300   : > { %p14_p4 = scmp.ge.s32.totalorder %s17_s24, 4  }
 0x302   :  { %16 = sbr.rel (!%p14_p4) target bundleno = 1 (0x1), region = 78 }

</bundles_post_ra>
